<compile_context>
chip_gen: v7x
topology: tpu7x:2x2x1
jax: 0.10.0
libtpu: 0.0.40
codegen_flags: <defaults>
</compile_context>

<pallas_src>
import functools

import jax
import jax.numpy as jnp
import numpy as np
from jax.experimental import pallas as pl
from jax.experimental.pallas import tpu as pltpu


def _round_up(n, m):
    return ((n + m - 1) // m) * m


# ----------------------------------------------------------------------------
# Fused kernel: per time-chunk, run every LSTM layer and the FC projection.
# Scratch:
#   state_ref: (L, 2, Bp, Hp) f32  persistent h/c across grid steps
#   gx_sc:     (chunk, Bp, 4*Hp)   per-chunk input projection (reused per layer)
#   h_sc:      (chunk, Bp, Hp)     per-chunk hidden states (reused per layer)
# ----------------------------------------------------------------------------
def _make_fused_kernel(num_layers, chunk, bp, hp, vp):
    def kernel(*refs):
        x_ref = refs[0]
        layer_refs = refs[1:1 + 3 * num_layers]
        fcw_ref = refs[1 + 3 * num_layers]
        fcb_ref = refs[2 + 3 * num_layers]
        out_ref = refs[3 + 3 * num_layers]
        state_ref, gx_sc, h_sc = refs[4 + 3 * num_layers:]

        @pl.when(pl.program_id(0) == 0)
        def _():
            state_ref[...] = jnp.zeros_like(state_ref)

        cur = x_ref[...]                                   # (chunk, Bp, Fin) f32
        for l in range(num_layers):
            wih = layer_refs[3 * l][...]                   # (Fin, 4Hp) bf16
            whh = layer_refs[3 * l + 1][...]               # (Hp, 4Hp) bf16
            bias = layer_refs[3 * l + 2][...]              # (1, 4Hp) f32

            # Phase 1 (per chunk): batched input projection on the MXU.
            fin = cur.shape[-1]
            inp = cur.reshape(chunk * bp, fin).astype(jnp.bfloat16)
            gx = jnp.dot(inp, wih, preferred_element_type=jnp.float32) + bias
            gx_sc[...] = gx.reshape(chunk, bp, 4 * hp)

            # Phase 2: serial recurrence; only h @ W_hh on the critical path.
            def step(t, carry, whh=whh):
                h, c = carry
                gates = gx_sc[t] + jnp.dot(
                    h.astype(jnp.bfloat16), whh,
                    preferred_element_type=jnp.float32)
                sig = jax.nn.sigmoid(gates[:, : 3 * hp])   # [i|f|o] slab
                g_g = jnp.tanh(gates[:, 3 * hp:])          # g slab
                i_g = sig[:, :hp]
                f_g = sig[:, hp: 2 * hp]
                o_g = sig[:, 2 * hp:]
                c_new = f_g * c + i_g * g_g
                h_new = o_g * jnp.tanh(c_new)
                h_sc[t] = h_new
                return h_new, c_new

            h0 = state_ref[l, 0]
            c0 = state_ref[l, 1]
            h_fin, c_fin = jax.lax.fori_loop(0, chunk, step, (h0, c0),
                                             unroll=True)
            state_ref[l, 0] = h_fin
            state_ref[l, 1] = c_fin

            cur = h_sc[...]                                # input to next layer

        # Fused FC on this chunk's hidden states (no HBM round trip).
        hs = cur.reshape(chunk * bp, hp).astype(jnp.bfloat16)
        logits = jnp.dot(hs, fcw_ref[...],
                         preferred_element_type=jnp.float32) + fcb_ref[...]
        out_ref[...] = logits.reshape(chunk, bp, vp)

    return kernel


def _vmem_limit_bytes(num_layers, chunk, bp, ep, hp, vp):
    f32, bf16 = 4, 2
    total = 0
    total += 2 * chunk * bp * ep * f32            # x chunk (double buffered)
    total += 2 * chunk * bp * vp * f32            # logits chunk (double buffered)
    total += num_layers * 2 * bp * hp * f32       # persistent h/c
    total += chunk * bp * 4 * hp * f32            # gx scratch
    total += chunk * bp * hp * f32                # h scratch
    total += 2 * ep * 4 * hp * bf16               # layer-0 W_ih
    total += 2 * (num_layers - 1) * hp * 4 * hp * bf16
    total += 2 * num_layers * hp * 4 * hp * bf16  # W_hh
    total += 2 * num_layers * 4 * hp * f32        # biases
    total += 2 * (hp * vp * bf16 + vp * f32)      # FC
    return int(min(100 << 20, max(32 << 20, 2 * total)))


# ----------------------------------------------------------------------------
# Parameter preparation: lane-dense zero padding + gate reorder
# (PyTorch i,f,g,o -> kernel i,f,o,g), matmul weights cast to bf16.
# ----------------------------------------------------------------------------
def _pad2(x, rows, cols, dtype):
    out = jnp.zeros((rows, cols), dtype)
    return out.at[: x.shape[0], : x.shape[1]].set(x.astype(dtype))


def _pack_gate_weight(w, rows_p, hp, dtype):
    f_in, four_h = w.shape
    h = four_h // 4
    out = jnp.zeros((rows_p, 4 * hp), dtype)
    out = out.at[:f_in, 0 * hp: 0 * hp + h].set(w[:, 0 * h: 1 * h].astype(dtype))  # i
    out = out.at[:f_in, 1 * hp: 1 * hp + h].set(w[:, 1 * h: 2 * h].astype(dtype))  # f
    out = out.at[:f_in, 2 * hp: 2 * hp + h].set(w[:, 3 * h: 4 * h].astype(dtype))  # o
    out = out.at[:f_in, 3 * hp: 3 * hp + h].set(w[:, 2 * h: 3 * h].astype(dtype))  # g
    return out


def prepare_padded_params(params, *, weight_dtype=jnp.bfloat16):
    emb = params["embedding"]
    vocab, e_dim = emb.shape
    h_dim = params["lstm"][0]["w_hh"].shape[0]
    v_dim = params["fc_w"].shape[1]
    ep = _round_up(e_dim, 128)
    hp = _round_up(h_dim, 128)
    vp = _round_up(v_dim, 128)

    pp = {"embedding": _pad2(emb, vocab, ep, jnp.float32), "lstm": []}
    in_p = ep
    for layer in params["lstm"]:
        pp["lstm"].append({
            "w_ih": _pack_gate_weight(layer["w_ih"], in_p, hp, weight_dtype),
            "w_hh": _pack_gate_weight(layer["w_hh"], hp, hp, weight_dtype),
            "bias": _pack_gate_weight(layer["bias"], 1, hp, jnp.float32),
        })
        in_p = hp
    pp["fc_w"] = _pad2(params["fc_w"], hp, vp, weight_dtype)
    pp["fc_b"] = _pad2(params["fc_b"], 1, vp, jnp.float32)
    return pp


# ----------------------------------------------------------------------------
# Full model forward.
# ----------------------------------------------------------------------------
def lstm_protein_generator_forward(token_ids, pp, *, vocab_size, chunk=8):
    """token_ids: (B, T) int32 -> logits (B, T, vocab_size)."""
    B, T = token_ids.shape
    bp = _round_up(B, 8)
    t_pad = _round_up(T, chunk)
    ep = pp["embedding"].shape[1]
    hp = pp["lstm"][0]["w_hh"].shape[0]
    vp = pp["fc_w"].shape[1]
    num_layers = len(pp["lstm"])

    # Embedding lookup, directly time-major (only the tiny id matrix is
    # transposed, never the activations).
    ids_t = token_ids.T                                     # (T, B)
    x = jnp.take(pp["embedding"], ids_t, axis=0)            # (T, B, Ep)
    x = jnp.pad(x, ((0, t_pad - T), (0, bp - B), (0, 0))).astype(jnp.float32)

    weight_args = []
    in_specs = [pl.BlockSpec((chunk, bp, ep), lambda t: (t, 0, 0))]
    for layer in pp["lstm"]:
        for name in ("w_ih", "w_hh", "bias"):
            w = layer[name]
            weight_args.append(w)
            in_specs.append(pl.BlockSpec(w.shape, lambda t: (0, 0)))
    for w in (pp["fc_w"], pp["fc_b"]):
        weight_args.append(w)
        in_specs.append(pl.BlockSpec(w.shape, lambda t: (0, 0)))

    kernel = _make_fused_kernel(num_layers, chunk, bp, hp, vp)

    logits_tm = pl.pallas_call(
        kernel,
        out_shape=jax.ShapeDtypeStruct((t_pad, bp, vp), jnp.float32),
        grid=(t_pad // chunk,),
        in_specs=in_specs,
        out_specs=pl.BlockSpec((chunk, bp, vp), lambda t: (t, 0, 0)),
        scratch_shapes=[
            pltpu.VMEM((num_layers, 2, bp, hp), jnp.float32),
            pltpu.VMEM((chunk, bp, 4 * hp), jnp.float32),
            pltpu.VMEM((chunk, bp, hp), jnp.float32),
        ],
        compiler_params=pltpu.CompilerParams(
            dimension_semantics=("arbitrary",),
            vmem_limit_bytes=_vmem_limit_bytes(
                num_layers, chunk, bp, ep, hp, vp)),
    )(x, *weight_args)

    # Strip time/batch/vocab padding; final transpose is tiny.
    return jnp.transpose(logits_tm[:T, :B, :vocab_size], (1, 0, 2))


# ----------------------------------------------------------------------------
# PyTorch-style parameter init (unpadded, gate order i,f,g,o; combined bias).
# ----------------------------------------------------------------------------
def init_params(key, vocab_size, embedding_dim, hidden_dim, num_layers):
    keys = jax.random.split(key, 2 + 4 * num_layers + 2)
    k = iter(keys)
    bound = 1.0 / np.sqrt(hidden_dim)

    params = {
        "embedding": jax.random.normal(
            next(k), (vocab_size, embedding_dim), jnp.float32),
        "lstm": [],
    }
    in_dim = embedding_dim
    for _ in range(num_layers):
        w_ih = jax.random.uniform(next(k), (in_dim, 4 * hidden_dim),
                                  jnp.float32, -bound, bound)
        w_hh = jax.random.uniform(next(k), (hidden_dim, 4 * hidden_dim),
                                  jnp.float32, -bound, bound)
        b_ih = jax.random.uniform(next(k), (1, 4 * hidden_dim),
                                  jnp.float32, -bound, bound)
        b_hh = jax.random.uniform(next(k), (1, 4 * hidden_dim),
                                  jnp.float32, -bound, bound)
        params["lstm"].append(
            {"w_ih": w_ih, "w_hh": w_hh, "bias": b_ih + b_hh})
        in_dim = hidden_dim

    params["fc_w"] = jax.random.uniform(next(k), (hidden_dim, vocab_size),
                                        jnp.float32, -bound, bound)
    params["fc_b"] = jax.random.uniform(next(k), (1, vocab_size),
                                        jnp.float32, -bound, bound)
    return params


# ----------------------------------------------------------------------------
# Pure-JAX f32 reference (unpadded, PyTorch gate order).
# ----------------------------------------------------------------------------
def reference_forward(token_ids, params):
    B, T = token_ids.shape
    x = jnp.take(params["embedding"], token_ids, axis=0)  # (B, T, E)
    for layer in params["lstm"]:
        H = layer["w_hh"].shape[0]
        h = jnp.zeros((B, H), jnp.float32)
        c = jnp.zeros((B, H), jnp.float32)
        outs = []
        for t in range(T):
            gates = x[:, t, :] @ layer["w_ih"] + h @ layer["w_hh"] + layer["bias"]
            i_g = jax.nn.sigmoid(gates[:, 0 * H:1 * H])
            f_g = jax.nn.sigmoid(gates[:, 1 * H:2 * H])
            g_g = jnp.tanh(gates[:, 2 * H:3 * H])
            o_g = jax.nn.sigmoid(gates[:, 3 * H:4 * H])
            c = f_g * c + i_g * g_g
            h = o_g * jnp.tanh(c)
            outs.append(h)
        x = jnp.stack(outs, axis=1)  # (B, T, H)
    return x @ params["fc_w"] + params["fc_b"]


if __name__ == "__main__":
    vocab_size, embedding_dim, hidden_dim, num_layers = 24, 32, 32, 2
    batch, seq = 2, 8

    key = jax.random.PRNGKey(0)
    p_key, d_key = jax.random.split(key)
    params = init_params(p_key, vocab_size, embedding_dim, hidden_dim,
                         num_layers)
    padded = prepare_padded_params(params)
    token_ids = jax.random.randint(d_key, (batch, seq), 0, vocab_size,
                                   dtype=jnp.int32)

    fwd = jax.jit(functools.partial(lstm_protein_generator_forward,
                                    vocab_size=vocab_size))
    logits = fwd(token_ids, padded)
    jax.block_until_ready(logits)

    # Tolerance sized for bf16 matmul operands (f32 accumulation/state).
    ref = reference_forward(token_ids, params)
    np.testing.assert_allclose(np.asarray(logits), np.asarray(ref),
                               rtol=5e-2, atol=5e-2)
    assert logits.shape == (batch, seq, vocab_size)
    print("KERNEL_OK")
</pallas_src>

<mosaic_0001>
module attributes {stable_mosaic.version = 11 : i64} {
  func.func @kernel(%arg0: i32, %arg1: memref<8x8x128xf32, #tpu.memory_space<vmem>>, %arg2: memref<128x512xbf16, #tpu.memory_space<vmem>>, %arg3: memref<128x512xbf16, #tpu.memory_space<vmem>>, %arg4: memref<1x512xf32, #tpu.memory_space<vmem>>, %arg5: memref<128x512xbf16, #tpu.memory_space<vmem>>, %arg6: memref<128x512xbf16, #tpu.memory_space<vmem>>, %arg7: memref<1x512xf32, #tpu.memory_space<vmem>>, %arg8: memref<128x128xbf16, #tpu.memory_space<vmem>>, %arg9: memref<1x128xf32, #tpu.memory_space<vmem>>, %arg10: memref<8x8x128xf32, #tpu.memory_space<vmem>>, %arg11: memref<2x2x8x128xf32, #tpu.memory_space<vmem>>, %arg12: memref<8x8x512xf32, #tpu.memory_space<vmem>>, %arg13: memref<8x8x128xf32, #tpu.memory_space<vmem>>) attributes {dimension_semantics = [#tpu.dimension_semantics<arbitrary>], iteration_bounds = array<i64: 1>, scalar_prefetch = 0 : i64, scratch_operands = 3 : i64, tpu.core_type = #tpu.core_type<tc>, window_params = [{transform_indices = @transform_0, window_bounds = array<i64: 8, 8, 128>}, {pipeline_mode = #tpu.pipeline_mode<synchronous>, transform_indices = @transform_1, window_bounds = array<i64: 128, 512>}, {pipeline_mode = #tpu.pipeline_mode<synchronous>, transform_indices = @transform_2, window_bounds = array<i64: 128, 512>}, {pipeline_mode = #tpu.pipeline_mode<synchronous>, transform_indices = @transform_3, window_bounds = array<i64: 1, 512>}, {pipeline_mode = #tpu.pipeline_mode<synchronous>, transform_indices = @transform_4, window_bounds = array<i64: 128, 512>}, {pipeline_mode = #tpu.pipeline_mode<synchronous>, transform_indices = @transform_5, window_bounds = array<i64: 128, 512>}, {pipeline_mode = #tpu.pipeline_mode<synchronous>, transform_indices = @transform_6, window_bounds = array<i64: 1, 512>}, {pipeline_mode = #tpu.pipeline_mode<synchronous>, transform_indices = @transform_7, window_bounds = array<i64: 128, 128>}, {pipeline_mode = #tpu.pipeline_mode<synchronous>, transform_indices = @transform_8, window_bounds = array<i64: 1, 128>}, {transform_indices = @transform_9, window_bounds = array<i64: 8, 8, 128>}]} {
    %c0_i32 = arith.constant 0 : i32
    %0 = arith.cmpi eq, %arg0, %c0_i32 : i32
    %1 = arith.extui %0 : i1 to i32
    %c0_i32_0 = arith.constant 0 : i32
    %2 = arith.cmpi ne, %1, %c0_i32_0 : i32
    scf.if %2 {
      %cst_173 = arith.constant 0.000000e+00 : f32
      %471 = vector.broadcast %cst_173 : f32 to vector<2x2x8x128xf32>
      %c0_174 = arith.constant 0 : index
      %c0_175 = arith.constant 0 : index
      %c0_176 = arith.constant 0 : index
      %c0_177 = arith.constant 0 : index
      %472 = vector.load %arg11[%c0_174, %c0_175, %c0_176, %c0_177] : memref<2x2x8x128xf32, #tpu.memory_space<vmem>>, vector<2x2x8x128xf32>
      tpu.vector_store %arg11[%c0_174, %c0_175, %c0_176, %c0_177], %471 {strides = array<i32>} : memref<2x2x8x128xf32, #tpu.memory_space<vmem>>, vector<2x2x8x128xf32>,
    } else {
    }
    %c0 = arith.constant 0 : index
    %c0_1 = arith.constant 0 : index
    %c0_2 = arith.constant 0 : index
    %3 = vector.load %arg1[%c0, %c0_1, %c0_2] : memref<8x8x128xf32, #tpu.memory_space<vmem>>, vector<8x8x128xf32>
    %c0_3 = arith.constant 0 : index
    %c0_4 = arith.constant 0 : index
    %4 = vector.load %arg2[%c0_3, %c0_4] : memref<128x512xbf16, #tpu.memory_space<vmem>>, vector<128x512xbf16>
    %c0_5 = arith.constant 0 : index
    %c0_6 = arith.constant 0 : index
    %5 = vector.load %arg3[%c0_5, %c0_6] : memref<128x512xbf16, #tpu.memory_space<vmem>>, vector<128x512xbf16>
    %c0_7 = arith.constant 0 : index
    %c0_8 = arith.constant 0 : index
    %6 = vector.load %arg4[%c0_7, %c0_8] : memref<1x512xf32, #tpu.memory_space<vmem>>, vector<1x512xf32>
    %7 = vector.shape_cast %3 : vector<8x8x128xf32> to vector<64x128xf32>
    %8 = arith.truncf %7 : vector<64x128xf32> to vector<64x128xbf16>
    %cst = arith.constant dense<0.000000e+00> : vector<64x512xf32>
    %9 = tpu.matmul %8, %4, %cst {dimension_numbers = #tpu.dot_dimension_numbers<[1], [0], [0], [1], [0, 0, 1, 1], [], []>} : vector<64x128xbf16>, vector<128x512xbf16>, vector<64x512xf32> -> vector<64x512xf32>
    %10 = vector.broadcast %6 : vector<1x512xf32> to vector<64x512xf32>
    %11 = arith.addf %9, %10 : vector<64x512xf32>
    %12 = vector.shape_cast %11 : vector<64x512xf32> to vector<8x8x512xf32>
    %c0_9 = arith.constant 0 : index
    %c0_10 = arith.constant 0 : index
    %c0_11 = arith.constant 0 : index
    %13 = vector.load %arg12[%c0_9, %c0_10, %c0_11] : memref<8x8x512xf32, #tpu.memory_space<vmem>>, vector<8x8x512xf32>
    tpu.vector_store %arg12[%c0_9, %c0_10, %c0_11], %12 {strides = array<i32>} : memref<8x8x512xf32, #tpu.memory_space<vmem>>, vector<8x8x512xf32>,
    %c0_12 = arith.constant 0 : index
    %c0_13 = arith.constant 0 : index
    %c0_14 = arith.constant 0 : index
    %c0_15 = arith.constant 0 : index
    %14 = vector.load %arg11[%c0_12, %c0_13, %c0_14, %c0_15] : memref<2x2x8x128xf32, #tpu.memory_space<vmem>>, vector<1x1x8x128xf32>
    %15 = vector.shape_cast %14 : vector<1x1x8x128xf32> to vector<8x128xf32>
    %c0_16 = arith.constant 0 : index
    %c1 = arith.constant 1 : index
    %c0_17 = arith.constant 0 : index
    %c0_18 = arith.constant 0 : index
    %16 = vector.load %arg11[%c0_16, %c1, %c0_17, %c0_18] : memref<2x2x8x128xf32, #tpu.memory_space<vmem>>, vector<1x1x8x128xf32>
    %17 = vector.shape_cast %16 : vector<1x1x8x128xf32> to vector<8x128xf32>
    %c0_i32_19 = arith.constant 0 : i32
    %18 = arith.index_cast %c0_i32_19 : i32 to index
    %c0_20 = arith.constant 0 : index
    %c0_21 = arith.constant 0 : index
    %19 = vector.load %arg12[%18, %c0_20, %c0_21] : memref<8x8x512xf32, #tpu.memory_space<vmem>>, vector<1x8x512xf32>
    %20 = vector.shape_cast %19 : vector<1x8x512xf32> to vector<8x512xf32>
    %21 = arith.truncf %15 : vector<8x128xf32> to vector<8x128xbf16>
    %cst_22 = arith.constant dense<0.000000e+00> : vector<8x512xf32>
    %22 = tpu.matmul %21, %5, %cst_22 {dimension_numbers = #tpu.dot_dimension_numbers<[1], [0], [0], [1], [0, 0, 1, 1], [], []>} : vector<8x128xbf16>, vector<128x512xbf16>, vector<8x512xf32> -> vector<8x512xf32>
    %23 = arith.addf %20, %22 : vector<8x512xf32>
    %24 = vector.extract_strided_slice %23 {offsets = [0, 0], sizes = [8, 384], strides = [1, 1]} : vector<8x512xf32> to vector<8x384xf32>
    %25 = arith.negf %24 : vector<8x384xf32>
    %26 = math.exp %25 : vector<8x384xf32>
    %cst_23 = arith.constant 1.000000e+00 : f32
    %27 = vector.broadcast %cst_23 : f32 to vector<8x384xf32>
    %28 = arith.addf %27, %26 : vector<8x384xf32>
    %29 = arith.divf %27, %28 : vector<8x384xf32>
    %30 = vector.extract_strided_slice %23 {offsets = [0, 384], sizes = [8, 128], strides = [1, 1]} : vector<8x512xf32> to vector<8x128xf32>
    %31 = math.tanh %30 : vector<8x128xf32>
    %32 = vector.extract_strided_slice %29 {offsets = [0, 0], sizes = [8, 128], strides = [1, 1]} : vector<8x384xf32> to vector<8x128xf32>
    %33 = vector.extract_strided_slice %29 {offsets = [0, 128], sizes = [8, 128], strides = [1, 1]} : vector<8x384xf32> to vector<8x128xf32>
    %34 = vector.extract_strided_slice %29 {offsets = [0, 256], sizes = [8, 128], strides = [1, 1]} : vector<8x384xf32> to vector<8x128xf32>
    %35 = arith.mulf %33, %17 : vector<8x128xf32>
    %36 = arith.mulf %32, %31 : vector<8x128xf32>
    %37 = arith.addf %35, %36 : vector<8x128xf32>
    %38 = math.tanh %37 : vector<8x128xf32>
    %39 = arith.mulf %34, %38 : vector<8x128xf32>
    %40 = arith.index_cast %c0_i32_19 : i32 to index
    %c0_24 = arith.constant 0 : index
    %c0_25 = arith.constant 0 : index
    %41 = vector.load %arg13[%40, %c0_24, %c0_25] : memref<8x8x128xf32, #tpu.memory_space<vmem>>, vector<1x8x128xf32>
    %42 = vector.shape_cast %41 : vector<1x8x128xf32> to vector<8x128xf32>
    %43 = vector.shape_cast %39 : vector<8x128xf32> to vector<1x8x128xf32>
    tpu.vector_store %arg13[%40, %c0_24, %c0_25], %43 {strides = array<i32>} : memref<8x8x128xf32, #tpu.memory_space<vmem>>, vector<1x8x128xf32>,
    %c1_i32 = arith.constant 1 : i32
    %44 = arith.index_cast %c1_i32 : i32 to index
    %c0_26 = arith.constant 0 : index
    %c0_27 = arith.constant 0 : index
    %45 = vector.load %arg12[%44, %c0_26, %c0_27] : memref<8x8x512xf32, #tpu.memory_space<vmem>>, vector<1x8x512xf32>
    %46 = vector.shape_cast %45 : vector<1x8x512xf32> to vector<8x512xf32>
    %47 = arith.truncf %39 : vector<8x128xf32> to vector<8x128xbf16>
    %cst_28 = arith.constant dense<0.000000e+00> : vector<8x512xf32>
    %48 = tpu.matmul %47, %5, %cst_28 {dimension_numbers = #tpu.dot_dimension_numbers<[1], [0], [0], [1], [0, 0, 1, 1], [], []>} : vector<8x128xbf16>, vector<128x512xbf16>, vector<8x512xf32> -> vector<8x512xf32>
    %49 = arith.addf %46, %48 : vector<8x512xf32>
    %50 = vector.extract_strided_slice %49 {offsets = [0, 0], sizes = [8, 384], strides = [1, 1]} : vector<8x512xf32> to vector<8x384xf32>
    %51 = arith.negf %50 : vector<8x384xf32>
    %52 = math.exp %51 : vector<8x384xf32>
    %cst_29 = arith.constant 1.000000e+00 : f32
    %53 = vector.broadcast %cst_29 : f32 to vector<8x384xf32>
    %54 = arith.addf %53, %52 : vector<8x384xf32>
    %55 = arith.divf %53, %54 : vector<8x384xf32>
    %56 = vector.extract_strided_slice %49 {offsets = [0, 384], sizes = [8, 128], strides = [1, 1]} : vector<8x512xf32> to vector<8x128xf32>
    %57 = math.tanh %56 : vector<8x128xf32>
    %58 = vector.extract_strided_slice %55 {offsets = [0, 0], sizes = [8, 128], strides = [1, 1]} : vector<8x384xf32> to vector<8x128xf32>
    %59 = vector.extract_strided_slice %55 {offsets = [0, 128], sizes = [8, 128], strides = [1, 1]} : vector<8x384xf32> to vector<8x128xf32>
    %60 = vector.extract_strided_slice %55 {offsets = [0, 256], sizes = [8, 128], strides = [1, 1]} : vector<8x384xf32> to vector<8x128xf32>
    %61 = arith.mulf %59, %37 : vector<8x128xf32>
    %62 = arith.mulf %58, %57 : vector<8x128xf32>
    %63 = arith.addf %61, %62 : vector<8x128xf32>
    %64 = math.tanh %63 : vector<8x128xf32>
    %65 = arith.mulf %60, %64 : vector<8x128xf32>
    %66 = arith.index_cast %c1_i32 : i32 to index
    %c0_30 = arith.constant 0 : index
    %c0_31 = arith.constant 0 : index
    %67 = vector.load %arg13[%66, %c0_30, %c0_31] : memref<8x8x128xf32, #tpu.memory_space<vmem>>, vector<1x8x128xf32>
    %68 = vector.shape_cast %67 : vector<1x8x128xf32> to vector<8x128xf32>
    %69 = vector.shape_cast %65 : vector<8x128xf32> to vector<1x8x128xf32>
    tpu.vector_store %arg13[%66, %c0_30, %c0_31], %69 {strides = array<i32>} : memref<8x8x128xf32, #tpu.memory_space<vmem>>, vector<1x8x128xf32>,
    %c2_i32 = arith.constant 2 : i32
    %70 = arith.index_cast %c2_i32 : i32 to index
    %c0_32 = arith.constant 0 : index
    %c0_33 = arith.constant 0 : index
    %71 = vector.load %arg12[%70, %c0_32, %c0_33] : memref<8x8x512xf32, #tpu.memory_space<vmem>>, vector<1x8x512xf32>
    %72 = vector.shape_cast %71 : vector<1x8x512xf32> to vector<8x512xf32>
    %73 = arith.truncf %65 : vector<8x128xf32> to vector<8x128xbf16>
    %cst_34 = arith.constant dense<0.000000e+00> : vector<8x512xf32>
    %74 = tpu.matmul %73, %5, %cst_34 {dimension_numbers = #tpu.dot_dimension_numbers<[1], [0], [0], [1], [0, 0, 1, 1], [], []>} : vector<8x128xbf16>, vector<128x512xbf16>, vector<8x512xf32> -> vector<8x512xf32>
    %75 = arith.addf %72, %74 : vector<8x512xf32>
    %76 = vector.extract_strided_slice %75 {offsets = [0, 0], sizes = [8, 384], strides = [1, 1]} : vector<8x512xf32> to vector<8x384xf32>
    %77 = arith.negf %76 : vector<8x384xf32>
    %78 = math.exp %77 : vector<8x384xf32>
    %cst_35 = arith.constant 1.000000e+00 : f32
    %79 = vector.broadcast %cst_35 : f32 to vector<8x384xf32>
    %80 = arith.addf %79, %78 : vector<8x384xf32>
    %81 = arith.divf %79, %80 : vector<8x384xf32>
    %82 = vector.extract_strided_slice %75 {offsets = [0, 384], sizes = [8, 128], strides = [1, 1]} : vector<8x512xf32> to vector<8x128xf32>
    %83 = math.tanh %82 : vector<8x128xf32>
    %84 = vector.extract_strided_slice %81 {offsets = [0, 0], sizes = [8, 128], strides = [1, 1]} : vector<8x384xf32> to vector<8x128xf32>
    %85 = vector.extract_strided_slice %81 {offsets = [0, 128], sizes = [8, 128], strides = [1, 1]} : vector<8x384xf32> to vector<8x128xf32>
    %86 = vector.extract_strided_slice %81 {offsets = [0, 256], sizes = [8, 128], strides = [1, 1]} : vector<8x384xf32> to vector<8x128xf32>
    %87 = arith.mulf %85, %63 : vector<8x128xf32>
    %88 = arith.mulf %84, %83 : vector<8x128xf32>
    %89 = arith.addf %87, %88 : vector<8x128xf32>
    %90 = math.tanh %89 : vector<8x128xf32>
    %91 = arith.mulf %86, %90 : vector<8x128xf32>
    %92 = arith.index_cast %c2_i32 : i32 to index
    %c0_36 = arith.constant 0 : index
    %c0_37 = arith.constant 0 : index
    %93 = vector.load %arg13[%92, %c0_36, %c0_37] : memref<8x8x128xf32, #tpu.memory_space<vmem>>, vector<1x8x128xf32>
    %94 = vector.shape_cast %93 : vector<1x8x128xf32> to vector<8x128xf32>
    %95 = vector.shape_cast %91 : vector<8x128xf32> to vector<1x8x128xf32>
    tpu.vector_store %arg13[%92, %c0_36, %c0_37], %95 {strides = array<i32>} : memref<8x8x128xf32, #tpu.memory_space<vmem>>, vector<1x8x128xf32>,
    %c3_i32 = arith.constant 3 : i32
    %96 = arith.index_cast %c3_i32 : i32 to index
    %c0_38 = arith.constant 0 : index
    %c0_39 = arith.constant 0 : index
    %97 = vector.load %arg12[%96, %c0_38, %c0_39] : memref<8x8x512xf32, #tpu.memory_space<vmem>>, vector<1x8x512xf32>
    %98 = vector.shape_cast %97 : vector<1x8x512xf32> to vector<8x512xf32>
    %99 = arith.truncf %91 : vector<8x128xf32> to vector<8x128xbf16>
    %cst_40 = arith.constant dense<0.000000e+00> : vector<8x512xf32>
    %100 = tpu.matmul %99, %5, %cst_40 {dimension_numbers = #tpu.dot_dimension_numbers<[1], [0], [0], [1], [0, 0, 1, 1], [], []>} : vector<8x128xbf16>, vector<128x512xbf16>, vector<8x512xf32> -> vector<8x512xf32>
    %101 = arith.addf %98, %100 : vector<8x512xf32>
    %102 = vector.extract_strided_slice %101 {offsets = [0, 0], sizes = [8, 384], strides = [1, 1]} : vector<8x512xf32> to vector<8x384xf32>
    %103 = arith.negf %102 : vector<8x384xf32>
    %104 = math.exp %103 : vector<8x384xf32>
    %cst_41 = arith.constant 1.000000e+00 : f32
    %105 = vector.broadcast %cst_41 : f32 to vector<8x384xf32>
    %106 = arith.addf %105, %104 : vector<8x384xf32>
    %107 = arith.divf %105, %106 : vector<8x384xf32>
    %108 = vector.extract_strided_slice %101 {offsets = [0, 384], sizes = [8, 128], strides = [1, 1]} : vector<8x512xf32> to vector<8x128xf32>
    %109 = math.tanh %108 : vector<8x128xf32>
    %110 = vector.extract_strided_slice %107 {offsets = [0, 0], sizes = [8, 128], strides = [1, 1]} : vector<8x384xf32> to vector<8x128xf32>
    %111 = vector.extract_strided_slice %107 {offsets = [0, 128], sizes = [8, 128], strides = [1, 1]} : vector<8x384xf32> to vector<8x128xf32>
    %112 = vector.extract_strided_slice %107 {offsets = [0, 256], sizes = [8, 128], strides = [1, 1]} : vector<8x384xf32> to vector<8x128xf32>
    %113 = arith.mulf %111, %89 : vector<8x128xf32>
    %114 = arith.mulf %110, %109 : vector<8x128xf32>
    %115 = arith.addf %113, %114 : vector<8x128xf32>
    %116 = math.tanh %115 : vector<8x128xf32>
    %117 = arith.mulf %112, %116 : vector<8x128xf32>
    %118 = arith.index_cast %c3_i32 : i32 to index
    %c0_42 = arith.constant 0 : index
    %c0_43 = arith.constant 0 : index
    %119 = vector.load %arg13[%118, %c0_42, %c0_43] : memref<8x8x128xf32, #tpu.memory_space<vmem>>, vector<1x8x128xf32>
    %120 = vector.shape_cast %119 : vector<1x8x128xf32> to vector<8x128xf32>
    %121 = vector.shape_cast %117 : vector<8x128xf32> to vector<1x8x128xf32>
    tpu.vector_store %arg13[%118, %c0_42, %c0_43], %121 {strides = array<i32>} : memref<8x8x128xf32, #tpu.memory_space<vmem>>, vector<1x8x128xf32>,
    %c4_i32 = arith.constant 4 : i32
    %122 = arith.index_cast %c4_i32 : i32 to index
    %c0_44 = arith.constant 0 : index
    %c0_45 = arith.constant 0 : index
    %123 = vector.load %arg12[%122, %c0_44, %c0_45] : memref<8x8x512xf32, #tpu.memory_space<vmem>>, vector<1x8x512xf32>
    %124 = vector.shape_cast %123 : vector<1x8x512xf32> to vector<8x512xf32>
    %125 = arith.truncf %117 : vector<8x128xf32> to vector<8x128xbf16>
    %cst_46 = arith.constant dense<0.000000e+00> : vector<8x512xf32>
    %126 = tpu.matmul %125, %5, %cst_46 {dimension_numbers = #tpu.dot_dimension_numbers<[1], [0], [0], [1], [0, 0, 1, 1], [], []>} : vector<8x128xbf16>, vector<128x512xbf16>, vector<8x512xf32> -> vector<8x512xf32>
    %127 = arith.addf %124, %126 : vector<8x512xf32>
    %128 = vector.extract_strided_slice %127 {offsets = [0, 0], sizes = [8, 384], strides = [1, 1]} : vector<8x512xf32> to vector<8x384xf32>
    %129 = arith.negf %128 : vector<8x384xf32>
    %130 = math.exp %129 : vector<8x384xf32>
    %cst_47 = arith.constant 1.000000e+00 : f32
    %131 = vector.broadcast %cst_47 : f32 to vector<8x384xf32>
    %132 = arith.addf %131, %130 : vector<8x384xf32>
    %133 = arith.divf %131, %132 : vector<8x384xf32>
    %134 = vector.extract_strided_slice %127 {offsets = [0, 384], sizes = [8, 128], strides = [1, 1]} : vector<8x512xf32> to vector<8x128xf32>
    %135 = math.tanh %134 : vector<8x128xf32>
    %136 = vector.extract_strided_slice %133 {offsets = [0, 0], sizes = [8, 128], strides = [1, 1]} : vector<8x384xf32> to vector<8x128xf32>
    %137 = vector.extract_strided_slice %133 {offsets = [0, 128], sizes = [8, 128], strides = [1, 1]} : vector<8x384xf32> to vector<8x128xf32>
    %138 = vector.extract_strided_slice %133 {offsets = [0, 256], sizes = [8, 128], strides = [1, 1]} : vector<8x384xf32> to vector<8x128xf32>
    %139 = arith.mulf %137, %115 : vector<8x128xf32>
    %140 = arith.mulf %136, %135 : vector<8x128xf32>
    %141 = arith.addf %139, %140 : vector<8x128xf32>
    %142 = math.tanh %141 : vector<8x128xf32>
    %143 = arith.mulf %138, %142 : vector<8x128xf32>
    %144 = arith.index_cast %c4_i32 : i32 to index
    %c0_48 = arith.constant 0 : index
    %c0_49 = arith.constant 0 : index
    %145 = vector.load %arg13[%144, %c0_48, %c0_49] : memref<8x8x128xf32, #tpu.memory_space<vmem>>, vector<1x8x128xf32>
    %146 = vector.shape_cast %145 : vector<1x8x128xf32> to vector<8x128xf32>
    %147 = vector.shape_cast %143 : vector<8x128xf32> to vector<1x8x128xf32>
    tpu.vector_store %arg13[%144, %c0_48, %c0_49], %147 {strides = array<i32>} : memref<8x8x128xf32, #tpu.memory_space<vmem>>, vector<1x8x128xf32>,
    %c5_i32 = arith.constant 5 : i32
    %148 = arith.index_cast %c5_i32 : i32 to index
    %c0_50 = arith.constant 0 : index
    %c0_51 = arith.constant 0 : index
    %149 = vector.load %arg12[%148, %c0_50, %c0_51] : memref<8x8x512xf32, #tpu.memory_space<vmem>>, vector<1x8x512xf32>
    %150 = vector.shape_cast %149 : vector<1x8x512xf32> to vector<8x512xf32>
    %151 = arith.truncf %143 : vector<8x128xf32> to vector<8x128xbf16>
    %cst_52 = arith.constant dense<0.000000e+00> : vector<8x512xf32>
    %152 = tpu.matmul %151, %5, %cst_52 {dimension_numbers = #tpu.dot_dimension_numbers<[1], [0], [0], [1], [0, 0, 1, 1], [], []>} : vector<8x128xbf16>, vector<128x512xbf16>, vector<8x512xf32> -> vector<8x512xf32>
    %153 = arith.addf %150, %152 : vector<8x512xf32>
    %154 = vector.extract_strided_slice %153 {offsets = [0, 0], sizes = [8, 384], strides = [1, 1]} : vector<8x512xf32> to vector<8x384xf32>
    %155 = arith.negf %154 : vector<8x384xf32>
    %156 = math.exp %155 : vector<8x384xf32>
    %cst_53 = arith.constant 1.000000e+00 : f32
    %157 = vector.broadcast %cst_53 : f32 to vector<8x384xf32>
    %158 = arith.addf %157, %156 : vector<8x384xf32>
    %159 = arith.divf %157, %158 : vector<8x384xf32>
    %160 = vector.extract_strided_slice %153 {offsets = [0, 384], sizes = [8, 128], strides = [1, 1]} : vector<8x512xf32> to vector<8x128xf32>
    %161 = math.tanh %160 : vector<8x128xf32>
    %162 = vector.extract_strided_slice %159 {offsets = [0, 0], sizes = [8, 128], strides = [1, 1]} : vector<8x384xf32> to vector<8x128xf32>
    %163 = vector.extract_strided_slice %159 {offsets = [0, 128], sizes = [8, 128], strides = [1, 1]} : vector<8x384xf32> to vector<8x128xf32>
    %164 = vector.extract_strided_slice %159 {offsets = [0, 256], sizes = [8, 128], strides = [1, 1]} : vector<8x384xf32> to vector<8x128xf32>
    %165 = arith.mulf %163, %141 : vector<8x128xf32>
    %166 = arith.mulf %162, %161 : vector<8x128xf32>
    %167 = arith.addf %165, %166 : vector<8x128xf32>
    %168 = math.tanh %167 : vector<8x128xf32>
    %169 = arith.mulf %164, %168 : vector<8x128xf32>
    %170 = arith.index_cast %c5_i32 : i32 to index
    %c0_54 = arith.constant 0 : index
    %c0_55 = arith.constant 0 : index
    %171 = vector.load %arg13[%170, %c0_54, %c0_55] : memref<8x8x128xf32, #tpu.memory_space<vmem>>, vector<1x8x128xf32>
    %172 = vector.shape_cast %171 : vector<1x8x128xf32> to vector<8x128xf32>
    %173 = vector.shape_cast %169 : vector<8x128xf32> to vector<1x8x128xf32>
    tpu.vector_store %arg13[%170, %c0_54, %c0_55], %173 {strides = array<i32>} : memref<8x8x128xf32, #tpu.memory_space<vmem>>, vector<1x8x128xf32>,
    %c6_i32 = arith.constant 6 : i32
    %174 = arith.index_cast %c6_i32 : i32 to index
    %c0_56 = arith.constant 0 : index
    %c0_57 = arith.constant 0 : index
    %175 = vector.load %arg12[%174, %c0_56, %c0_57] : memref<8x8x512xf32, #tpu.memory_space<vmem>>, vector<1x8x512xf32>
    %176 = vector.shape_cast %175 : vector<1x8x512xf32> to vector<8x512xf32>
    %177 = arith.truncf %169 : vector<8x128xf32> to vector<8x128xbf16>
    %cst_58 = arith.constant dense<0.000000e+00> : vector<8x512xf32>
    %178 = tpu.matmul %177, %5, %cst_58 {dimension_numbers = #tpu.dot_dimension_numbers<[1], [0], [0], [1], [0, 0, 1, 1], [], []>} : vector<8x128xbf16>, vector<128x512xbf16>, vector<8x512xf32> -> vector<8x512xf32>
    %179 = arith.addf %176, %178 : vector<8x512xf32>
    %180 = vector.extract_strided_slice %179 {offsets = [0, 0], sizes = [8, 384], strides = [1, 1]} : vector<8x512xf32> to vector<8x384xf32>
    %181 = arith.negf %180 : vector<8x384xf32>
    %182 = math.exp %181 : vector<8x384xf32>
    %cst_59 = arith.constant 1.000000e+00 : f32
    %183 = vector.broadcast %cst_59 : f32 to vector<8x384xf32>
    %184 = arith.addf %183, %182 : vector<8x384xf32>
    %185 = arith.divf %183, %184 : vector<8x384xf32>
    %186 = vector.extract_strided_slice %179 {offsets = [0, 384], sizes = [8, 128], strides = [1, 1]} : vector<8x512xf32> to vector<8x128xf32>
    %187 = math.tanh %186 : vector<8x128xf32>
    %188 = vector.extract_strided_slice %185 {offsets = [0, 0], sizes = [8, 128], strides = [1, 1]} : vector<8x384xf32> to vector<8x128xf32>
    %189 = vector.extract_strided_slice %185 {offsets = [0, 128], sizes = [8, 128], strides = [1, 1]} : vector<8x384xf32> to vector<8x128xf32>
    %190 = vector.extract_strided_slice %185 {offsets = [0, 256], sizes = [8, 128], strides = [1, 1]} : vector<8x384xf32> to vector<8x128xf32>
    %191 = arith.mulf %189, %167 : vector<8x128xf32>
    %192 = arith.mulf %188, %187 : vector<8x128xf32>
    %193 = arith.addf %191, %192 : vector<8x128xf32>
    %194 = math.tanh %193 : vector<8x128xf32>
    %195 = arith.mulf %190, %194 : vector<8x128xf32>
    %196 = arith.index_cast %c6_i32 : i32 to index
    %c0_60 = arith.constant 0 : index
    %c0_61 = arith.constant 0 : index
    %197 = vector.load %arg13[%196, %c0_60, %c0_61] : memref<8x8x128xf32, #tpu.memory_space<vmem>>, vector<1x8x128xf32>
    %198 = vector.shape_cast %197 : vector<1x8x128xf32> to vector<8x128xf32>
    %199 = vector.shape_cast %195 : vector<8x128xf32> to vector<1x8x128xf32>
    tpu.vector_store %arg13[%196, %c0_60, %c0_61], %199 {strides = array<i32>} : memref<8x8x128xf32, #tpu.memory_space<vmem>>, vector<1x8x128xf32>,
    %c7_i32 = arith.constant 7 : i32
    %200 = arith.index_cast %c7_i32 : i32 to index
    %c0_62 = arith.constant 0 : index
    %c0_63 = arith.constant 0 : index
    %201 = vector.load %arg12[%200, %c0_62, %c0_63] : memref<8x8x512xf32, #tpu.memory_space<vmem>>, vector<1x8x512xf32>
    %202 = vector.shape_cast %201 : vector<1x8x512xf32> to vector<8x512xf32>
    %203 = arith.truncf %195 : vector<8x128xf32> to vector<8x128xbf16>
    %cst_64 = arith.constant dense<0.000000e+00> : vector<8x512xf32>
    %204 = tpu.matmul %203, %5, %cst_64 {dimension_numbers = #tpu.dot_dimension_numbers<[1], [0], [0], [1], [0, 0, 1, 1], [], []>} : vector<8x128xbf16>, vector<128x512xbf16>, vector<8x512xf32> -> vector<8x512xf32>
    %205 = arith.addf %202, %204 : vector<8x512xf32>
    %206 = vector.extract_strided_slice %205 {offsets = [0, 0], sizes = [8, 384], strides = [1, 1]} : vector<8x512xf32> to vector<8x384xf32>
    %207 = arith.negf %206 : vector<8x384xf32>
    %208 = math.exp %207 : vector<8x384xf32>
    %cst_65 = arith.constant 1.000000e+00 : f32
    %209 = vector.broadcast %cst_65 : f32 to vector<8x384xf32>
    %210 = arith.addf %209, %208 : vector<8x384xf32>
    %211 = arith.divf %209, %210 : vector<8x384xf32>
    %212 = vector.extract_strided_slice %205 {offsets = [0, 384], sizes = [8, 128], strides = [1, 1]} : vector<8x512xf32> to vector<8x128xf32>
    %213 = math.tanh %212 : vector<8x128xf32>
    %214 = vector.extract_strided_slice %211 {offsets = [0, 0], sizes = [8, 128], strides = [1, 1]} : vector<8x384xf32> to vector<8x128xf32>
    %215 = vector.extract_strided_slice %211 {offsets = [0, 128], sizes = [8, 128], strides = [1, 1]} : vector<8x384xf32> to vector<8x128xf32>
    %216 = vector.extract_strided_slice %211 {offsets = [0, 256], sizes = [8, 128], strides = [1, 1]} : vector<8x384xf32> to vector<8x128xf32>
    %217 = arith.mulf %215, %193 : vector<8x128xf32>
    %218 = arith.mulf %214, %213 : vector<8x128xf32>
    %219 = arith.addf %217, %218 : vector<8x128xf32>
    %220 = math.tanh %219 : vector<8x128xf32>
    %221 = arith.mulf %216, %220 : vector<8x128xf32>
    %222 = arith.index_cast %c7_i32 : i32 to index
    %c0_66 = arith.constant 0 : index
    %c0_67 = arith.constant 0 : index
    %223 = vector.load %arg13[%222, %c0_66, %c0_67] : memref<8x8x128xf32, #tpu.memory_space<vmem>>, vector<1x8x128xf32>
    %224 = vector.shape_cast %223 : vector<1x8x128xf32> to vector<8x128xf32>
    %225 = vector.shape_cast %221 : vector<8x128xf32> to vector<1x8x128xf32>
    tpu.vector_store %arg13[%222, %c0_66, %c0_67], %225 {strides = array<i32>} : memref<8x8x128xf32, #tpu.memory_space<vmem>>, vector<1x8x128xf32>,
    %c8_i32 = arith.constant 8 : i32
    %c0_68 = arith.constant 0 : index
    %c0_69 = arith.constant 0 : index
    %c0_70 = arith.constant 0 : index
    %c0_71 = arith.constant 0 : index
    %226 = vector.load %arg11[%c0_68, %c0_69, %c0_70, %c0_71] : memref<2x2x8x128xf32, #tpu.memory_space<vmem>>, vector<1x1x8x128xf32>
    %227 = vector.shape_cast %226 : vector<1x1x8x128xf32> to vector<8x128xf32>
    %228 = vector.shape_cast %221 : vector<8x128xf32> to vector<1x1x8x128xf32>
    tpu.vector_store %arg11[%c0_68, %c0_69, %c0_70, %c0_71], %228 {strides = array<i32>} : memref<2x2x8x128xf32, #tpu.memory_space<vmem>>, vector<1x1x8x128xf32>,
    %c0_72 = arith.constant 0 : index
    %c1_73 = arith.constant 1 : index
    %c0_74 = arith.constant 0 : index
    %c0_75 = arith.constant 0 : index
    %229 = vector.load %arg11[%c0_72, %c1_73, %c0_74, %c0_75] : memref<2x2x8x128xf32, #tpu.memory_space<vmem>>, vector<1x1x8x128xf32>
    %230 = vector.shape_cast %229 : vector<1x1x8x128xf32> to vector<8x128xf32>
    %231 = vector.shape_cast %219 : vector<8x128xf32> to vector<1x1x8x128xf32>
    tpu.vector_store %arg11[%c0_72, %c1_73, %c0_74, %c0_75], %231 {strides = array<i32>} : memref<2x2x8x128xf32, #tpu.memory_space<vmem>>, vector<1x1x8x128xf32>,
    %c0_76 = arith.constant 0 : index
    %c0_77 = arith.constant 0 : index
    %c0_78 = arith.constant 0 : index
    %232 = vector.load %arg13[%c0_76, %c0_77, %c0_78] : memref<8x8x128xf32, #tpu.memory_space<vmem>>, vector<8x8x128xf32>
    %c0_79 = arith.constant 0 : index
    %c0_80 = arith.constant 0 : index
    %233 = vector.load %arg5[%c0_79, %c0_80] : memref<128x512xbf16, #tpu.memory_space<vmem>>, vector<128x512xbf16>
    %c0_81 = arith.constant 0 : index
    %c0_82 = arith.constant 0 : index
    %234 = vector.load %arg6[%c0_81, %c0_82] : memref<128x512xbf16, #tpu.memory_space<vmem>>, vector<128x512xbf16>
    %c0_83 = arith.constant 0 : index
    %c0_84 = arith.constant 0 : index
    %235 = vector.load %arg7[%c0_83, %c0_84] : memref<1x512xf32, #tpu.memory_space<vmem>>, vector<1x512xf32>
    %236 = vector.shape_cast %232 : vector<8x8x128xf32> to vector<64x128xf32>
    %237 = arith.truncf %236 : vector<64x128xf32> to vector<64x128xbf16>
    %cst_85 = arith.constant dense<0.000000e+00> : vector<64x512xf32>
    %238 = tpu.matmul %237, %233, %cst_85 {dimension_numbers = #tpu.dot_dimension_numbers<[1], [0], [0], [1], [0, 0, 1, 1], [], []>} : vector<64x128xbf16>, vector<128x512xbf16>, vector<64x512xf32> -> vector<64x512xf32>
    %239 = vector.broadcast %235 : vector<1x512xf32> to vector<64x512xf32>
    %240 = arith.addf %238, %239 : vector<64x512xf32>
    %241 = vector.shape_cast %240 : vector<64x512xf32> to vector<8x8x512xf32>
    %c0_86 = arith.constant 0 : index
    %c0_87 = arith.constant 0 : index
    %c0_88 = arith.constant 0 : index
    %242 = vector.load %arg12[%c0_86, %c0_87, %c0_88] : memref<8x8x512xf32, #tpu.memory_space<vmem>>, vector<8x8x512xf32>
    tpu.vector_store %arg12[%c0_86, %c0_87, %c0_88], %241 {strides = array<i32>} : memref<8x8x512xf32, #tpu.memory_space<vmem>>, vector<8x8x512xf32>,
    %c1_89 = arith.constant 1 : index
    %c0_90 = arith.constant 0 : index
    %c0_91 = arith.constant 0 : index
    %c0_92 = arith.constant 0 : index
    %243 = vector.load %arg11[%c1_89, %c0_90, %c0_91, %c0_92] : memref<2x2x8x128xf32, #tpu.memory_space<vmem>>, vector<1x1x8x128xf32>
    %244 = vector.shape_cast %243 : vector<1x1x8x128xf32> to vector<8x128xf32>
    %c1_93 = arith.constant 1 : index
    %c1_94 = arith.constant 1 : index
    %c0_95 = arith.constant 0 : index
    %c0_96 = arith.constant 0 : index
    %245 = vector.load %arg11[%c1_93, %c1_94, %c0_95, %c0_96] : memref<2x2x8x128xf32, #tpu.memory_space<vmem>>, vector<1x1x8x128xf32>
    %246 = vector.shape_cast %245 : vector<1x1x8x128xf32> to vector<8x128xf32>
    %c0_i32_97 = arith.constant 0 : i32
    %247 = arith.index_cast %c0_i32_97 : i32 to index
    %c0_98 = arith.constant 0 : index
    %c0_99 = arith.constant 0 : index
    %248 = vector.load %arg12[%247, %c0_98, %c0_99] : memref<8x8x512xf32, #tpu.memory_space<vmem>>, vector<1x8x512xf32>
    %249 = vector.shape_cast %248 : vector<1x8x512xf32> to vector<8x512xf32>
    %250 = arith.truncf %244 : vector<8x128xf32> to vector<8x128xbf16>
    %cst_100 = arith.constant dense<0.000000e+00> : vector<8x512xf32>
    %251 = tpu.matmul %250, %234, %cst_100 {dimension_numbers = #tpu.dot_dimension_numbers<[1], [0], [0], [1], [0, 0, 1, 1], [], []>} : vector<8x128xbf16>, vector<128x512xbf16>, vector<8x512xf32> -> vector<8x512xf32>
    %252 = arith.addf %249, %251 : vector<8x512xf32>
    %253 = vector.extract_strided_slice %252 {offsets = [0, 0], sizes = [8, 384], strides = [1, 1]} : vector<8x512xf32> to vector<8x384xf32>
    %254 = arith.negf %253 : vector<8x384xf32>
    %255 = math.exp %254 : vector<8x384xf32>
    %cst_101 = arith.constant 1.000000e+00 : f32
    %256 = vector.broadcast %cst_101 : f32 to vector<8x384xf32>
    %257 = arith.addf %256, %255 : vector<8x384xf32>
    %258 = arith.divf %256, %257 : vector<8x384xf32>
    %259 = vector.extract_strided_slice %252 {offsets = [0, 384], sizes = [8, 128], strides = [1, 1]} : vector<8x512xf32> to vector<8x128xf32>
    %260 = math.tanh %259 : vector<8x128xf32>
    %261 = vector.extract_strided_slice %258 {offsets = [0, 0], sizes = [8, 128], strides = [1, 1]} : vector<8x384xf32> to vector<8x128xf32>
    %262 = vector.extract_strided_slice %258 {offsets = [0, 128], sizes = [8, 128], strides = [1, 1]} : vector<8x384xf32> to vector<8x128xf32>
    %263 = vector.extract_strided_slice %258 {offsets = [0, 256], sizes = [8, 128], strides = [1, 1]} : vector<8x384xf32> to vector<8x128xf32>
    %264 = arith.mulf %262, %246 : vector<8x128xf32>
    %265 = arith.mulf %261, %260 : vector<8x128xf32>
    %266 = arith.addf %264, %265 : vector<8x128xf32>
    %267 = math.tanh %266 : vector<8x128xf32>
    %268 = arith.mulf %263, %267 : vector<8x128xf32>
    %269 = arith.index_cast %c0_i32_97 : i32 to index
    %c0_102 = arith.constant 0 : index
    %c0_103 = arith.constant 0 : index
    %270 = vector.load %arg13[%269, %c0_102, %c0_103] : memref<8x8x128xf32, #tpu.memory_space<vmem>>, vector<1x8x128xf32>
    %271 = vector.shape_cast %270 : vector<1x8x128xf32> to vector<8x128xf32>
    %272 = vector.shape_cast %268 : vector<8x128xf32> to vector<1x8x128xf32>
    tpu.vector_store %arg13[%269, %c0_102, %c0_103], %272 {strides = array<i32>} : memref<8x8x128xf32, #tpu.memory_space<vmem>>, vector<1x8x128xf32>,
    %c1_i32_104 = arith.constant 1 : i32
    %273 = arith.index_cast %c1_i32_104 : i32 to index
    %c0_105 = arith.constant 0 : index
    %c0_106 = arith.constant 0 : index
    %274 = vector.load %arg12[%273, %c0_105, %c0_106] : memref<8x8x512xf32, #tpu.memory_space<vmem>>, vector<1x8x512xf32>
    %275 = vector.shape_cast %274 : vector<1x8x512xf32> to vector<8x512xf32>
    %276 = arith.truncf %268 : vector<8x128xf32> to vector<8x128xbf16>
    %cst_107 = arith.constant dense<0.000000e+00> : vector<8x512xf32>
    %277 = tpu.matmul %276, %234, %cst_107 {dimension_numbers = #tpu.dot_dimension_numbers<[1], [0], [0], [1], [0, 0, 1, 1], [], []>} : vector<8x128xbf16>, vector<128x512xbf16>, vector<8x512xf32> -> vector<8x512xf32>
    %278 = arith.addf %275, %277 : vector<8x512xf32>
    %279 = vector.extract_strided_slice %278 {offsets = [0, 0], sizes = [8, 384], strides = [1, 1]} : vector<8x512xf32> to vector<8x384xf32>
    %280 = arith.negf %279 : vector<8x384xf32>
    %281 = math.exp %280 : vector<8x384xf32>
    %cst_108 = arith.constant 1.000000e+00 : f32
    %282 = vector.broadcast %cst_108 : f32 to vector<8x384xf32>
    %283 = arith.addf %282, %281 : vector<8x384xf32>
    %284 = arith.divf %282, %283 : vector<8x384xf32>
    %285 = vector.extract_strided_slice %278 {offsets = [0, 384], sizes = [8, 128], strides = [1, 1]} : vector<8x512xf32> to vector<8x128xf32>
    %286 = math.tanh %285 : vector<8x128xf32>
    %287 = vector.extract_strided_slice %284 {offsets = [0, 0], sizes = [8, 128], strides = [1, 1]} : vector<8x384xf32> to vector<8x128xf32>
    %288 = vector.extract_strided_slice %284 {offsets = [0, 128], sizes = [8, 128], strides = [1, 1]} : vector<8x384xf32> to vector<8x128xf32>
    %289 = vector.extract_strided_slice %284 {offsets = [0, 256], sizes = [8, 128], strides = [1, 1]} : vector<8x384xf32> to vector<8x128xf32>
    %290 = arith.mulf %288, %266 : vector<8x128xf32>
    %291 = arith.mulf %287, %286 : vector<8x128xf32>
    %292 = arith.addf %290, %291 : vector<8x128xf32>
    %293 = math.tanh %292 : vector<8x128xf32>
    %294 = arith.mulf %289, %293 : vector<8x128xf32>
    %295 = arith.index_cast %c1_i32_104 : i32 to index
    %c0_109 = arith.constant 0 : index
    %c0_110 = arith.constant 0 : index
    %296 = vector.load %arg13[%295, %c0_109, %c0_110] : memref<8x8x128xf32, #tpu.memory_space<vmem>>, vector<1x8x128xf32>
    %297 = vector.shape_cast %296 : vector<1x8x128xf32> to vector<8x128xf32>
    %298 = vector.shape_cast %294 : vector<8x128xf32> to vector<1x8x128xf32>
    tpu.vector_store %arg13[%295, %c0_109, %c0_110], %298 {strides = array<i32>} : memref<8x8x128xf32, #tpu.memory_space<vmem>>, vector<1x8x128xf32>,
    %c2_i32_111 = arith.constant 2 : i32
    %299 = arith.index_cast %c2_i32_111 : i32 to index
    %c0_112 = arith.constant 0 : index
    %c0_113 = arith.constant 0 : index
    %300 = vector.load %arg12[%299, %c0_112, %c0_113] : memref<8x8x512xf32, #tpu.memory_space<vmem>>, vector<1x8x512xf32>
    %301 = vector.shape_cast %300 : vector<1x8x512xf32> to vector<8x512xf32>
    %302 = arith.truncf %294 : vector<8x128xf32> to vector<8x128xbf16>
    %cst_114 = arith.constant dense<0.000000e+00> : vector<8x512xf32>
    %303 = tpu.matmul %302, %234, %cst_114 {dimension_numbers = #tpu.dot_dimension_numbers<[1], [0], [0], [1], [0, 0, 1, 1], [], []>} : vector<8x128xbf16>, vector<128x512xbf16>, vector<8x512xf32> -> vector<8x512xf32>
    %304 = arith.addf %301, %303 : vector<8x512xf32>
    %305 = vector.extract_strided_slice %304 {offsets = [0, 0], sizes = [8, 384], strides = [1, 1]} : vector<8x512xf32> to vector<8x384xf32>
    %306 = arith.negf %305 : vector<8x384xf32>
    %307 = math.exp %306 : vector<8x384xf32>
    %cst_115 = arith.constant 1.000000e+00 : f32
    %308 = vector.broadcast %cst_115 : f32 to vector<8x384xf32>
    %309 = arith.addf %308, %307 : vector<8x384xf32>
    %310 = arith.divf %308, %309 : vector<8x384xf32>
    %311 = vector.extract_strided_slice %304 {offsets = [0, 384], sizes = [8, 128], strides = [1, 1]} : vector<8x512xf32> to vector<8x128xf32>
    %312 = math.tanh %311 : vector<8x128xf32>
    %313 = vector.extract_strided_slice %310 {offsets = [0, 0], sizes = [8, 128], strides = [1, 1]} : vector<8x384xf32> to vector<8x128xf32>
    %314 = vector.extract_strided_slice %310 {offsets = [0, 128], sizes = [8, 128], strides = [1, 1]} : vector<8x384xf32> to vector<8x128xf32>
    %315 = vector.extract_strided_slice %310 {offsets = [0, 256], sizes = [8, 128], strides = [1, 1]} : vector<8x384xf32> to vector<8x128xf32>
    %316 = arith.mulf %314, %292 : vector<8x128xf32>
    %317 = arith.mulf %313, %312 : vector<8x128xf32>
    %318 = arith.addf %316, %317 : vector<8x128xf32>
    %319 = math.tanh %318 : vector<8x128xf32>
    %320 = arith.mulf %315, %319 : vector<8x128xf32>
    %321 = arith.index_cast %c2_i32_111 : i32 to index
    %c0_116 = arith.constant 0 : index
    %c0_117 = arith.constant 0 : index
    %322 = vector.load %arg13[%321, %c0_116, %c0_117] : memref<8x8x128xf32, #tpu.memory_space<vmem>>, vector<1x8x128xf32>
    %323 = vector.shape_cast %322 : vector<1x8x128xf32> to vector<8x128xf32>
    %324 = vector.shape_cast %320 : vector<8x128xf32> to vector<1x8x128xf32>
    tpu.vector_store %arg13[%321, %c0_116, %c0_117], %324 {strides = array<i32>} : memref<8x8x128xf32, #tpu.memory_space<vmem>>, vector<1x8x128xf32>,
    %c3_i32_118 = arith.constant 3 : i32
    %325 = arith.index_cast %c3_i32_118 : i32 to index
    %c0_119 = arith.constant 0 : index
    %c0_120 = arith.constant 0 : index
    %326 = vector.load %arg12[%325, %c0_119, %c0_120] : memref<8x8x512xf32, #tpu.memory_space<vmem>>, vector<1x8x512xf32>
    %327 = vector.shape_cast %326 : vector<1x8x512xf32> to vector<8x512xf32>
    %328 = arith.truncf %320 : vector<8x128xf32> to vector<8x128xbf16>
    %cst_121 = arith.constant dense<0.000000e+00> : vector<8x512xf32>
    %329 = tpu.matmul %328, %234, %cst_121 {dimension_numbers = #tpu.dot_dimension_numbers<[1], [0], [0], [1], [0, 0, 1, 1], [], []>} : vector<8x128xbf16>, vector<128x512xbf16>, vector<8x512xf32> -> vector<8x512xf32>
    %330 = arith.addf %327, %329 : vector<8x512xf32>
    %331 = vector.extract_strided_slice %330 {offsets = [0, 0], sizes = [8, 384], strides = [1, 1]} : vector<8x512xf32> to vector<8x384xf32>
    %332 = arith.negf %331 : vector<8x384xf32>
    %333 = math.exp %332 : vector<8x384xf32>
    %cst_122 = arith.constant 1.000000e+00 : f32
    %334 = vector.broadcast %cst_122 : f32 to vector<8x384xf32>
    %335 = arith.addf %334, %333 : vector<8x384xf32>
    %336 = arith.divf %334, %335 : vector<8x384xf32>
    %337 = vector.extract_strided_slice %330 {offsets = [0, 384], sizes = [8, 128], strides = [1, 1]} : vector<8x512xf32> to vector<8x128xf32>
    %338 = math.tanh %337 : vector<8x128xf32>
    %339 = vector.extract_strided_slice %336 {offsets = [0, 0], sizes = [8, 128], strides = [1, 1]} : vector<8x384xf32> to vector<8x128xf32>
    %340 = vector.extract_strided_slice %336 {offsets = [0, 128], sizes = [8, 128], strides = [1, 1]} : vector<8x384xf32> to vector<8x128xf32>
    %341 = vector.extract_strided_slice %336 {offsets = [0, 256], sizes = [8, 128], strides = [1, 1]} : vector<8x384xf32> to vector<8x128xf32>
    %342 = arith.mulf %340, %318 : vector<8x128xf32>
    %343 = arith.mulf %339, %338 : vector<8x128xf32>
    %344 = arith.addf %342, %343 : vector<8x128xf32>
    %345 = math.tanh %344 : vector<8x128xf32>
    %346 = arith.mulf %341, %345 : vector<8x128xf32>
    %347 = arith.index_cast %c3_i32_118 : i32 to index
    %c0_123 = arith.constant 0 : index
    %c0_124 = arith.constant 0 : index
    %348 = vector.load %arg13[%347, %c0_123, %c0_124] : memref<8x8x128xf32, #tpu.memory_space<vmem>>, vector<1x8x128xf32>
    %349 = vector.shape_cast %348 : vector<1x8x128xf32> to vector<8x128xf32>
    %350 = vector.shape_cast %346 : vector<8x128xf32> to vector<1x8x128xf32>
    tpu.vector_store %arg13[%347, %c0_123, %c0_124], %350 {strides = array<i32>} : memref<8x8x128xf32, #tpu.memory_space<vmem>>, vector<1x8x128xf32>,
    %c4_i32_125 = arith.constant 4 : i32
    %351 = arith.index_cast %c4_i32_125 : i32 to index
    %c0_126 = arith.constant 0 : index
    %c0_127 = arith.constant 0 : index
    %352 = vector.load %arg12[%351, %c0_126, %c0_127] : memref<8x8x512xf32, #tpu.memory_space<vmem>>, vector<1x8x512xf32>
    %353 = vector.shape_cast %352 : vector<1x8x512xf32> to vector<8x512xf32>
    %354 = arith.truncf %346 : vector<8x128xf32> to vector<8x128xbf16>
    %cst_128 = arith.constant dense<0.000000e+00> : vector<8x512xf32>
    %355 = tpu.matmul %354, %234, %cst_128 {dimension_numbers = #tpu.dot_dimension_numbers<[1], [0], [0], [1], [0, 0, 1, 1], [], []>} : vector<8x128xbf16>, vector<128x512xbf16>, vector<8x512xf32> -> vector<8x512xf32>
    %356 = arith.addf %353, %355 : vector<8x512xf32>
    %357 = vector.extract_strided_slice %356 {offsets = [0, 0], sizes = [8, 384], strides = [1, 1]} : vector<8x512xf32> to vector<8x384xf32>
    %358 = arith.negf %357 : vector<8x384xf32>
    %359 = math.exp %358 : vector<8x384xf32>
    %cst_129 = arith.constant 1.000000e+00 : f32
    %360 = vector.broadcast %cst_129 : f32 to vector<8x384xf32>
    %361 = arith.addf %360, %359 : vector<8x384xf32>
    %362 = arith.divf %360, %361 : vector<8x384xf32>
    %363 = vector.extract_strided_slice %356 {offsets = [0, 384], sizes = [8, 128], strides = [1, 1]} : vector<8x512xf32> to vector<8x128xf32>
    %364 = math.tanh %363 : vector<8x128xf32>
    %365 = vector.extract_strided_slice %362 {offsets = [0, 0], sizes = [8, 128], strides = [1, 1]} : vector<8x384xf32> to vector<8x128xf32>
    %366 = vector.extract_strided_slice %362 {offsets = [0, 128], sizes = [8, 128], strides = [1, 1]} : vector<8x384xf32> to vector<8x128xf32>
    %367 = vector.extract_strided_slice %362 {offsets = [0, 256], sizes = [8, 128], strides = [1, 1]} : vector<8x384xf32> to vector<8x128xf32>
    %368 = arith.mulf %366, %344 : vector<8x128xf32>
    %369 = arith.mulf %365, %364 : vector<8x128xf32>
    %370 = arith.addf %368, %369 : vector<8x128xf32>
    %371 = math.tanh %370 : vector<8x128xf32>
    %372 = arith.mulf %367, %371 : vector<8x128xf32>
    %373 = arith.index_cast %c4_i32_125 : i32 to index
    %c0_130 = arith.constant 0 : index
    %c0_131 = arith.constant 0 : index
    %374 = vector.load %arg13[%373, %c0_130, %c0_131] : memref<8x8x128xf32, #tpu.memory_space<vmem>>, vector<1x8x128xf32>
    %375 = vector.shape_cast %374 : vector<1x8x128xf32> to vector<8x128xf32>
    %376 = vector.shape_cast %372 : vector<8x128xf32> to vector<1x8x128xf32>
    tpu.vector_store %arg13[%373, %c0_130, %c0_131], %376 {strides = array<i32>} : memref<8x8x128xf32, #tpu.memory_space<vmem>>, vector<1x8x128xf32>,
    %c5_i32_132 = arith.constant 5 : i32
    %377 = arith.index_cast %c5_i32_132 : i32 to index
    %c0_133 = arith.constant 0 : index
    %c0_134 = arith.constant 0 : index
    %378 = vector.load %arg12[%377, %c0_133, %c0_134] : memref<8x8x512xf32, #tpu.memory_space<vmem>>, vector<1x8x512xf32>
    %379 = vector.shape_cast %378 : vector<1x8x512xf32> to vector<8x512xf32>
    %380 = arith.truncf %372 : vector<8x128xf32> to vector<8x128xbf16>
    %cst_135 = arith.constant dense<0.000000e+00> : vector<8x512xf32>
    %381 = tpu.matmul %380, %234, %cst_135 {dimension_numbers = #tpu.dot_dimension_numbers<[1], [0], [0], [1], [0, 0, 1, 1], [], []>} : vector<8x128xbf16>, vector<128x512xbf16>, vector<8x512xf32> -> vector<8x512xf32>
    %382 = arith.addf %379, %381 : vector<8x512xf32>
    %383 = vector.extract_strided_slice %382 {offsets = [0, 0], sizes = [8, 384], strides = [1, 1]} : vector<8x512xf32> to vector<8x384xf32>
    %384 = arith.negf %383 : vector<8x384xf32>
    %385 = math.exp %384 : vector<8x384xf32>
    %cst_136 = arith.constant 1.000000e+00 : f32
    %386 = vector.broadcast %cst_136 : f32 to vector<8x384xf32>
    %387 = arith.addf %386, %385 : vector<8x384xf32>
    %388 = arith.divf %386, %387 : vector<8x384xf32>
    %389 = vector.extract_strided_slice %382 {offsets = [0, 384], sizes = [8, 128], strides = [1, 1]} : vector<8x512xf32> to vector<8x128xf32>
    %390 = math.tanh %389 : vector<8x128xf32>
    %391 = vector.extract_strided_slice %388 {offsets = [0, 0], sizes = [8, 128], strides = [1, 1]} : vector<8x384xf32> to vector<8x128xf32>
    %392 = vector.extract_strided_slice %388 {offsets = [0, 128], sizes = [8, 128], strides = [1, 1]} : vector<8x384xf32> to vector<8x128xf32>
    %393 = vector.extract_strided_slice %388 {offsets = [0, 256], sizes = [8, 128], strides = [1, 1]} : vector<8x384xf32> to vector<8x128xf32>
    %394 = arith.mulf %392, %370 : vector<8x128xf32>
    %395 = arith.mulf %391, %390 : vector<8x128xf32>
    %396 = arith.addf %394, %395 : vector<8x128xf32>
    %397 = math.tanh %396 : vector<8x128xf32>
    %398 = arith.mulf %393, %397 : vector<8x128xf32>
    %399 = arith.index_cast %c5_i32_132 : i32 to index
    %c0_137 = arith.constant 0 : index
    %c0_138 = arith.constant 0 : index
    %400 = vector.load %arg13[%399, %c0_137, %c0_138] : memref<8x8x128xf32, #tpu.memory_space<vmem>>, vector<1x8x128xf32>
    %401 = vector.shape_cast %400 : vector<1x8x128xf32> to vector<8x128xf32>
    %402 = vector.shape_cast %398 : vector<8x128xf32> to vector<1x8x128xf32>
    tpu.vector_store %arg13[%399, %c0_137, %c0_138], %402 {strides = array<i32>} : memref<8x8x128xf32, #tpu.memory_space<vmem>>, vector<1x8x128xf32>,
    %c6_i32_139 = arith.constant 6 : i32
    %403 = arith.index_cast %c6_i32_139 : i32 to index
    %c0_140 = arith.constant 0 : index
    %c0_141 = arith.constant 0 : index
    %404 = vector.load %arg12[%403, %c0_140, %c0_141] : memref<8x8x512xf32, #tpu.memory_space<vmem>>, vector<1x8x512xf32>
    %405 = vector.shape_cast %404 : vector<1x8x512xf32> to vector<8x512xf32>
    %406 = arith.truncf %398 : vector<8x128xf32> to vector<8x128xbf16>
    %cst_142 = arith.constant dense<0.000000e+00> : vector<8x512xf32>
    %407 = tpu.matmul %406, %234, %cst_142 {dimension_numbers = #tpu.dot_dimension_numbers<[1], [0], [0], [1], [0, 0, 1, 1], [], []>} : vector<8x128xbf16>, vector<128x512xbf16>, vector<8x512xf32> -> vector<8x512xf32>
    %408 = arith.addf %405, %407 : vector<8x512xf32>
    %409 = vector.extract_strided_slice %408 {offsets = [0, 0], sizes = [8, 384], strides = [1, 1]} : vector<8x512xf32> to vector<8x384xf32>
    %410 = arith.negf %409 : vector<8x384xf32>
    %411 = math.exp %410 : vector<8x384xf32>
    %cst_143 = arith.constant 1.000000e+00 : f32
    %412 = vector.broadcast %cst_143 : f32 to vector<8x384xf32>
    %413 = arith.addf %412, %411 : vector<8x384xf32>
    %414 = arith.divf %412, %413 : vector<8x384xf32>
    %415 = vector.extract_strided_slice %408 {offsets = [0, 384], sizes = [8, 128], strides = [1, 1]} : vector<8x512xf32> to vector<8x128xf32>
    %416 = math.tanh %415 : vector<8x128xf32>
    %417 = vector.extract_strided_slice %414 {offsets = [0, 0], sizes = [8, 128], strides = [1, 1]} : vector<8x384xf32> to vector<8x128xf32>
    %418 = vector.extract_strided_slice %414 {offsets = [0, 128], sizes = [8, 128], strides = [1, 1]} : vector<8x384xf32> to vector<8x128xf32>
    %419 = vector.extract_strided_slice %414 {offsets = [0, 256], sizes = [8, 128], strides = [1, 1]} : vector<8x384xf32> to vector<8x128xf32>
    %420 = arith.mulf %418, %396 : vector<8x128xf32>
    %421 = arith.mulf %417, %416 : vector<8x128xf32>
    %422 = arith.addf %420, %421 : vector<8x128xf32>
    %423 = math.tanh %422 : vector<8x128xf32>
    %424 = arith.mulf %419, %423 : vector<8x128xf32>
    %425 = arith.index_cast %c6_i32_139 : i32 to index
    %c0_144 = arith.constant 0 : index
    %c0_145 = arith.constant 0 : index
    %426 = vector.load %arg13[%425, %c0_144, %c0_145] : memref<8x8x128xf32, #tpu.memory_space<vmem>>, vector<1x8x128xf32>
    %427 = vector.shape_cast %426 : vector<1x8x128xf32> to vector<8x128xf32>
    %428 = vector.shape_cast %424 : vector<8x128xf32> to vector<1x8x128xf32>
    tpu.vector_store %arg13[%425, %c0_144, %c0_145], %428 {strides = array<i32>} : memref<8x8x128xf32, #tpu.memory_space<vmem>>, vector<1x8x128xf32>,
    %c7_i32_146 = arith.constant 7 : i32
    %429 = arith.index_cast %c7_i32_146 : i32 to index
    %c0_147 = arith.constant 0 : index
    %c0_148 = arith.constant 0 : index
    %430 = vector.load %arg12[%429, %c0_147, %c0_148] : memref<8x8x512xf32, #tpu.memory_space<vmem>>, vector<1x8x512xf32>
    %431 = vector.shape_cast %430 : vector<1x8x512xf32> to vector<8x512xf32>
    %432 = arith.truncf %424 : vector<8x128xf32> to vector<8x128xbf16>
    %cst_149 = arith.constant dense<0.000000e+00> : vector<8x512xf32>
    %433 = tpu.matmul %432, %234, %cst_149 {dimension_numbers = #tpu.dot_dimension_numbers<[1], [0], [0], [1], [0, 0, 1, 1], [], []>} : vector<8x128xbf16>, vector<128x512xbf16>, vector<8x512xf32> -> vector<8x512xf32>
    %434 = arith.addf %431, %433 : vector<8x512xf32>
    %435 = vector.extract_strided_slice %434 {offsets = [0, 0], sizes = [8, 384], strides = [1, 1]} : vector<8x512xf32> to vector<8x384xf32>
    %436 = arith.negf %435 : vector<8x384xf32>
    %437 = math.exp %436 : vector<8x384xf32>
    %cst_150 = arith.constant 1.000000e+00 : f32
    %438 = vector.broadcast %cst_150 : f32 to vector<8x384xf32>
    %439 = arith.addf %438, %437 : vector<8x384xf32>
    %440 = arith.divf %438, %439 : vector<8x384xf32>
    %441 = vector.extract_strided_slice %434 {offsets = [0, 384], sizes = [8, 128], strides = [1, 1]} : vector<8x512xf32> to vector<8x128xf32>
    %442 = math.tanh %441 : vector<8x128xf32>
    %443 = vector.extract_strided_slice %440 {offsets = [0, 0], sizes = [8, 128], strides = [1, 1]} : vector<8x384xf32> to vector<8x128xf32>
    %444 = vector.extract_strided_slice %440 {offsets = [0, 128], sizes = [8, 128], strides = [1, 1]} : vector<8x384xf32> to vector<8x128xf32>
    %445 = vector.extract_strided_slice %440 {offsets = [0, 256], sizes = [8, 128], strides = [1, 1]} : vector<8x384xf32> to vector<8x128xf32>
    %446 = arith.mulf %444, %422 : vector<8x128xf32>
    %447 = arith.mulf %443, %442 : vector<8x128xf32>
    %448 = arith.addf %446, %447 : vector<8x128xf32>
    %449 = math.tanh %448 : vector<8x128xf32>
    %450 = arith.mulf %445, %449 : vector<8x128xf32>
    %451 = arith.index_cast %c7_i32_146 : i32 to index
    %c0_151 = arith.constant 0 : index
    %c0_152 = arith.constant 0 : index
    %452 = vector.load %arg13[%451, %c0_151, %c0_152] : memref<8x8x128xf32, #tpu.memory_space<vmem>>, vector<1x8x128xf32>
    %453 = vector.shape_cast %452 : vector<1x8x128xf32> to vector<8x128xf32>
    %454 = vector.shape_cast %450 : vector<8x128xf32> to vector<1x8x128xf32>
    tpu.vector_store %arg13[%451, %c0_151, %c0_152], %454 {strides = array<i32>} : memref<8x8x128xf32, #tpu.memory_space<vmem>>, vector<1x8x128xf32>,
    %c8_i32_153 = arith.constant 8 : i32
    %c1_154 = arith.constant 1 : index
    %c0_155 = arith.constant 0 : index
    %c0_156 = arith.constant 0 : index
    %c0_157 = arith.constant 0 : index
    %455 = vector.load %arg11[%c1_154, %c0_155, %c0_156, %c0_157] : memref<2x2x8x128xf32, #tpu.memory_space<vmem>>, vector<1x1x8x128xf32>
    %456 = vector.shape_cast %455 : vector<1x1x8x128xf32> to vector<8x128xf32>
    %457 = vector.shape_cast %450 : vector<8x128xf32> to vector<1x1x8x128xf32>
    tpu.vector_store %arg11[%c1_154, %c0_155, %c0_156, %c0_157], %457 {strides = array<i32>} : memref<2x2x8x128xf32, #tpu.memory_space<vmem>>, vector<1x1x8x128xf32>,
    %c1_158 = arith.constant 1 : index
    %c1_159 = arith.constant 1 : index
    %c0_160 = arith.constant 0 : index
    %c0_161 = arith.constant 0 : index
    %458 = vector.load %arg11[%c1_158, %c1_159, %c0_160, %c0_161] : memref<2x2x8x128xf32, #tpu.memory_space<vmem>>, vector<1x1x8x128xf32>
    %459 = vector.shape_cast %458 : vector<1x1x8x128xf32> to vector<8x128xf32>
    %460 = vector.shape_cast %448 : vector<8x128xf32> to vector<1x1x8x128xf32>
    tpu.vector_store %arg11[%c1_158, %c1_159, %c0_160, %c0_161], %460 {strides = array<i32>} : memref<2x2x8x128xf32, #tpu.memory_space<vmem>>, vector<1x1x8x128xf32>,
    %c0_162 = arith.constant 0 : index
    %c0_163 = arith.constant 0 : index
    %c0_164 = arith.constant 0 : index
    %461 = vector.load %arg13[%c0_162, %c0_163, %c0_164] : memref<8x8x128xf32, #tpu.memory_space<vmem>>, vector<8x8x128xf32>
    %462 = vector.shape_cast %461 : vector<8x8x128xf32> to vector<64x128xf32>
    %463 = arith.truncf %462 : vector<64x128xf32> to vector<64x128xbf16>
    %c0_165 = arith.constant 0 : index
    %c0_166 = arith.constant 0 : index
    %464 = vector.load %arg8[%c0_165, %c0_166] : memref<128x128xbf16, #tpu.memory_space<vmem>>, vector<128x128xbf16>
    %cst_167 = arith.constant dense<0.000000e+00> : vector<64x128xf32>
    %465 = tpu.matmul %463, %464, %cst_167 {dimension_numbers = #tpu.dot_dimension_numbers<[1], [0], [0], [1], [0, 0, 1, 1], [], []>} : vector<64x128xbf16>, vector<128x128xbf16>, vector<64x128xf32> -> vector<64x128xf32>
    %c0_168 = arith.constant 0 : index
    %c0_169 = arith.constant 0 : index
    %466 = vector.load %arg9[%c0_168, %c0_169] : memref<1x128xf32, #tpu.memory_space<vmem>>, vector<1x128xf32>
    %467 = vector.broadcast %466 : vector<1x128xf32> to vector<64x128xf32>
    %468 = arith.addf %465, %467 : vector<64x128xf32>
    %469 = vector.shape_cast %468 : vector<64x128xf32> to vector<8x8x128xf32>
    %c0_170 = arith.constant 0 : index
    %c0_171 = arith.constant 0 : index
    %c0_172 = arith.constant 0 : index
    %470 = vector.load %arg10[%c0_170, %c0_171, %c0_172] : memref<8x8x128xf32, #tpu.memory_space<vmem>>, vector<8x8x128xf32>
    tpu.vector_store %arg10[%c0_170, %c0_171, %c0_172], %469 {strides = array<i32>} : memref<8x8x128xf32, #tpu.memory_space<vmem>>, vector<8x8x128xf32>,
    return
  }
  func.func @transform_0(%arg0: i32) -> (i32, i32, i32) {
    %c0_i32 = arith.constant 0 : i32
    %c0_i32_0 = arith.constant 0 : i32
    %c0_i32_1 = arith.constant 0 : i32
    return %arg0, %c0_i32, %c0_i32_0 : i32, i32, i32
  }
  func.func @transform_1(%arg0: i32) -> (i32, i32) {
    %c0_i32 = arith.constant 0 : i32
    %c0_i32_0 = arith.constant 0 : i32
    %c0_i32_1 = arith.constant 0 : i32
    return %c0_i32, %c0_i32_0 : i32, i32
  }
  func.func @transform_2(%arg0: i32) -> (i32, i32) {
    %c0_i32 = arith.constant 0 : i32
    %c0_i32_0 = arith.constant 0 : i32
    %c0_i32_1 = arith.constant 0 : i32
    return %c0_i32, %c0_i32_0 : i32, i32
  }
  func.func @transform_3(%arg0: i32) -> (i32, i32) {
    %c0_i32 = arith.constant 0 : i32
    %c0_i32_0 = arith.constant 0 : i32
    %c0_i32_1 = arith.constant 0 : i32
    return %c0_i32, %c0_i32_0 : i32, i32
  }
  func.func @transform_4(%arg0: i32) -> (i32, i32) {
    %c0_i32 = arith.constant 0 : i32
    %c0_i32_0 = arith.constant 0 : i32
    %c0_i32_1 = arith.constant 0 : i32
    return %c0_i32, %c0_i32_0 : i32, i32
  }
  func.func @transform_5(%arg0: i32) -> (i32, i32) {
    %c0_i32 = arith.constant 0 : i32
    %c0_i32_0 = arith.constant 0 : i32
    %c0_i32_1 = arith.constant 0 : i32
    return %c0_i32, %c0_i32_0 : i32, i32
  }
  func.func @transform_6(%arg0: i32) -> (i32, i32) {
    %c0_i32 = arith.constant 0 : i32
    %c0_i32_0 = arith.constant 0 : i32
    %c0_i32_1 = arith.constant 0 : i32
    return %c0_i32, %c0_i32_0 : i32, i32
  }
  func.func @transform_7(%arg0: i32) -> (i32, i32) {
    %c0_i32 = arith.constant 0 : i32
    %c0_i32_0 = arith.constant 0 : i32
    %c0_i32_1 = arith.constant 0 : i32
    return %c0_i32, %c0_i32_0 : i32, i32
  }
  func.func @transform_8(%arg0: i32) -> (i32, i32) {
    %c0_i32 = arith.constant 0 : i32
    %c0_i32_0 = arith.constant 0 : i32
    %c0_i32_1 = arith.constant 0 : i32
    return %c0_i32, %c0_i32_0 : i32, i32
  }
  func.func @transform_9(%arg0: i32) -> (i32, i32, i32) {
    %c0_i32 = arith.constant 0 : i32
    %c0_i32_0 = arith.constant 0 : i32
    %c0_i32_1 = arith.constant 0 : i32
    return %arg0, %c0_i32, %c0_i32_0 : i32, i32, i32
  }
}

</mosaic_0001>

<bundles_post_ra>
// kernel: lstm_protein_generator_forward.1
= control target key start
LH: loop header
LB: loop body
LE: loop exit
PB: predicated region body
PF: predicated region fallthrough
CT: control target
= control target key end

     0   :  { %14 = vsyncpa [#allocation6], 0  ;;  %s5566_s0 = inlined_call_operand.vmem [shape: f32[8,8,128], index: 0, kind: input, shape index: {}]   ;;  %s5567_s1 = inlined_call_operand.vmem [shape: bf16[128,512], index: 1, kind: input, shape index: {}]   ;;  %s5568_s2 = inlined_call_operand.hbm [shape: bf16[128,512], index: 2, kind: input, shape index: {}]   ;;  %s5569_s3 = inlined_call_operand.vmem [shape: f32[1,512], index: 3, kind: input, shape index: {}]   ;;  %s5570_s4 = inlined_call_operand.hbm [shape: bf16[128,512], index: 4, kind: input, shape index: {}]   ;;  %s5571_s5 = inlined_call_operand.hbm [shape: bf16[128,512], index: 5, kind: input, shape index: {}]   ;;  %s5572_s6 = inlined_call_operand.vmem [shape: f32[1,512], index: 6, kind: input, shape index: {}]   ;;  %s5573_s7 = inlined_call_operand.vmem [shape: bf16[128,128], index: 7, kind: input, shape index: {}]   ;;  %s5574_s8 = inlined_call_operand.vmem [shape: f32[1,128], index: 8, kind: input, shape index: {}]   ;;  %s5575_s9 = inlined_call_operand.vmem [shape: f32[8,8,128], index: 9, kind: output, shape index: {}]  }
   0x1   :  { %15 = vsyncpa [#allocation8], 0  ;;  %s4135_s30 = smov [#allocation7]   ;;  %s4136_s11 = smov [#allocation5]  }
   0x2   :  { %s39_s10 = sshll.u32 %s4135_s30, 4  ;;  %s25_s12 = sshll.u32 %s4136_s11, 4  ;;  %s40_s10 = int_to_ptr.vmem [resolvable:$true] %s39_s10  ;;  %s4192_s12 = int_to_ptr.vmem [resolvable:$true] %s25_s12 }
   0x3   :  { %s4065_s15 = scalar_lea.hbm %s5570_s4, 4096 }
   0x4   :  { %p4066_p0 = scmp.ne.s32.totalorder %s5570_s4, %s4065_s15  ;;  %p4069_p1 = scmp.lt.u32.totalorder %s4065_s15, %s5570_s4 }
   0x6   :  { %p4071_p2 = pnand %p4069_p1, %p4066_p0 }
   0x8   :  { %4074 = shalt.err (!%p4071_p2)
}
   0x9   :  { %s4075_s20 = scalar_lea.vmem %s40_s10, 4096  ;;  %p4080_p4 = scmp.lt.s32.totalorder %s40_s10, %s40_s10 }
   0xa   :  { %p4076_p3 = scmp.ne.s32.totalorder %s40_s10, %s4075_s20  ;;  %p4081_p5 = scmp.lt.s32.totalorder %s4075_s20, %s4075_s20 }
   0xc   :  { %p4082_p6 = por %p4081_p5, %p4080_p4 }
   0xe   :  { %p4083_p7 = pnand %p4082_p6, %p4076_p3 }
  0x10   :  { %4086 = shalt.err (!%p4083_p7)
}
  0x11   :  { %s4137_s21 = smov 256   ;;  %s4138_s22 = smov 16  }
  0x12   :  { %45 = dma.hbm_to_vmem [thread:$0]  %s5570_s4, 4096, %s40_s10, [#allocation8], %s4137_s21, %s4137_s21, %s4138_s22  }
  0x13   :  { %s4087_s27 = scalar_lea.hbm %s5568_s2, 4096 }
  0x14   :  { %p4088_p8 = scmp.ne.s32.totalorder %s5568_s2, %s4087_s27  ;;  %p4091_p9 = scmp.lt.u32.totalorder %s4087_s27, %s5568_s2 }
  0x16   :  { %p4093_p10 = pnand %p4091_p9, %p4088_p8 }
  0x18   :  { %4096 = shalt.err (!%p4093_p10)
}
  0x19   :  { %s4097_s13 = scalar_lea.vmem %s4192_s12, 4096  ;;  %p4102_p12 = scmp.lt.s32.totalorder %s4192_s12, %s4192_s12 }
  0x1a   :  { %p4098_p11 = scmp.ne.s32.totalorder %s4192_s12, %s4097_s13  ;;  %p4103_p13 = scmp.lt.s32.totalorder %s4097_s13, %s4097_s13 }
  0x1c   :  { %p4104_p0 = por %p4103_p13, %p4102_p12 }
  0x1e   :  { %p4105_p1 = pnand %p4104_p0, %p4098_p11 }
  0x20   :  { %4108 = shalt.err (!%p4105_p1)
}
  0x21   :  { %31 = dma.hbm_to_vmem [thread:$0]  %s5568_s2, 4096, %s4192_s12, [#allocation6], %s4137_s21, %s4137_s21, %s4138_s22  }
  0x22   :  { %s4139_s14 = smov [#allocation9]   ;;  %s4109_s18 = scalar_lea.hbm %s5571_s5, 4096 }
  0x23   :  { %s51_s15 = sshll.u32 %s4139_s14, 4  ;;  %p4110_p2 = scmp.ne.s32.totalorder %s5571_s5, %s4109_s18  ;;  %s52_s15 = int_to_ptr.vmem [resolvable:$true] %s51_s15 }
  0x24   :  { %p4113_p3 = scmp.lt.u32.totalorder %s4109_s18, %s5571_s5 }
  0x26   :  { %p4115_p4 = pnand %p4113_p3, %p4110_p2 }
  0x28   :  { %4118 = shalt.err (!%p4115_p4)
}
  0x29   :  { %s4119_s25 = scalar_lea.vmem %s52_s15, 4096  ;;  %p4124_p6 = scmp.lt.s32.totalorder %s52_s15, %s52_s15 }
  0x2a   :  { %p4120_p5 = scmp.ne.s32.totalorder %s52_s15, %s4119_s25  ;;  %p4125_p7 = scmp.lt.s32.totalorder %s4119_s25, %s4119_s25 }
  0x2c   :  { %p4126_p8 = por %p4125_p7, %p4124_p6 }
  0x2e   :  { %p4127_p9 = pnand %p4126_p8, %p4120_p5 }
  0x30   :  { %4130 = shalt.err (!%p4127_p9)
}
  0x31   :  { %57 = dma.hbm_to_vmem [thread:$0]  %s5571_s5, 4096, %s52_s15, [#allocation8], %s4137_s21, %s4137_s21, %s4138_s22  }
  0x32   :  { %4131 = dma.done.wait [#allocation6], 4096  }
  0x33   :  { %4132 = vsyncadd [#allocation6], 4294963200 }
  0x34   :  { %4133 = dma.done.wait [#allocation8], 8192  }
  0x35   :  { %4134 = vsyncadd [#allocation8], 4294959104  ;;  %v5580_v0 = vmov 0   ;;  %v3545_v1 = vld [vmem:[%s5567_s1 + $0x4] ss:$16 sps:$4 sm:$0xff]   ;;  %v83_v33 = vld [vmem:[%s5566_s0 + $0x8] sm:$0xff] }
  0x36   :  { %372 = vmatprep.mubr.bf16.mxu1 %v5580_v0  ;;  %718 = vmatprep.mubr.bf16.mxu0 %v5580_v0  ;;  %v3547_v2 = vld [vmem:[%s5567_s1] ss:$16 sps:$4 sm:$0xff]   ;;  %v4252_v3 = vld [vmem:[#allocation5 + $0x4] ss:$16 sps:$4 sm:$0xff]   ;;  %v3595_v34 = vld [vmem:[%s5567_s1 + $0xc] ss:$16 sps:$4 sm:$0xff]  }
  0x37   :  { %340 = vmatprep.subr.bf16.mxu1 %v3545_v1  ;;  %v4254_v4 = vld [vmem:[#allocation5] ss:$16 sps:$4 sm:$0xff]   ;;  %v3551_v5 = vld [vmem:[%s5567_s1 + $0x24] ss:$16 sps:$4 sm:$0xff]   ;;  %686 = vmatprep.subr.bf16.mxu0 %v4252_v3  ;;  %v3593_v37 = vld [vmem:[%s5567_s1 + $0x8] ss:$16 sps:$4 sm:$0xff]  }
  0x38   :  { %341 = vmatpush1.bf16.msra.mxu1 %v3547_v2  ;;  %v3553_v6 = vld [vmem:[%s5567_s1 + $0x20] ss:$16 sps:$4 sm:$0xff]   ;;  %v4263_v7 = vld [vmem:[#allocation5 + $0x24] ss:$16 sps:$4 sm:$0xff]   ;;  %687 = vmatpush1.bf16.msra.mxu0 %v4254_v4  ;;  %v3598_v38 = vld [vmem:[%s5567_s1 + $0x2c] ss:$16 sps:$4 sm:$0xff]  }
  0x39   :  { %342 = vmatprep.subr.bf16.mxu1 %v3551_v5  ;;  %v4266_v8 = vld [vmem:[#allocation5 + $0x20] ss:$16 sps:$4 sm:$0xff]   ;;  %688 = vmatprep.subr.bf16.mxu0 %v4263_v7  ;;  %v3557_v9 = vld [vmem:[%s5567_s1 + $0x44] ss:$16 sps:$4 sm:$0xff]   ;;  %v3596_v39 = vld [vmem:[%s5567_s1 + $0x28] ss:$16 sps:$4 sm:$0xff]  }
  0x3a   :  { %v3559_v10 = vld [vmem:[%s5567_s1 + $0x40] ss:$16 sps:$4 sm:$0xff]   ;;  %v4275_v11 = vld [vmem:[#allocation5 + $0x44] ss:$16 sps:$4 sm:$0xff]   ;;  %v85_v41 = vld [vmem:[%s5566_s0 + $0x18] sm:$0xff]  ;;  %v5578_v42 = vmov 0.0|0.0  }
  0x3b   :  { %v3563_v12 = vld [vmem:[%s5567_s1 + $0x64] ss:$16 sps:$4 sm:$0xff]   ;;  %v4281_v13 = vld [vmem:[#allocation5 + $0x40] ss:$16 sps:$4 sm:$0xff]   ;;  %v3601_v43 = vld [vmem:[%s5567_s1 + $0x4c] ss:$16 sps:$4 sm:$0xff]  }
  0x3c   :  { %343 = vmatpush1.bf16.msra.mxu1 %v3553_v6  ;;  %689 = vmatpush1.bf16.msra.mxu0 %v4266_v8  ;;  %v4284_v14 = vld [vmem:[#allocation5 + $0x64] ss:$16 sps:$4 sm:$0xff]   ;;  %v3565_v15 = vld [vmem:[%s5567_s1 + $0x60] ss:$16 sps:$4 sm:$0xff]   ;;  %v3599_v45 = vld [vmem:[%s5567_s1 + $0x48] ss:$16 sps:$4 sm:$0xff]  }
  0x3d   :  { %344 = vmatprep.subr.bf16.mxu1 %v3557_v9  ;;  %690 = vmatprep.subr.bf16.mxu0 %v4275_v11  ;;  %v3569_v16 = vld [vmem:[%s5567_s1 + $0x84] ss:$16 sps:$4 sm:$0xff]   ;;  %v4293_v17 = vld [vmem:[#allocation5 + $0x60] ss:$16 sps:$4 sm:$0xff]   ;;  %v3604_v46 = vld [vmem:[%s5567_s1 + $0x6c] ss:$16 sps:$4 sm:$0xff]  }
  0x3e   :  { %v4296_v18 = vld [vmem:[#allocation5 + $0x84] ss:$16 sps:$4 sm:$0xff]   ;;  %v3571_v19 = vld [vmem:[%s5567_s1 + $0x80] ss:$16 sps:$4 sm:$0xff]   ;;  %v3602_v47 = vld [vmem:[%s5567_s1 + $0x68] ss:$16 sps:$4 sm:$0xff]  }
  0x3f   :  { %v3575_v20 = vld [vmem:[%s5567_s1 + $0xa4] ss:$16 sps:$4 sm:$0xff]   ;;  %v4305_v21 = vld [vmem:[#allocation5 + $0x80] ss:$16 sps:$4 sm:$0xff]   ;;  %v87_v49 = vld [vmem:[%s5566_s0 + $0x28] sm:$0xff] }
  0x40   :  { %345 = vmatpush1.bf16.msra.mxu1 %v3559_v10  ;;  %691 = vmatpush1.bf16.msra.mxu0 %v4281_v13  ;;  %v4308_v22 = vld [vmem:[#allocation5 + $0xa4] ss:$16 sps:$4 sm:$0xff]   ;;  %v3577_v23 = vld [vmem:[%s5567_s1 + $0xa0] ss:$16 sps:$4 sm:$0xff]   ;;  %v3607_v50 = vld [vmem:[%s5567_s1 + $0x8c] ss:$16 sps:$4 sm:$0xff]  }
  0x41   :  { %346 = vmatprep.subr.bf16.mxu1 %v3563_v12  ;;  %692 = vmatprep.subr.bf16.mxu0 %v4284_v14  ;;  %v3581_v24 = vld [vmem:[%s5567_s1 + $0xc4] ss:$16 sps:$4 sm:$0xff]   ;;  %v4317_v25 = vld [vmem:[#allocation5 + $0xa0] ss:$16 sps:$4 sm:$0xff]   ;;  %v3605_v51 = vld [vmem:[%s5567_s1 + $0x88] ss:$16 sps:$4 sm:$0xff]  }
  0x42   :  { %v4320_v26 = vld [vmem:[#allocation5 + $0xc4] ss:$16 sps:$4 sm:$0xff]   ;;  %v3583_v27 = vld [vmem:[%s5567_s1 + $0xc0] ss:$16 sps:$4 sm:$0xff]   ;;  %v3610_v53 = vld [vmem:[%s5567_s1 + $0xac] ss:$16 sps:$4 sm:$0xff]  }
  0x43   :  { %v3587_v28 = vld [vmem:[%s5567_s1 + $0xe4] ss:$16 sps:$4 sm:$0xff]   ;;  %v4329_v29 = vld [vmem:[#allocation5 + $0xc0] ss:$16 sps:$4 sm:$0xff]   ;;  %v3608_v54 = vld [vmem:[%s5567_s1 + $0xa8] ss:$16 sps:$4 sm:$0xff]  }
  0x44   :  { %347 = vmatpush1.bf16.msra.mxu1 %v3565_v15  ;;  %693 = vmatpush1.bf16.msra.mxu0 %v4293_v17  ;;  %v3589_v30 = vld [vmem:[%s5567_s1 + $0xe0] ss:$16 sps:$4 sm:$0xff]   ;;  %v4335_v31 = vld [vmem:[#allocation5 + $0xe4] ss:$16 sps:$4 sm:$0xff]   ;;  %v89_v56 = vld [vmem:[%s5566_s0 + $0x38] sm:$0xff] }
  0x45   :  { %348 = vmatprep.subr.bf16.mxu1 %v3569_v16  ;;  %694 = vmatprep.subr.bf16.mxu0 %v4296_v18  ;;  %v82_v32 = vld [vmem:[%s5566_s0] sm:$0xff]  ;;  %v84_v40 = vld [vmem:[%s5566_s0 + $0x10] sm:$0xff]  ;;  %v3613_v57 = vld [vmem:[%s5567_s1 + $0xcc] ss:$16 sps:$4 sm:$0xff]  }
  0x46   :  { %v4347_v35 = vld [vmem:[#allocation5 + $0xe0] ss:$16 sps:$4 sm:$0xff]   ;;  %v4350_v36 = vpack.c.bf16 %v83_v33, %v82_v32  ;;  %v4377_v44 = vpack.c.bf16 %v85_v41, %v84_v40  ;;  %v3611_v58 = vld [vmem:[%s5567_s1 + $0xc8] ss:$16 sps:$4 sm:$0xff]   ;;  %v3616_v60 = vld [vmem:[%s5567_s1 + $0xec] ss:$16 sps:$4 sm:$0xff]  }
  0x47   :  { %v86_v48 = vld [vmem:[%s5566_s0 + $0x20] sm:$0xff]  ;;  %v88_v55 = vld [vmem:[%s5566_s0 + $0x30] sm:$0xff]  ;;  %v3614_v61 = vld [vmem:[%s5567_s1 + $0xe8] ss:$16 sps:$4 sm:$0xff]  }
  0x48   :  { %349 = vmatpush1.bf16.msra.mxu1 %v3571_v19  ;;  %695 = vmatpush1.bf16.msra.mxu0 %v4305_v21  ;;  %v157_v52 = vpack.c.bf16 %v87_v49, %v86_v48  ;;  %v158_v59 = vpack.c.bf16 %v89_v56, %v88_v55  ;;  %v4437_v62 = vld [vmem:[#allocation5 + $0xc] ss:$16 sps:$4 sm:$0xff]   ;;  %v4441_v63 = vld [vmem:[#allocation5 + $0x8] ss:$16 sps:$4 sm:$0xff]   ;;  %v154_v33 = vld [vmem:[%s5569_s3] sm:$0xf] }
  0x49   :  { %350 = vmatprep.subr.bf16.mxu1 %v3575_v20  ;;  %696 = vmatprep.subr.bf16.mxu0 %v4308_v22  ;;  %v4444_v1 = vld [vmem:[#allocation5 + $0x2c] ss:$16 sps:$4 sm:$0xff]   ;;  %v4448_v2 = vld [vmem:[#allocation5 + $0x28] ss:$16 sps:$4 sm:$0xff]  }
  0x4a   :  { %v4452_v5 = vld [vmem:[#allocation5 + $0x4c] ss:$16 sps:$4 sm:$0xff]   ;;  %v4458_v6 = vld [vmem:[#allocation5 + $0x48] ss:$16 sps:$4 sm:$0xff]  }
  0x4b   :  { %v4462_v9 = vld [vmem:[#allocation5 + $0x6c] ss:$16 sps:$4 sm:$0xff]   ;;  %v4466_v10 = vld [vmem:[#allocation5 + $0x68] ss:$16 sps:$4 sm:$0xff]  }
  0x4c   :  { %351 = vmatpush1.bf16.msra.mxu1 %v3577_v23  ;;  %697 = vmatpush1.bf16.msra.mxu0 %v4317_v25  ;;  %v4470_v12 = vld [vmem:[#allocation5 + $0x8c] ss:$16 sps:$4 sm:$0xff]   ;;  %v4473_v15 = vld [vmem:[#allocation5 + $0x88] ss:$16 sps:$4 sm:$0xff]  }
  0x4d   :  { %352 = vmatprep.subr.bf16.mxu1 %v3581_v24  ;;  %698 = vmatprep.subr.bf16.mxu0 %v4320_v26  ;;  %v4476_v16 = vld [vmem:[#allocation5 + $0xac] ss:$16 sps:$4 sm:$0xff]   ;;  %v4479_v19 = vld [vmem:[#allocation5 + $0xa8] ss:$16 sps:$4 sm:$0xff]  }
  0x4e   :  { %v4483_v20 = vld [vmem:[#allocation5 + $0xcc] ss:$16 sps:$4 sm:$0xff]   ;;  %v4486_v23 = vld [vmem:[#allocation5 + $0xc8] ss:$16 sps:$4 sm:$0xff]  }
  0x4f   :  { %v4489_v24 = vld [vmem:[#allocation5 + $0xec] ss:$16 sps:$4 sm:$0xff]  }
  0x50   :  { %353 = vmatpush1.bf16.msra.mxu1 %v3583_v27  ;;  %699 = vmatpush1.bf16.msra.mxu0 %v4329_v29  ;;  %v4492_v27 = vld [vmem:[#allocation5 + $0xe8] ss:$16 sps:$4 sm:$0xff]  }
  0x51   :  { %354 = vmatprep.subr.bf16.mxu1 %v3587_v28  ;;  %700 = vmatprep.subr.bf16.mxu0 %v4335_v31  ;;  %v160_v28 = vlaneseq }
  0x54   :  { %355 = vmatpush1.bf16.msra.mxu1 %v3589_v30  ;;  %701 = vmatpush1.bf16.msra.mxu0 %v4347_v35  ;;  %v4516_v30 = vshrl.u32 %v160_v28, 7 }
  0x55   :  { %413 = vmatprep.subr.bf16.mxu1 %v3595_v34  ;;  %803 = vmatprep.subr.bf16.mxu0 %v4252_v3 }
  0x56   :  { %5586 = vst [vmem:[#allocation12_spill] sm:$0xff] %v4516_v30  ;;  %v5577_v32 = vsub.s32 0, %v4516_v30  ;;  %v5576_v34 = vsub.s32 1, %v4516_v30 }
  0x57   :  { %373 = vmatmul.mubr.bf16.vlgmr.msra.gmra.mrb[0].mxu1 %v4350_v36  ;;  %719 = vmatmul.mubr.bf16.vlgmr.msra.gmra.mrb[0].mxu0 %v5578_v42 }
  0x58   :  { %414 = vmatpush1.bf16.msra.mxu1 %v3593_v37  ;;  %382 = vmatprep.mubr.bf16.mxu1 %v5580_v0  ;;  %v167_v37 = vrot.slane %v154_v33, %v5576_v34 }
  0x59   :  { %415 = vmatprep.subr.bf16.mxu1 %v3598_v38  ;;  %804 = vmatpush1.bf16.msra.mxu0 %v4254_v4 }
  0x5a   :  { %835 = vmatprep.mubr.bf16.mxu0 %v5580_v0  ;;  %805 = vmatprep.subr.bf16.mxu0 %v4263_v7 }
  0x5c   :  { %416 = vmatpush1.bf16.msra.mxu1 %v3596_v39 }
  0x5d   :  { %417 = vmatprep.subr.bf16.mxu1 %v3601_v43  ;;  %806 = vmatpush1.bf16.msra.mxu0 %v4266_v8 }
  0x5e   :  { %807 = vmatprep.subr.bf16.mxu0 %v4275_v11 }
  0x5f   :  { %383 = vmatmul.mubr.bf16.gmra.mrb[4].mxu1 %v4377_v44 }
  0x60   :  { %418 = vmatpush1.bf16.msra.mxu1 %v3599_v45  ;;  %392 = vmatprep.mubr.bf16.mxu1 %v5580_v0 }
  0x61   :  { %419 = vmatprep.subr.bf16.mxu1 %v3604_v46  ;;  %808 = vmatpush1.bf16.msra.mxu0 %v4281_v13 }
  0x62   :  { %809 = vmatprep.subr.bf16.mxu0 %v4284_v14 }
  0x64   :  { %420 = vmatpush1.bf16.msra.mxu1 %v3602_v47 }
  0x65   :  { %421 = vmatprep.subr.bf16.mxu1 %v3607_v50  ;;  %810 = vmatpush1.bf16.msra.mxu0 %v4293_v17 }
  0x66   :  { %811 = vmatprep.subr.bf16.mxu0 %v4296_v18 }
  0x67   :  { %393 = vmatmul.mubr.bf16.gmra.mrb[8].mxu1 %v157_v52 }
  0x68   :  { %422 = vmatpush1.bf16.msra.mxu1 %v3605_v51  ;;  %402 = vmatprep.mubr.bf16.mxu1 %v5580_v0 }
  0x69   :  { %423 = vmatprep.subr.bf16.mxu1 %v3610_v53  ;;  %812 = vmatpush1.bf16.msra.mxu0 %v4305_v21 }
  0x6a   :  { %813 = vmatprep.subr.bf16.mxu0 %v4308_v22 }
  0x6c   :  { %424 = vmatpush1.bf16.msra.mxu1 %v3608_v54 }
  0x6d   :  { %425 = vmatprep.subr.bf16.mxu1 %v3613_v57  ;;  %814 = vmatpush1.bf16.msra.mxu0 %v4317_v25 }
  0x6e   :  { %815 = vmatprep.subr.bf16.mxu0 %v4320_v26 }
  0x6f   :  { %403 = vmatmul.mubr.bf16.gmra.mrb[12].mxu1 %v158_v59 }
  0x70   :  { %426 = vmatpush1.bf16.msra.mxu1 %v3611_v58  ;;  %445 = vmatprep.mubr.bf16.mxu1 %v5580_v0 }
  0x71   :  { %427 = vmatprep.subr.bf16.mxu1 %v3616_v60  ;;  %816 = vmatpush1.bf16.msra.mxu0 %v4329_v29 }
  0x72   :  { %817 = vmatprep.subr.bf16.mxu0 %v4335_v31 }
  0x74   :  { %428 = vmatpush1.bf16.msra.mxu1 %v3614_v61 }
  0x75   :  { %727 = vmatprep.subr.bf16.mxu1 %v4437_v62  ;;  %818 = vmatpush1.bf16.msra.mxu0 %v4347_v35 }
  0x76   :  { %921 = vmatprep.subr.bf16.mxu0 %v4252_v3 }
  0x77   :  { %446 = vmatmul.mubr.bf16.vlgmr.msra.gmra.mrb[16].mxu1 %v4350_v36  ;;  %v163_v36 = vrot.slane %v154_v33, %v5577_v32 }
  0x78   :  { %728 = vmatpush1.bf16.msra.mxu1 %v4441_v63  ;;  %455 = vmatprep.mubr.bf16.mxu1 %v5580_v0 }
  0x79   :  { %729 = vmatprep.subr.bf16.mxu1 %v4444_v1 }
  0x7c   :  { %730 = vmatpush1.bf16.msra.mxu1 %v4448_v2 }
  0x7d   :  { %731 = vmatprep.subr.bf16.mxu1 %v4452_v5 }
  0x7f   :  { %456 = vmatmul.mubr.bf16.gmra.mrb[20].mxu1 %v4377_v44 }
  0x80   :  { %732 = vmatpush1.bf16.msra.mxu1 %v4458_v6  ;;  %465 = vmatprep.mubr.bf16.mxu1 %v5580_v0 }
  0x81   :  { %733 = vmatprep.subr.bf16.mxu1 %v4462_v9 }
  0x84   :  { %734 = vmatpush1.bf16.msra.mxu1 %v4466_v10 }
  0x85   :  { %735 = vmatprep.subr.bf16.mxu1 %v4470_v12 }
  0x87   :  { %466 = vmatmul.mubr.bf16.gmra.mrb[24].mxu1 %v157_v52 }
  0x88   :  { %736 = vmatpush1.bf16.msra.mxu1 %v4473_v15  ;;  %475 = vmatprep.mubr.bf16.mxu1 %v5580_v0 }
  0x89   :  { %737 = vmatprep.subr.bf16.mxu1 %v4476_v16 }
  0x8c   :  { %738 = vmatpush1.bf16.msra.mxu1 %v4479_v19 }
  0x8d   :  { %739 = vmatprep.subr.bf16.mxu1 %v4483_v20 }
  0x8f   :  { %476 = vmatmul.mubr.bf16.gmra.mrb[28].mxu1 %v158_v59 }
  0x90   :  { %740 = vmatpush1.bf16.msra.mxu1 %v4486_v23  ;;  %759 = vmatprep.mubr.bf16.mxu1 %v5580_v0 }
  0x91   :  { %741 = vmatprep.subr.bf16.mxu1 %v4489_v24 }
  0x94   :  { %742 = vmatpush1.bf16.msra.mxu1 %v4492_v27 }
  0x95   :  { %844 = vmatprep.subr.bf16.mxu1 %v4437_v62 }
  0x97   :  { %760 = vmatmul.mubr.bf16.vlgmr.msra.gmra.mrb[32].mxu1 %v5578_v42 }
  0x98   :  { %845 = vmatpush1.bf16.msra.mxu1 %v4441_v63  ;;  %876 = vmatprep.mubr.bf16.mxu1 %v5580_v0 }
  0x99   :  { %846 = vmatprep.subr.bf16.mxu1 %v4444_v1 }
  0x9c   :  { %847 = vmatpush1.bf16.msra.mxu1 %v4448_v2 }
  0x9d   :  { %848 = vmatprep.subr.bf16.mxu1 %v4452_v5 }
  0xa0   :  { %849 = vmatpush1.bf16.msra.mxu1 %v4458_v6 }
  0xa1   :  { %850 = vmatprep.subr.bf16.mxu1 %v4462_v9 }
  0xa4   :  { %851 = vmatpush1.bf16.msra.mxu1 %v4466_v10 }
  0xa5   :  { %852 = vmatprep.subr.bf16.mxu1 %v4470_v12 }
  0xa8   :  { %853 = vmatpush1.bf16.msra.mxu1 %v4473_v15 }
  0xa9   :  { %854 = vmatprep.subr.bf16.mxu1 %v4476_v16 }
  0xac   :  { %855 = vmatpush1.bf16.msra.mxu1 %v4479_v19 }
  0xad   :  { %856 = vmatprep.subr.bf16.mxu1 %v4483_v20 }
  0xb0   :  { %857 = vmatpush1.bf16.msra.mxu1 %v4486_v23 }
  0xb1   :  { %858 = vmatprep.subr.bf16.mxu1 %v4489_v24 }
  0xb4   :  { %859 = vmatpush1.bf16.msra.mxu1 %v4492_v27 }
  0xb5   :  { %962 = vmatprep.subr.bf16.mxu1 %v4437_v62 }
 0x12a   :  { %v374_v38 = vpop.f32.mrb[0].mxu1  ;;  %v720_v44 = vpop.f32.mrb[0].mxu0 }
 0x12b   :  { %v375_v39 = vadd.f32 %v374_v38, %v163_v36  ;;  %v376_v40 = vpop.f32.mrb[1].mxu1  ;;  %v722_v48 = vpop.f32.mrb[1].mxu0 }
 0x12c   :  { %v377_v41 = vadd.f32 %v376_v40, %v167_v37  ;;  %v378_v43 = vpop.f32.mrb[2].mxu1  ;;  %v724_v51 = vpop.f32.mrb[2].mxu0 }
 0x12d   :  { %v4527_v45 = vadd.f32 %v378_v43, %v163_v36  ;;  %v768_v46 = vadd.f32 %v720_v44, %v375_v39  ;;  %v380_v47 = vpop.f32.mrb[3].mxu1  ;;  %v725_v52 = vpop.f32.mrb[3].mxu0 }
 0x12e   :  { %v4529_v49 = vadd.f32 %v380_v47, %v167_v37  ;;  %v769_v50 = vadd.f32 %v722_v48, %v377_v41 }
 0x132   :  { %v384_v53 = vpop.f32.mrb[4].mxu1 }
 0x133   :  { %v4531_v54 = vadd.f32 %v384_v53, %v163_v36  ;;  %v386_v55 = vpop.f32.mrb[5].mxu1 }
 0x134   :  { %v4533_v56 = vadd.f32 %v386_v55, %v167_v37  ;;  %v388_v57 = vpop.f32.mrb[6].mxu1 }
 0x135   :  { %v4535_v58 = vadd.f32 %v388_v57, %v163_v36  ;;  %v390_v59 = vpop.f32.mrb[7].mxu1 }
 0x136   :  { %v4537_v60 = vadd.f32 %v390_v59, %v167_v37 }
 0x138   :  { %5587 = vst [vmem:[#allocation13_spill] sm:$0xff] %v4537_v60 }
 0x13a   :  { %v394_v61 = vpop.f32.mrb[8].mxu1 }
 0x13b   :  { %v4539_v28 = vadd.f32 %v394_v61, %v163_v36  ;;  %v396_v38 = vpop.f32.mrb[9].mxu1  ;;  %v5582_v61 = vsub.s32 2, %v4516_v30 }
 0x13c   :  { %v4541_v39 = vadd.f32 %v396_v38, %v167_v37  ;;  %v398_v40 = vpop.f32.mrb[10].mxu1  ;;  %v5585_v38 = vsub.s32 3, %v4516_v30  ;;  %v3382_v30 = vmul.f32 -1.442695, %v769_v50 }
 0x13d   :  { %5588 = vst [vmem:[#allocation14_spill] sm:$0xff] %v4539_v28  ;;  %v4543_v41 = vadd.f32 %v398_v40, %v163_v36  ;;  %v400_v43 = vpop.f32.mrb[11].mxu1 }
 0x13e   :  { %5589 = vst [vmem:[#allocation15_spill] sm:$0xff] %v4541_v39  ;;  %v4545_v44 = vadd.f32 %v400_v43, %v167_v37  ;;  %v171_v43 = vrot.slane %v154_v33, %v5582_v61  ;;  %3745 = vpow2.f32 %v3382_v30 }
 0x13f   :  { %5590 = vst [vmem:[#allocation16_spill] sm:$0xff] %v4543_v41 }
 0x140   :  { %5591 = vst [vmem:[#allocation17_spill] sm:$0xff] %v4545_v44 }
 0x142   :  { %v404_v47 = vpop.f32.mrb[12].mxu1 }
 0x143   :  { %v4547_v48 = vadd.f32 %v404_v47, %v163_v36  ;;  %v406_v51 = vpop.f32.mrb[13].mxu1  ;;  %v175_v47 = vrot.slane %v154_v33, %v5585_v38  ;;  %v3381_v33 = vmul.f32 -1.442695, %v768_v46 }
 0x144   :  { %v4549_v52 = vadd.f32 %v406_v51, %v167_v37  ;;  %v408_v53 = vpop.f32.mrb[14].mxu1 }
 0x145   :  { %5592 = vst [vmem:[#allocation18_spill] sm:$0xff] %v4547_v48  ;;  %v4551_v55 = vadd.f32 %v408_v53, %v163_v36  ;;  %v410_v57 = vpop.f32.mrb[15].mxu1  ;;  %3747 = vpow2.f32 %v3381_v33 }
 0x146   :  { %5593 = vst [vmem:[#allocation19_spill] sm:$0xff] %v4549_v52  ;;  %v4553_v59 = vadd.f32 %v410_v57, %v167_v37 }
 0x147   :  { %5594 = vst [vmem:[#allocation20_spill] sm:$0xff] %v4551_v55 }
 0x148   :  { %5595 = vst [vmem:[#allocation21_spill] sm:$0xff] %v4553_v59  ;;  %v3746_v30 = vpop.eup %3745 }
 0x14a   :  { %v447_v40 = vpop.f32.mrb[16].mxu1 }
 0x14b   :  { %v449_v34 = vpop.f32.mrb[17].mxu1 }
 0x14c   :  { %v451_v51 = vpop.f32.mrb[18].mxu1  ;;  %v450_v28 = vadd.f32 %v449_v34, %v175_v47 }
 0x14d   :  { %v4561_v32 = vadd.f32 %v451_v51, %v171_v43  ;;  %v453_v36 = vpop.f32.mrb[19].mxu1 }
 0x14e   :  { %v4563_v53 = vadd.f32 %v453_v36, %v175_v47 }
 0x14f   :  { %v3748_v33 = vpop.eup %3747 }
 0x152   :  { %v457_v37 = vpop.f32.mrb[20].mxu1 }
 0x153   :  { %v4565_v57 = vadd.f32 %v457_v37, %v171_v43  ;;  %v459_v42 = vpop.f32.mrb[21].mxu1 }
 0x154   :  { %v4567_v0 = vadd.f32 %v459_v42, %v175_v47  ;;  %v461_v59 = vpop.f32.mrb[22].mxu1 }
 0x155   :  { %v4569_v55 = vadd.f32 %v461_v59, %v171_v43  ;;  %v463_v61 = vpop.f32.mrb[23].mxu1 }
 0x156   :  { %v4571_v52 = vadd.f32 %v463_v61, %v175_v47 }
 0x158   :  { %5596 = vst [vmem:[#allocation22_spill] sm:$0xff] %v4571_v52 }
 0x15a   :  { %v467_v38 = vpop.f32.mrb[24].mxu1 }
 0x15b   :  { %v4573_v51 = vadd.f32 %v467_v38, %v171_v43  ;;  %v469_v36 = vpop.f32.mrb[25].mxu1 }
 0x15c   :  { %v4575_v48 = vadd.f32 %v469_v36, %v175_v47  ;;  %v471_v37 = vpop.f32.mrb[26].mxu1 }
 0x15d   :  { %5597 = vst [vmem:[#allocation23_spill] sm:$0xff] %v4573_v51  ;;  %v4577_v44 = vadd.f32 %v471_v37, %v171_v43  ;;  %v473_v42 = vpop.f32.mrb[27].mxu1  ;;  %v781_v37 = vadd.f32 1.0, %v3748_v33 }
 0x15e   :  { %5598 = vst [vmem:[#allocation24_spill] sm:$0xff] %v4575_v48  ;;  %v4579_v41 = vadd.f32 %v473_v42, %v175_v47  ;;  %v782_v48 = vadd.f32 1.0, %v3746_v30 }
 0x15f   :  { %5599 = vst [vmem:[#allocation25_spill] sm:$0xff] %v4577_v44  ;;  %v448_v44 = vadd.f32 %v447_v40, %v171_v43 }
 0x160   :  { %5600 = vst [vmem:[#allocation26_spill] sm:$0xff] %v4579_v41  ;;  %3749 = vrcp.f32 %v782_v48 }
 0x161   :  { %3751 = vrcp.f32 %v781_v37 }
 0x162   :  { %v477_v59 = vpop.f32.mrb[28].mxu1 }
 0x163   :  { %v4581_v39 = vadd.f32 %v477_v59, %v171_v43  ;;  %v479_v61 = vpop.f32.mrb[29].mxu1 }
 0x164   :  { %v4583_v50 = vadd.f32 %v479_v61, %v175_v47  ;;  %v481_v46 = vpop.f32.mrb[30].mxu1 }
 0x165   :  { %5601 = vst [vmem:[#allocation27_spill] sm:$0xff] %v4581_v39  ;;  %v4585_v38 = vadd.f32 %v481_v46, %v171_v43  ;;  %v483_v51 = vpop.f32.mrb[31].mxu1 }
 0x166   :  { %5602 = vst [vmem:[#allocation28_spill] sm:$0xff] %v4583_v50  ;;  %v4587_v36 = vadd.f32 %v483_v51, %v175_v47 }
 0x167   :  { %5603 = vst [vmem:[#allocation29_spill] sm:$0xff] %v4585_v38 }
 0x168   :  { %5604 = vst [vmem:[#allocation30_spill] sm:$0xff] %v4587_v36 }
 0x16a   :  { %v761_v42 = vpop.f32.mrb[32].mxu1  ;;  %v3750_v46 = vpop.eup %3749 }
 0x16b   :  { %v770_v41 = vadd.f32 %v761_v42, %v448_v44  ;;  %v763_v52 = vpop.f32.mrb[33].mxu1  ;;  %v3752_v38 = vpop.eup %3751  ;;  %v791_v36 = vmul.f32 0.0, %v3750_v46 }
 0x16c   :  { %v771_v59 = vadd.f32 %v763_v52, %v450_v28  ;;  %v765_v39 = vpop.f32.mrb[34].mxu1 }
 0x16d   :  { %v3383_v61 = vmul.f32 -1.442695, %v770_v41  ;;  %v766_v50 = vpop.f32.mrb[35].mxu1 }
 0x16e   :  { %3753 = vtanh.f32 %v771_v59 }
 0x16f   :  { %3755 = vpow2.f32 %v3383_v61 }
 0x178   :  { %v3754_v60 = vpop.eup %3753 }
 0x179   :  { %v3756_v51 = vpop.eup %3755  ;;  %v792_v30 = vmul.f32 %v3754_v60, %v3752_v38  ;;  %v5605_v60 = vmov 0  }
 0x17a   :  { %v783_v33 = vadd.f32 1.0, %v3756_v51 }
 0x17b   :  { %v4589_v40 = vadd.f32 %v792_v30, %v791_v36 }
 0x17c   :  { %3757 = vrcp.f32 %v783_v33 }
 0x17d   :  { %3759 = vtanh.f32 %v4589_v40 }
 0x186   :  { %v3758_v34 = vpop.eup %3757 }
 0x187   :  { %v3760_v28 = vpop.eup %3759 }
 0x188   :  { %v4592_v39 = vmul.f32 %v3760_v28, %v3758_v34 }
 0x18a   :  { %v802_v41 = vpack.c.bf16 %v4592_v39, %v4592_v39 }
 0x18c   :  { %836 = vmatmul.mubr.bf16.vlgmr.msra.gmra.mrb[4].mxu0 %v802_v41  ;;  %877 = vmatmul.mubr.bf16.vlgmr.msra.gmra.mrb[36].mxu1 %v802_v41 }
 0x18d   :  { %922 = vmatpush1.bf16.msra.mxu0 %v4254_v4  ;;  %963 = vmatpush1.bf16.msra.mxu1 %v4441_v63 }
 0x18e   :  { %923 = vmatprep.subr.bf16.mxu0 %v4263_v7  ;;  %964 = vmatprep.subr.bf16.mxu1 %v4444_v1 }
 0x18f   :  { %953 = vmatprep.mubr.bf16.mxu0 %v5605_v60  ;;  %994 = vmatprep.mubr.bf16.mxu1 %v5605_v60 }
 0x191   :  { %924 = vmatpush1.bf16.msra.mxu0 %v4266_v8  ;;  %965 = vmatpush1.bf16.msra.mxu1 %v4448_v2 }
 0x192   :  { %925 = vmatprep.subr.bf16.mxu0 %v4275_v11  ;;  %966 = vmatprep.subr.bf16.mxu1 %v4452_v5 }
 0x195   :  { %926 = vmatpush1.bf16.msra.mxu0 %v4281_v13  ;;  %967 = vmatpush1.bf16.msra.mxu1 %v4458_v6 }
 0x196   :  { %927 = vmatprep.subr.bf16.mxu0 %v4284_v14  ;;  %968 = vmatprep.subr.bf16.mxu1 %v4462_v9 }
 0x199   :  { %928 = vmatpush1.bf16.msra.mxu0 %v4293_v17  ;;  %969 = vmatpush1.bf16.msra.mxu1 %v4466_v10 }
 0x19a   :  { %929 = vmatprep.subr.bf16.mxu0 %v4296_v18  ;;  %970 = vmatprep.subr.bf16.mxu1 %v4470_v12 }
 0x19d   :  { %930 = vmatpush1.bf16.msra.mxu0 %v4305_v21  ;;  %971 = vmatpush1.bf16.msra.mxu1 %v4473_v15 }
 0x19e   :  { %931 = vmatprep.subr.bf16.mxu0 %v4308_v22  ;;  %972 = vmatprep.subr.bf16.mxu1 %v4476_v16 }
 0x1a1   :  { %932 = vmatpush1.bf16.msra.mxu0 %v4317_v25  ;;  %973 = vmatpush1.bf16.msra.mxu1 %v4479_v19 }
 0x1a2   :  { %933 = vmatprep.subr.bf16.mxu0 %v4320_v26  ;;  %974 = vmatprep.subr.bf16.mxu1 %v4483_v20 }
 0x1a5   :  { %934 = vmatpush1.bf16.msra.mxu0 %v4329_v29  ;;  %975 = vmatpush1.bf16.msra.mxu1 %v4486_v23 }
 0x1a6   :  { %935 = vmatprep.subr.bf16.mxu0 %v4335_v31  ;;  %976 = vmatprep.subr.bf16.mxu1 %v4489_v24 }
 0x1a9   :  { %936 = vmatpush1.bf16.msra.mxu0 %v4347_v35  ;;  %977 = vmatpush1.bf16.msra.mxu1 %v4492_v27 }
 0x1aa   :  { %1039 = vmatprep.subr.bf16.mxu0 %v4252_v3  ;;  %1080 = vmatprep.subr.bf16.mxu1 %v4437_v62 }
 0x25f   :  { %v837_v4 = vpop.f32.mrb[4].mxu0  ;;  %v878_v7 = vpop.f32.mrb[36].mxu1 }
 0x260   :  { %v885_v8 = vadd.f32 %v837_v4, %v4527_v45  ;;  %v887_v44 = vadd.f32 %v878_v7, %v4561_v32  ;;  %v839_v48 = vpop.f32.mrb[5].mxu0  ;;  %v880_v52 = vpop.f32.mrb[37].mxu1 }
 0x261   :  { %v886_v43 = vadd.f32 %v839_v48, %v4529_v49  ;;  %v888_v47 = vadd.f32 %v880_v52, %v4563_v53  ;;  %v841_v50 = vpop.f32.mrb[6].mxu0  ;;  %v882_v38 = vpop.f32.mrb[38].mxu1  ;;  %v4642_v48 = vld [vmem:[#allocation5] ss:$16 sps:$4 sm:$0xff]  }
 0x262   :  { %v3384_v36 = vmul.f32 -1.442695, %v885_v8  ;;  %v842_v37 = vpop.f32.mrb[7].mxu0  ;;  %v883_v42 = vpop.f32.mrb[39].mxu1  ;;  %v3386_v59 = vmul.f32 -1.442695, %v887_v44 }
 0x263   :  { %v3385_v3 = vmul.f32 -1.442695, %v886_v43  ;;  %v4652_v52 = vld [vmem:[#allocation5 + $0x20] ss:$16 sps:$4 sm:$0xff]  }
 0x264   :  { %3761 = vpow2.f32 %v3384_v36 }
 0x265   :  { %3763 = vpow2.f32 %v3385_v3 }
 0x266   :  { %3765 = vtanh.f32 %v888_v47 }
 0x267   :  { %3767 = vpow2.f32 %v3386_v59 }
 0x26e   :  { %v3762_v61 = vpop.eup %3761 }
 0x26f   :  { %v898_v46 = vadd.f32 1.0, %v3762_v61  ;;  %v3764_v45 = vpop.eup %3763 }
 0x270   :  { %v899_v32 = vadd.f32 1.0, %v3764_v45  ;;  %v3766_v49 = vpop.eup %3765 }
 0x271   :  { %3769 = vrcp.f32 %v898_v46  ;;  %v3768_v51 = vpop.eup %3767 }
 0x272   :  { %3771 = vrcp.f32 %v899_v32  ;;  %v900_v34 = vadd.f32 1.0, %v3768_v51 }
 0x274   :  { %3773 = vrcp.f32 %v900_v34  ;;  %v4712_v34 = vld [vmem:[#allocation5 + $0x64] ss:$16 sps:$4 sm:$0xff]  }
 0x27b   :  { %v3770_v53 = vpop.eup %3769 }
 0x27c   :  { %v909_v30 = vmul.f32 %v3770_v53, %v3766_v49  ;;  %v3772_v33 = vpop.eup %3771 }
 0x27d   :  { %v908_v28 = vmul.f32 %v3772_v33, %v4589_v40  ;;  %v4646_v40 = vld [vmem:[#allocation5 + $0x24] ss:$16 sps:$4 sm:$0xff]   ;;  %v4708_v33 = vld [vmem:[#allocation5 + $0x40] ss:$16 sps:$4 sm:$0xff]  }
 0x27e   :  { %v3774_v4 = vpop.eup %3773 }
 0x27f   :  { %v4635_v41 = vadd.f32 %v909_v30, %v908_v28  ;;  %v4704_v30 = vld [vmem:[#allocation5 + $0x44] ss:$16 sps:$4 sm:$0xff]   ;;  %v4716_v28 = vld [vmem:[#allocation5 + $0x60] ss:$16 sps:$4 sm:$0xff]  }
 0x281   :  { %3775 = vtanh.f32 %v4635_v41 }
 0x28b   :  { %v3776_v7 = vpop.eup %3775 }
 0x28c   :  { %v4638_v8 = vmul.f32 %v3776_v7, %v3774_v4  ;;  %v4724_v4 = vld [vmem:[#allocation5 + $0x80] ss:$16 sps:$4 sm:$0xff]   ;;  %v4728_v7 = vld [vmem:[#allocation5 + $0xa4] ss:$16 sps:$4 sm:$0xff]  }
 0x28e   :  { %v920_v44 = vpack.c.bf16 %v4638_v8, %v4638_v8 }
 0x290   :  { %954 = vmatmul.mubr.bf16.vlgmr.msra.gmra.mrb[8].mxu0 %v920_v44  ;;  %995 = vmatmul.mubr.bf16.vlgmr.msra.gmra.mrb[40].mxu1 %v920_v44  ;;  %v4732_v44 = vld [vmem:[#allocation5 + $0xa0] ss:$16 sps:$4 sm:$0xff]  }
 0x291   :  { %1040 = vmatpush1.bf16.msra.mxu0 %v4642_v48  ;;  %1081 = vmatpush1.bf16.msra.mxu1 %v4441_v63 }
 0x292   :  { %1041 = vmatprep.subr.bf16.mxu0 %v4646_v40  ;;  %1082 = vmatprep.subr.bf16.mxu1 %v4444_v1 }
 0x293   :  { %1071 = vmatprep.mubr.bf16.mxu0 %v5605_v60  ;;  %1112 = vmatprep.mubr.bf16.mxu1 %v5605_v60 }
 0x295   :  { %1042 = vmatpush1.bf16.msra.mxu0 %v4652_v52  ;;  %1083 = vmatpush1.bf16.msra.mxu1 %v4448_v2 }
 0x296   :  { %1043 = vmatprep.subr.bf16.mxu0 %v4275_v11  ;;  %1084 = vmatprep.subr.bf16.mxu1 %v4452_v5  ;;  %v4680_v11 = vld [vmem:[#allocation5 + $0x4] ss:$16 sps:$4 sm:$0xff]  }
 0x299   :  { %1044 = vmatpush1.bf16.msra.mxu0 %v4281_v13  ;;  %1085 = vmatpush1.bf16.msra.mxu1 %v4458_v6 }
 0x29a   :  { %1045 = vmatprep.subr.bf16.mxu0 %v4284_v14  ;;  %1086 = vmatprep.subr.bf16.mxu1 %v4462_v9 }
 0x29d   :  { %1046 = vmatpush1.bf16.msra.mxu0 %v4293_v17  ;;  %1087 = vmatpush1.bf16.msra.mxu1 %v4466_v10 }
 0x29e   :  { %1047 = vmatprep.subr.bf16.mxu0 %v4296_v18  ;;  %1088 = vmatprep.subr.bf16.mxu1 %v4470_v12 }
 0x2a1   :  { %1048 = vmatpush1.bf16.msra.mxu0 %v4305_v21  ;;  %1089 = vmatpush1.bf16.msra.mxu1 %v4473_v15 }
 0x2a2   :  { %1049 = vmatprep.subr.bf16.mxu0 %v4308_v22  ;;  %1090 = vmatprep.subr.bf16.mxu1 %v4476_v16 }
 0x2a5   :  { %1050 = vmatpush1.bf16.msra.mxu0 %v4317_v25  ;;  %1091 = vmatpush1.bf16.msra.mxu1 %v4479_v19 }
 0x2a6   :  { %1051 = vmatprep.subr.bf16.mxu0 %v4320_v26  ;;  %1092 = vmatprep.subr.bf16.mxu1 %v4483_v20 }
 0x2a9   :  { %1052 = vmatpush1.bf16.msra.mxu0 %v4329_v29  ;;  %1093 = vmatpush1.bf16.msra.mxu1 %v4486_v23 }
 0x2aa   :  { %1053 = vmatprep.subr.bf16.mxu0 %v4335_v31  ;;  %1094 = vmatprep.subr.bf16.mxu1 %v4489_v24 }
 0x2ad   :  { %1054 = vmatpush1.bf16.msra.mxu0 %v4347_v35  ;;  %1095 = vmatpush1.bf16.msra.mxu1 %v4492_v27 }
 0x2ae   :  { %1157 = vmatprep.subr.bf16.mxu0 %v4680_v11  ;;  %1198 = vmatprep.subr.bf16.mxu1 %v4437_v62 }
 0x363   :  { %v955_v13 = vpop.f32.mrb[8].mxu0  ;;  %v996_v14 = vpop.f32.mrb[40].mxu1 }
 0x364   :  { %v1003_v17 = vadd.f32 %v955_v13, %v4531_v54  ;;  %v1005_v18 = vadd.f32 %v996_v14, %v4565_v57  ;;  %v957_v21 = vpop.f32.mrb[9].mxu0  ;;  %v998_v22 = vpop.f32.mrb[41].mxu1  ;;  %v4736_v13 = vld [vmem:[#allocation5 + $0xc4] ss:$16 sps:$4 sm:$0xff]   ;;  %v4740_v14 = vld [vmem:[#allocation5 + $0xc0] ss:$16 sps:$4 sm:$0xff]  }
 0x365   :  { %v1004_v25 = vadd.f32 %v957_v21, %v4533_v56  ;;  %v1006_v26 = vadd.f32 %v998_v22, %v4567_v0  ;;  %v959_v29 = vpop.f32.mrb[10].mxu0  ;;  %v1000_v31 = vpop.f32.mrb[42].mxu1 }
 0x366   :  { %v3387_v35 = vmul.f32 -1.442695, %v1003_v17  ;;  %v960_v43 = vpop.f32.mrb[11].mxu0  ;;  %v1001_v47 = vpop.f32.mrb[43].mxu1  ;;  %v3389_v38 = vmul.f32 -1.442695, %v1005_v18 }
 0x367   :  { %v3388_v50 = vmul.f32 -1.442695, %v1004_v25  ;;  %v4744_v17 = vld [vmem:[#allocation5 + $0xe4] ss:$16 sps:$4 sm:$0xff]   ;;  %v4748_v18 = vld [vmem:[#allocation5 + $0xe0] ss:$16 sps:$4 sm:$0xff]  }
 0x368   :  { %3777 = vpow2.f32 %v3387_v35  ;;  %v5606_v35 = vld [vmem:[#allocation13_spill] sm:$0xff]  ;;  %v5607_v47 = vld [vmem:[#allocation22_spill] sm:$0xff] }
 0x369   :  { %3779 = vpow2.f32 %v3388_v50 }
 0x36a   :  { %3781 = vtanh.f32 %v1006_v26 }
 0x36b   :  { %3783 = vpow2.f32 %v3389_v38 }
 0x372   :  { %v3778_v36 = vpop.eup %3777 }
 0x373   :  { %v1016_v37 = vadd.f32 1.0, %v3778_v36  ;;  %v3780_v54 = vpop.eup %3779 }
 0x374   :  { %v1017_v57 = vadd.f32 1.0, %v3780_v54  ;;  %v3782_v56 = vpop.eup %3781 }
 0x375   :  { %3785 = vrcp.f32 %v1016_v37  ;;  %v3784_v42 = vpop.eup %3783 }
 0x376   :  { %3787 = vrcp.f32 %v1017_v57  ;;  %v1018_v61 = vadd.f32 1.0, %v3784_v42 }
 0x378   :  { %3789 = vrcp.f32 %v1018_v61 }
 0x37f   :  { %v3786_v0 = vpop.eup %3785 }
 0x380   :  { %v1027_v3 = vmul.f32 %v3786_v0, %v3782_v56  ;;  %v3788_v59 = vpop.eup %3787 }
 0x381   :  { %v1026_v46 = vmul.f32 %v3788_v59, %v4635_v41  ;;  %v4720_v41 = vld [vmem:[#allocation5 + $0x84] ss:$16 sps:$4 sm:$0xff]  }
 0x382   :  { %v3790_v32 = vpop.eup %3789 }
 0x383   :  { %v4689_v45 = vadd.f32 %v1027_v3, %v1026_v46 }
 0x385   :  { %3791 = vtanh.f32 %v4689_v45 }
 0x38f   :  { %v3792_v49 = vpop.eup %3791 }
 0x390   :  { %v4692_v51 = vmul.f32 %v3792_v49, %v3790_v32 }
 0x392   :  { %v1038_v53 = vpack.c.bf16 %v4692_v51, %v4692_v51 }
 0x394   :  { %1072 = vmatmul.mubr.bf16.vlgmr.msra.gmra.mrb[12].mxu0 %v1038_v53  ;;  %1113 = vmatmul.mubr.bf16.vlgmr.msra.gmra.mrb[44].mxu1 %v1038_v53 }
 0x395   :  { %1158 = vmatpush1.bf16.msra.mxu0 %v4642_v48  ;;  %1199 = vmatpush1.bf16.msra.mxu1 %v4441_v63 }
 0x396   :  { %1159 = vmatprep.subr.bf16.mxu0 %v4646_v40  ;;  %1200 = vmatprep.subr.bf16.mxu1 %v4444_v1 }
 0x397   :  { %1189 = vmatprep.mubr.bf16.mxu0 %v5605_v60  ;;  %1230 = vmatprep.mubr.bf16.mxu1 %v5605_v60 }
 0x399   :  { %1160 = vmatpush1.bf16.msra.mxu0 %v4652_v52  ;;  %1201 = vmatpush1.bf16.msra.mxu1 %v4448_v2 }
 0x39a   :  { %1161 = vmatprep.subr.bf16.mxu0 %v4704_v30  ;;  %1202 = vmatprep.subr.bf16.mxu1 %v4452_v5 }
 0x39d   :  { %1162 = vmatpush1.bf16.msra.mxu0 %v4708_v33  ;;  %1203 = vmatpush1.bf16.msra.mxu1 %v4458_v6 }
 0x39e   :  { %1163 = vmatprep.subr.bf16.mxu0 %v4712_v34  ;;  %1204 = vmatprep.subr.bf16.mxu1 %v4462_v9 }
 0x3a1   :  { %1164 = vmatpush1.bf16.msra.mxu0 %v4716_v28  ;;  %1205 = vmatpush1.bf16.msra.mxu1 %v4466_v10 }
 0x3a2   :  { %1165 = vmatprep.subr.bf16.mxu0 %v4720_v41  ;;  %1206 = vmatprep.subr.bf16.mxu1 %v4470_v12 }
 0x3a5   :  { %1166 = vmatpush1.bf16.msra.mxu0 %v4724_v4  ;;  %1207 = vmatpush1.bf16.msra.mxu1 %v4473_v15 }
 0x3a6   :  { %1167 = vmatprep.subr.bf16.mxu0 %v4728_v7  ;;  %1208 = vmatprep.subr.bf16.mxu1 %v4476_v16 }
 0x3a9   :  { %1168 = vmatpush1.bf16.msra.mxu0 %v4732_v44  ;;  %1209 = vmatpush1.bf16.msra.mxu1 %v4479_v19 }
 0x3aa   :  { %1169 = vmatprep.subr.bf16.mxu0 %v4736_v13  ;;  %1210 = vmatprep.subr.bf16.mxu1 %v4483_v20 }
 0x3ad   :  { %1170 = vmatpush1.bf16.msra.mxu0 %v4740_v14  ;;  %1211 = vmatpush1.bf16.msra.mxu1 %v4486_v23 }
 0x3ae   :  { %1171 = vmatprep.subr.bf16.mxu0 %v4744_v17  ;;  %1212 = vmatprep.subr.bf16.mxu1 %v4489_v24 }
 0x3b1   :  { %1172 = vmatpush1.bf16.msra.mxu0 %v4748_v18  ;;  %1213 = vmatpush1.bf16.msra.mxu1 %v4492_v27 }
 0x3b2   :  { %1275 = vmatprep.subr.bf16.mxu0 %v4680_v11  ;;  %1316 = vmatprep.subr.bf16.mxu1 %v4437_v62 }
 0x467   :  { %v1073_v21 = vpop.f32.mrb[12].mxu0  ;;  %v1114_v22 = vpop.f32.mrb[44].mxu1 }
 0x468   :  { %v1121_v25 = vadd.f32 %v1073_v21, %v4535_v58  ;;  %v1123_v26 = vadd.f32 %v1114_v22, %v4569_v55  ;;  %v1075_v29 = vpop.f32.mrb[13].mxu0  ;;  %v1116_v31 = vpop.f32.mrb[45].mxu1 }
 0x469   :  { %v1122_v43 = vadd.f32 %v1075_v29, %v5606_v35  ;;  %v1124_v50 = vadd.f32 %v1116_v31, %v5607_v47  ;;  %v1077_v38 = vpop.f32.mrb[14].mxu0  ;;  %v1118_v36 = vpop.f32.mrb[46].mxu1  ;;  %v5608_v35 = vld [vmem:[#allocation14_spill] sm:$0xff]  ;;  %v5609_v47 = vld [vmem:[#allocation23_spill] sm:$0xff] }
 0x46a   :  { %v3390_v37 = vmul.f32 -1.442695, %v1121_v25  ;;  %v1078_v54 = vpop.f32.mrb[15].mxu0  ;;  %v1119_v57 = vpop.f32.mrb[47].mxu1  ;;  %v3392_v42 = vmul.f32 -1.442695, %v1123_v26 }
 0x46b   :  { %v3391_v56 = vmul.f32 -1.442695, %v1122_v43  ;;  %v5611_v57 = vld [vmem:[#allocation24_spill] sm:$0xff] }
 0x46c   :  { %3793 = vpow2.f32 %v3390_v37  ;;  %v5610_v37 = vld [vmem:[#allocation15_spill] sm:$0xff] }
 0x46d   :  { %3795 = vpow2.f32 %v3391_v56 }
 0x46e   :  { %3797 = vtanh.f32 %v1124_v50 }
 0x46f   :  { %3799 = vpow2.f32 %v3392_v42 }
 0x476   :  { %v3794_v0 = vpop.eup %3793 }
 0x477   :  { %v1134_v3 = vadd.f32 1.0, %v3794_v0  ;;  %v3796_v58 = vpop.eup %3795 }
 0x478   :  { %v1135_v55 = vadd.f32 1.0, %v3796_v58  ;;  %v3798_v59 = vpop.eup %3797 }
 0x479   :  { %3801 = vrcp.f32 %v1134_v3  ;;  %v3800_v61 = vpop.eup %3799 }
 0x47a   :  { %3803 = vrcp.f32 %v1135_v55  ;;  %v1136_v53 = vadd.f32 1.0, %v3800_v61 }
 0x47c   :  { %3805 = vrcp.f32 %v1136_v53 }
 0x483   :  { %v3802_v46 = vpop.eup %3801 }
 0x484   :  { %v1145_v32 = vmul.f32 %v3802_v46, %v3798_v59  ;;  %v3804_v49 = vpop.eup %3803 }
 0x485   :  { %v1144_v21 = vmul.f32 %v3804_v49, %v4689_v45 }
 0x486   :  { %v3806_v25 = vpop.eup %3805 }
 0x487   :  { %v4759_v22 = vadd.f32 %v1145_v32, %v1144_v21 }
 0x489   :  { %3807 = vtanh.f32 %v4759_v22 }
 0x493   :  { %v3808_v26 = vpop.eup %3807 }
 0x494   :  { %v4762_v29 = vmul.f32 %v3808_v26, %v3806_v25 }
 0x496   :  { %v1156_v31 = vpack.c.bf16 %v4762_v29, %v4762_v29 }
 0x498   :  { %1190 = vmatmul.mubr.bf16.vlgmr.msra.gmra.mrb[16].mxu0 %v1156_v31  ;;  %1231 = vmatmul.mubr.bf16.vlgmr.msra.gmra.mrb[48].mxu1 %v1156_v31 }
 0x499   :  { %1276 = vmatpush1.bf16.msra.mxu0 %v4642_v48  ;;  %1317 = vmatpush1.bf16.msra.mxu1 %v4441_v63 }
 0x49a   :  { %1277 = vmatprep.subr.bf16.mxu0 %v4646_v40  ;;  %1318 = vmatprep.subr.bf16.mxu1 %v4444_v1 }
 0x49b   :  { %1307 = vmatprep.mubr.bf16.mxu0 %v5605_v60  ;;  %1348 = vmatprep.mubr.bf16.mxu1 %v5605_v60 }
 0x49d   :  { %1278 = vmatpush1.bf16.msra.mxu0 %v4652_v52  ;;  %1319 = vmatpush1.bf16.msra.mxu1 %v4448_v2 }
 0x49e   :  { %1279 = vmatprep.subr.bf16.mxu0 %v4704_v30  ;;  %1320 = vmatprep.subr.bf16.mxu1 %v4452_v5 }
 0x4a1   :  { %1280 = vmatpush1.bf16.msra.mxu0 %v4708_v33  ;;  %1321 = vmatpush1.bf16.msra.mxu1 %v4458_v6 }
 0x4a2   :  { %1281 = vmatprep.subr.bf16.mxu0 %v4712_v34  ;;  %1322 = vmatprep.subr.bf16.mxu1 %v4462_v9 }
 0x4a5   :  { %1282 = vmatpush1.bf16.msra.mxu0 %v4716_v28  ;;  %1323 = vmatpush1.bf16.msra.mxu1 %v4466_v10 }
 0x4a6   :  { %1283 = vmatprep.subr.bf16.mxu0 %v4720_v41  ;;  %1324 = vmatprep.subr.bf16.mxu1 %v4470_v12 }
 0x4a9   :  { %1284 = vmatpush1.bf16.msra.mxu0 %v4724_v4  ;;  %1325 = vmatpush1.bf16.msra.mxu1 %v4473_v15 }
 0x4aa   :  { %1285 = vmatprep.subr.bf16.mxu0 %v4728_v7  ;;  %1326 = vmatprep.subr.bf16.mxu1 %v4476_v16 }
 0x4ad   :  { %1286 = vmatpush1.bf16.msra.mxu0 %v4732_v44  ;;  %1327 = vmatpush1.bf16.msra.mxu1 %v4479_v19 }
 0x4ae   :  { %1287 = vmatprep.subr.bf16.mxu0 %v4736_v13  ;;  %1328 = vmatprep.subr.bf16.mxu1 %v4483_v20 }
 0x4b1   :  { %1288 = vmatpush1.bf16.msra.mxu0 %v4740_v14  ;;  %1329 = vmatpush1.bf16.msra.mxu1 %v4486_v23 }
 0x4b2   :  { %1289 = vmatprep.subr.bf16.mxu0 %v4744_v17  ;;  %1330 = vmatprep.subr.bf16.mxu1 %v4489_v24 }
 0x4b5   :  { %1290 = vmatpush1.bf16.msra.mxu0 %v4748_v18  ;;  %1331 = vmatpush1.bf16.msra.mxu1 %v4492_v27 }
 0x4b6   :  { %1393 = vmatprep.subr.bf16.mxu0 %v4680_v11  ;;  %1434 = vmatprep.subr.bf16.mxu1 %v4437_v62 }
 0x56b   :  { %v1191_v63 = vpop.f32.mrb[16].mxu0  ;;  %v1232_v45 = vpop.f32.mrb[48].mxu1 }
 0x56c   :  { %v1239_v43 = vadd.f32 %v1191_v63, %v5608_v35  ;;  %v1241_v50 = vadd.f32 %v1232_v45, %v5609_v47  ;;  %v1193_v38 = vpop.f32.mrb[17].mxu0  ;;  %v1234_v36 = vpop.f32.mrb[49].mxu1 }
 0x56d   :  { %v1240_v54 = vadd.f32 %v1193_v38, %v5610_v37  ;;  %v1242_v56 = vadd.f32 %v1234_v36, %v5611_v57  ;;  %v1195_v42 = vpop.f32.mrb[18].mxu0  ;;  %v1236_v0 = vpop.f32.mrb[50].mxu1  ;;  %v4813_v36 = vld [vmem:[#allocation5 + $0x8] ss:$16 sps:$4 sm:$0xff]  }
 0x56e   :  { %v3393_v3 = vmul.f32 -1.442695, %v1239_v43  ;;  %v1196_v58 = vpop.f32.mrb[19].mxu0  ;;  %v1237_v55 = vpop.f32.mrb[51].mxu1  ;;  %v3395_v62 = vmul.f32 -1.442695, %v1241_v50 }
 0x56f   :  { %v3394_v59 = vmul.f32 -1.442695, %v1240_v54 }
 0x570   :  { %3809 = vpow2.f32 %v3393_v3 }
 0x571   :  { %3811 = vpow2.f32 %v3394_v59 }
 0x572   :  { %3813 = vtanh.f32 %v1242_v56 }
 0x573   :  { %3815 = vpow2.f32 %v3395_v62 }
 0x57a   :  { %v3810_v61 = vpop.eup %3809 }
 0x57b   :  { %v1252_v46 = vadd.f32 1.0, %v3810_v61  ;;  %v3812_v32 = vpop.eup %3811 }
 0x57c   :  { %v1253_v49 = vadd.f32 1.0, %v3812_v32  ;;  %v3814_v53 = vpop.eup %3813 }
 0x57d   :  { %3817 = vrcp.f32 %v1252_v46  ;;  %v3816_v21 = vpop.eup %3815 }
 0x57e   :  { %3819 = vrcp.f32 %v1253_v49  ;;  %v1254_v63 = vadd.f32 1.0, %v3816_v21 }
 0x580   :  { %3821 = vrcp.f32 %v1254_v63  ;;  %v4019_v63 = vld [vmem:[#allocation5 + $0x2c] ss:$16 sps:$4 sm:$0xff]  }
 0x587   :  { %v3818_v25 = vpop.eup %3817 }
 0x588   :  { %v1263_v26 = vmul.f32 %v3818_v25, %v3814_v53  ;;  %v3820_v31 = vpop.eup %3819 }
 0x589   :  { %v1262_v45 = vmul.f32 %v3820_v31, %v4759_v22 }
 0x58a   :  { %v3822_v43 = vpop.eup %3821 }
 0x58b   :  { %v4805_v35 = vadd.f32 %v1263_v26, %v1262_v45  ;;  %v4020_v45 = vld [vmem:[#allocation5 + $0x28] ss:$16 sps:$4 sm:$0xff]  }
 0x58d   :  { %3823 = vtanh.f32 %v4805_v35 }
 0x597   :  { %v3824_v47 = vpop.eup %3823 }
 0x598   :  { %v4808_v50 = vmul.f32 %v3824_v47, %v3822_v43  ;;  %v4024_v43 = vld [vmem:[#allocation5 + $0x68] ss:$16 sps:$4 sm:$0xff]   ;;  %v3643_v47 = vld [vmem:[#allocation7 + $0x4] ss:$16 sps:$4 sm:$0xff]  }
 0x59a   :  { %v1274_v38 = vpack.c.bf16 %v4808_v50, %v4808_v50 }
 0x59c   :  { %1308 = vmatmul.mubr.bf16.vlgmr.msra.gmra.mrb[20].mxu0 %v1274_v38  ;;  %1349 = vmatmul.mubr.bf16.vlgmr.msra.gmra.mrb[52].mxu1 %v1274_v38 }
 0x59d   :  { %1394 = vmatpush1.bf16.msra.mxu0 %v4642_v48  ;;  %1435 = vmatpush1.bf16.msra.mxu1 %v4813_v36 }
 0x59e   :  { %1395 = vmatprep.subr.bf16.mxu0 %v4646_v40  ;;  %1436 = vmatprep.subr.bf16.mxu1 %v4444_v1  ;;  %v4018_v1 = vld [vmem:[#allocation5 + $0xc] ss:$16 sps:$4 sm:$0xff]  }
 0x59f   :  { %1425 = vmatprep.mubr.bf16.mxu0 %v5605_v60  ;;  %1466 = vmatprep.mubr.bf16.mxu1 %v5605_v60 }
 0x5a1   :  { %1396 = vmatpush1.bf16.msra.mxu0 %v4652_v52  ;;  %1437 = vmatpush1.bf16.msra.mxu1 %v4448_v2 }
 0x5a2   :  { %1397 = vmatprep.subr.bf16.mxu0 %v4704_v30  ;;  %1438 = vmatprep.subr.bf16.mxu1 %v4452_v5 }
 0x5a5   :  { %1398 = vmatpush1.bf16.msra.mxu0 %v4708_v33  ;;  %1439 = vmatpush1.bf16.msra.mxu1 %v4458_v6  ;;  %v5612_v6 = vld [vmem:[#allocation16_spill] sm:$0xff] }
 0x5a6   :  { %1399 = vmatprep.subr.bf16.mxu0 %v4712_v34  ;;  %1440 = vmatprep.subr.bf16.mxu1 %v4462_v9 }
 0x5a9   :  { %1400 = vmatpush1.bf16.msra.mxu0 %v4716_v28  ;;  %1441 = vmatpush1.bf16.msra.mxu1 %v4466_v10  ;;  %v5613_v10 = vld [vmem:[#allocation25_spill] sm:$0xff] }
 0x5aa   :  { %1401 = vmatprep.subr.bf16.mxu0 %v4720_v41  ;;  %1442 = vmatprep.subr.bf16.mxu1 %v4470_v12 }
 0x5ad   :  { %1402 = vmatpush1.bf16.msra.mxu0 %v4724_v4  ;;  %1443 = vmatpush1.bf16.msra.mxu1 %v4473_v15 }
 0x5ae   :  { %1403 = vmatprep.subr.bf16.mxu0 %v4728_v7  ;;  %1444 = vmatprep.subr.bf16.mxu1 %v4476_v16 }
 0x5b1   :  { %1404 = vmatpush1.bf16.msra.mxu0 %v4732_v44  ;;  %1445 = vmatpush1.bf16.msra.mxu1 %v4479_v19  ;;  %v5614_v19 = vld [vmem:[#allocation17_spill] sm:$0xff] }
 0x5b2   :  { %1405 = vmatprep.subr.bf16.mxu0 %v4736_v13  ;;  %1446 = vmatprep.subr.bf16.mxu1 %v4483_v20 }
 0x5b5   :  { %1406 = vmatpush1.bf16.msra.mxu0 %v4740_v14  ;;  %1447 = vmatpush1.bf16.msra.mxu1 %v4486_v23  ;;  %v5615_v23 = vld [vmem:[#allocation26_spill] sm:$0xff] }
 0x5b6   :  { %1407 = vmatprep.subr.bf16.mxu0 %v4744_v17  ;;  %1448 = vmatprep.subr.bf16.mxu1 %v4489_v24 }
 0x5b9   :  { %1408 = vmatpush1.bf16.msra.mxu0 %v4748_v18  ;;  %1449 = vmatpush1.bf16.msra.mxu1 %v4492_v27 }
 0x5ba   :  { %1511 = vmatprep.subr.bf16.mxu0 %v4680_v11  ;;  %1552 = vmatprep.subr.bf16.mxu1 %v4018_v1 }
 0x66f   :  { %v1309_v2 = vpop.f32.mrb[20].mxu0  ;;  %v1350_v5 = vpop.f32.mrb[52].mxu1 }
 0x670   :  { %v1357_v9 = vadd.f32 %v1309_v2, %v5612_v6  ;;  %v1359_v12 = vadd.f32 %v1350_v5, %v5613_v10  ;;  %v1311_v15 = vpop.f32.mrb[21].mxu0  ;;  %v1352_v16 = vpop.f32.mrb[53].mxu1  ;;  %v5617_v2 = vld [vmem:[#allocation27_spill] sm:$0xff]  ;;  %v5619_v10 = vld [vmem:[#allocation28_spill] sm:$0xff] }
 0x671   :  { %v1358_v20 = vadd.f32 %v1311_v15, %v5614_v19  ;;  %v1360_v24 = vadd.f32 %v1352_v16, %v5615_v23  ;;  %v1313_v22 = vpop.f32.mrb[22].mxu0  ;;  %v1354_v37 = vpop.f32.mrb[54].mxu1 }
 0x672   :  { %v3396_v54 = vmul.f32 -1.442695, %v1357_v9  ;;  %v1314_v27 = vpop.f32.mrb[23].mxu0  ;;  %v1355_v57 = vpop.f32.mrb[55].mxu1  ;;  %v3398_v56 = vmul.f32 -1.442695, %v1359_v12 }
 0x673   :  { %v3397_v11 = vmul.f32 -1.442695, %v1358_v20  ;;  %v5618_v9 = vld [vmem:[#allocation19_spill] sm:$0xff] }
 0x674   :  { %3825 = vpow2.f32 %v3396_v54 }
 0x675   :  { %3827 = vpow2.f32 %v3397_v11 }
 0x676   :  { %3829 = vtanh.f32 %v1360_v24 }
 0x677   :  { %3831 = vpow2.f32 %v3398_v56 }
 0x67e   :  { %v3826_v42 = vpop.eup %3825 }
 0x67f   :  { %v1370_v0 = vadd.f32 1.0, %v3826_v42  ;;  %v3828_v3 = vpop.eup %3827 }
 0x680   :  { %v1371_v58 = vadd.f32 1.0, %v3828_v3  ;;  %v3830_v55 = vpop.eup %3829 }
 0x681   :  { %3833 = vrcp.f32 %v1370_v0  ;;  %v3832_v59 = vpop.eup %3831 }
 0x682   :  { %3835 = vrcp.f32 %v1371_v58  ;;  %v1372_v32 = vadd.f32 1.0, %v3832_v59 }
 0x684   :  { %3837 = vrcp.f32 %v1372_v32  ;;  %v3644_v32 = vld [vmem:[#allocation7 + $0x8] ss:$16 sps:$4 sm:$0xff]  }
 0x68b   :  { %v3834_v62 = vpop.eup %3833 }
 0x68c   :  { %v1381_v61 = vmul.f32 %v3834_v62, %v3830_v55  ;;  %v3836_v46 = vpop.eup %3835 }
 0x68d   :  { %v1380_v49 = vmul.f32 %v3836_v46, %v4805_v35  ;;  %v4021_v35 = vld [vmem:[#allocation5 + $0x4c] ss:$16 sps:$4 sm:$0xff]   ;;  %v3641_v46 = vld [vmem:[#allocation7] ss:$16 sps:$4 sm:$0xff]  }
 0x68e   :  { %v3838_v21 = vpop.eup %3837 }
 0x68f   :  { %v4852_v53 = vadd.f32 %v1381_v61, %v1380_v49 }
 0x691   :  { %3839 = vtanh.f32 %v4852_v53 }
 0x69b   :  { %v3840_v25 = vpop.eup %3839 }
 0x69c   :  { %v4855_v26 = vmul.f32 %v3840_v25, %v3838_v21  ;;  %v3649_v21 = vld [vmem:[#allocation7 + $0x24] ss:$16 sps:$4 sm:$0xff]   ;;  %v3652_v25 = vld [vmem:[#allocation7 + $0x2c] ss:$16 sps:$4 sm:$0xff]  }
 0x69e   :  { %v1392_v31 = vpack.c.bf16 %v4855_v26, %v4855_v26 }
 0x6a0   :  { %1426 = vmatmul.mubr.bf16.vlgmr.msra.gmra.mrb[24].mxu0 %v1392_v31  ;;  %1467 = vmatmul.mubr.bf16.vlgmr.msra.gmra.mrb[56].mxu1 %v1392_v31  ;;  %v3650_v31 = vld [vmem:[#allocation7 + $0x28] ss:$16 sps:$4 sm:$0xff]  }
 0x6a1   :  { %1512 = vmatpush1.bf16.msra.mxu0 %v4642_v48  ;;  %1553 = vmatpush1.bf16.msra.mxu1 %v4813_v36  ;;  %v4022_v48 = vld [vmem:[#allocation5 + $0x48] ss:$16 sps:$4 sm:$0xff]   ;;  %v5616_v36 = vld [vmem:[#allocation18_spill] sm:$0xff] }
 0x6a2   :  { %1513 = vmatprep.subr.bf16.mxu0 %v4646_v40  ;;  %1554 = vmatprep.subr.bf16.mxu1 %v4019_v63  ;;  %v4023_v40 = vld [vmem:[#allocation5 + $0x6c] ss:$16 sps:$4 sm:$0xff]   ;;  %v3655_v63 = vld [vmem:[#allocation7 + $0x44] ss:$16 sps:$4 sm:$0xff]  }
 0x6a3   :  { %1543 = vmatprep.mubr.bf16.mxu0 %v5605_v60  ;;  %1584 = vmatprep.mubr.bf16.mxu1 %v5605_v60 }
 0x6a5   :  { %1514 = vmatpush1.bf16.msra.mxu0 %v4652_v52  ;;  %1555 = vmatpush1.bf16.msra.mxu1 %v4020_v45  ;;  %v4025_v52 = vld [vmem:[#allocation5 + $0x8c] ss:$16 sps:$4 sm:$0xff]  }
 0x6a6   :  { %1515 = vmatprep.subr.bf16.mxu0 %v4704_v30  ;;  %1556 = vmatprep.subr.bf16.mxu1 %v4021_v35  ;;  %v4026_v30 = vld [vmem:[#allocation5 + $0x88] ss:$16 sps:$4 sm:$0xff]   ;;  %v3658_v45 = vld [vmem:[#allocation7 + $0x4c] ss:$16 sps:$4 sm:$0xff]   ;;  %v3653_v35 = vld [vmem:[#allocation7 + $0x40] ss:$16 sps:$4 sm:$0xff]  }
 0x6a9   :  { %1516 = vmatpush1.bf16.msra.mxu0 %v4708_v33  ;;  %1557 = vmatpush1.bf16.msra.mxu1 %v4022_v48  ;;  %v4027_v33 = vld [vmem:[#allocation5 + $0xac] ss:$16 sps:$4 sm:$0xff]   ;;  %v3656_v48 = vld [vmem:[#allocation7 + $0x48] ss:$16 sps:$4 sm:$0xff]  }
 0x6aa   :  { %1517 = vmatprep.subr.bf16.mxu0 %v4712_v34  ;;  %1558 = vmatprep.subr.bf16.mxu1 %v4023_v40  ;;  %v4028_v34 = vld [vmem:[#allocation5 + $0xa8] ss:$16 sps:$4 sm:$0xff]   ;;  %v3661_v40 = vld [vmem:[#allocation7 + $0x64] ss:$16 sps:$4 sm:$0xff]  }
 0x6ad   :  { %1518 = vmatpush1.bf16.msra.mxu0 %v4716_v28  ;;  %1559 = vmatpush1.bf16.msra.mxu1 %v4024_v43  ;;  %v4029_v28 = vld [vmem:[#allocation5 + $0xcc] ss:$16 sps:$4 sm:$0xff]  }
 0x6ae   :  { %1519 = vmatprep.subr.bf16.mxu0 %v4720_v41  ;;  %1560 = vmatprep.subr.bf16.mxu1 %v4025_v52  ;;  %v4030_v41 = vld [vmem:[#allocation5 + $0xc8] ss:$16 sps:$4 sm:$0xff]   ;;  %v3664_v43 = vld [vmem:[#allocation7 + $0x6c] ss:$16 sps:$4 sm:$0xff]   ;;  %v3659_v52 = vld [vmem:[#allocation7 + $0x60] ss:$16 sps:$4 sm:$0xff]  }
 0x6b1   :  { %1520 = vmatpush1.bf16.msra.mxu0 %v4724_v4  ;;  %1561 = vmatpush1.bf16.msra.mxu1 %v4026_v30  ;;  %v4031_v4 = vld [vmem:[#allocation5 + $0xec] ss:$16 sps:$4 sm:$0xff]   ;;  %v3662_v30 = vld [vmem:[#allocation7 + $0x68] ss:$16 sps:$4 sm:$0xff]  }
 0x6b2   :  { %1521 = vmatprep.subr.bf16.mxu0 %v4728_v7  ;;  %1562 = vmatprep.subr.bf16.mxu1 %v4027_v33  ;;  %v4032_v7 = vld [vmem:[#allocation5 + $0xe8] ss:$16 sps:$4 sm:$0xff]   ;;  %v3667_v33 = vld [vmem:[#allocation7 + $0x84] ss:$16 sps:$4 sm:$0xff]  }
 0x6b5   :  { %1522 = vmatpush1.bf16.msra.mxu0 %v4732_v44  ;;  %1563 = vmatpush1.bf16.msra.mxu1 %v4028_v34  ;;  %v3646_v44 = vld [vmem:[#allocation7 + $0xc] ss:$16 sps:$4 sm:$0xff]  }
 0x6b6   :  { %1523 = vmatprep.subr.bf16.mxu0 %v4736_v13  ;;  %1564 = vmatprep.subr.bf16.mxu1 %v4029_v28  ;;  %v3670_v34 = vld [vmem:[#allocation7 + $0x8c] ss:$16 sps:$4 sm:$0xff]   ;;  %v3665_v28 = vld [vmem:[#allocation7 + $0x80] ss:$16 sps:$4 sm:$0xff]  }
 0x6b9   :  { %1524 = vmatpush1.bf16.msra.mxu0 %v4740_v14  ;;  %1565 = vmatpush1.bf16.msra.mxu1 %v4030_v41  ;;  %v3668_v41 = vld [vmem:[#allocation7 + $0x88] ss:$16 sps:$4 sm:$0xff]  }
 0x6ba   :  { %1525 = vmatprep.subr.bf16.mxu0 %v4744_v17  ;;  %1566 = vmatprep.subr.bf16.mxu1 %v4031_v4  ;;  %v3673_v4 = vld [vmem:[#allocation7 + $0xa4] ss:$16 sps:$4 sm:$0xff]  }
 0x6bd   :  { %1526 = vmatpush1.bf16.msra.mxu0 %v4748_v18  ;;  %1567 = vmatpush1.bf16.msra.mxu1 %v4032_v7  ;;  %v3676_v7 = vld [vmem:[#allocation7 + $0xac] ss:$16 sps:$4 sm:$0xff]  }
 0x6be   :  { %1883 = vmatprep.subr.bf16.mxu0 %v3643_v47  ;;  %1956 = vmatprep.subr.bf16.mxu1 %v3646_v44  ;;  %v3671_v47 = vld [vmem:[#allocation7 + $0xa0] ss:$16 sps:$4 sm:$0xff]   ;;  %v3674_v44 = vld [vmem:[#allocation7 + $0xa8] ss:$16 sps:$4 sm:$0xff]  }
 0x773   :  { %v1427_v38 = vpop.f32.mrb[24].mxu0  ;;  %v1468_v13 = vpop.f32.mrb[56].mxu1 }
 0x774   :  { %v1475_v1 = vadd.f32 %v1427_v38, %v5616_v36  ;;  %v1477_v14 = vadd.f32 %v1468_v13, %v5617_v2  ;;  %v1429_v5 = vpop.f32.mrb[25].mxu0  ;;  %v1470_v6 = vpop.f32.mrb[57].mxu1  ;;  %v3679_v38 = vld [vmem:[#allocation7 + $0xc4] ss:$16 sps:$4 sm:$0xff]   ;;  %v3682_v13 = vld [vmem:[#allocation7 + $0xcc] ss:$16 sps:$4 sm:$0xff]  }
 0x775   :  { %v1476_v17 = vadd.f32 %v1429_v5, %v5618_v9  ;;  %v1478_v12 = vadd.f32 %v1470_v6, %v5619_v10  ;;  %v1431_v15 = vpop.f32.mrb[26].mxu0  ;;  %v1472_v18 = vpop.f32.mrb[58].mxu1  ;;  %v3677_v36 = vld [vmem:[#allocation7 + $0xc0] ss:$16 sps:$4 sm:$0xff]   ;;  %v3685_v2 = vld [vmem:[#allocation7 + $0xe4] ss:$16 sps:$4 sm:$0xff]   ;;  %v1698_v9 = vpack.c.bf16 %v4638_v8, %v4592_v39  ;;  %v1700_v10 = vpack.c.bf16 %v4855_v26, %v4808_v50 }
 0x776   :  { %v3399_v16 = vmul.f32 -1.442695, %v1475_v1  ;;  %v1432_v19 = vpop.f32.mrb[27].mxu0  ;;  %v1473_v20 = vpop.f32.mrb[59].mxu1  ;;  %v3401_v24 = vmul.f32 -1.442695, %v1477_v14 }
 0x777   :  { %v3400_v23 = vmul.f32 -1.442695, %v1476_v17  ;;  %v3680_v1 = vld [vmem:[#allocation7 + $0xc8] ss:$16 sps:$4 sm:$0xff]   ;;  %v3688_v14 = vld [vmem:[#allocation7 + $0xec] ss:$16 sps:$4 sm:$0xff]   ;;  %v1699_v17 = vpack.c.bf16 %v4762_v29, %v4692_v51 }
 0x778   :  { %3841 = vpow2.f32 %v3399_v16  ;;  %v3683_v5 = vld [vmem:[#allocation7 + $0xe0] ss:$16 sps:$4 sm:$0xff]   ;;  %v3686_v6 = vld [vmem:[#allocation7 + $0xe8] ss:$16 sps:$4 sm:$0xff]   ;;  %v4903_v39 = vld [vmem:[#allocation9 + $0x4] ss:$16 sps:$4 sm:$0xff]  }
 0x779   :  { %3843 = vpow2.f32 %v3400_v23  ;;  %v4905_v8 = vld [vmem:[#allocation9 + $0xc] ss:$16 sps:$4 sm:$0xff]   ;;  %v4907_v51 = vld [vmem:[#allocation9] ss:$16 sps:$4 sm:$0xff]   ;;  %v4909_v29 = vld [vmem:[#allocation9 + $0x8] ss:$16 sps:$4 sm:$0xff]  }
 0x77a   :  { %3845 = vtanh.f32 %v1478_v12  ;;  %v4915_v50 = vld [vmem:[#allocation9 + $0x24] ss:$16 sps:$4 sm:$0xff]   ;;  %v4917_v26 = vld [vmem:[#allocation9 + $0x2c] ss:$16 sps:$4 sm:$0xff]   ;;  %v4919_v12 = vld [vmem:[#allocation9 + $0x20] ss:$16 sps:$4 sm:$0xff]  }
 0x77b   :  { %3847 = vpow2.f32 %v3401_v24  ;;  %v4921_v15 = vld [vmem:[#allocation9 + $0x28] ss:$16 sps:$4 sm:$0xff]   ;;  %v4927_v18 = vld [vmem:[#allocation9 + $0x44] ss:$16 sps:$4 sm:$0xff]   ;;  %v4929_v16 = vld [vmem:[#allocation9 + $0x4c] ss:$16 sps:$4 sm:$0xff]  }
 0x77c   :  { %v4931_v19 = vld [vmem:[#allocation9 + $0x40] ss:$16 sps:$4 sm:$0xff]   ;;  %v4933_v20 = vld [vmem:[#allocation9 + $0x48] ss:$16 sps:$4 sm:$0xff]   ;;  %v4939_v23 = vld [vmem:[#allocation9 + $0x64] ss:$16 sps:$4 sm:$0xff]  }
 0x77d   :  { %v4941_v24 = vld [vmem:[#allocation9 + $0x6c] ss:$16 sps:$4 sm:$0xff]  }
 0x782   :  { %v3842_v22 = vpop.eup %3841 }
 0x783   :  { %v1488_v37 = vadd.f32 1.0, %v3842_v22  ;;  %v3844_v54 = vpop.eup %3843  ;;  %v4943_v22 = vld [vmem:[#allocation9 + $0x60] ss:$16 sps:$4 sm:$0xff]  }
 0x784   :  { %v1489_v27 = vadd.f32 1.0, %v3844_v54  ;;  %v3846_v57 = vpop.eup %3845  ;;  %v4951_v54 = vld [vmem:[#allocation9 + $0x84] ss:$16 sps:$4 sm:$0xff]  }
 0x785   :  { %3849 = vrcp.f32 %v1488_v37  ;;  %v3848_v11 = vpop.eup %3847  ;;  %v4945_v37 = vld [vmem:[#allocation9 + $0x68] ss:$16 sps:$4 sm:$0xff]  }
 0x786   :  { %3851 = vrcp.f32 %v1489_v27  ;;  %v1490_v3 = vadd.f32 1.0, %v3848_v11  ;;  %v4953_v27 = vld [vmem:[#allocation9 + $0x8c] ss:$16 sps:$4 sm:$0xff]   ;;  %v4957_v11 = vld [vmem:[#allocation9 + $0x88] ss:$16 sps:$4 sm:$0xff]  }
 0x788   :  { %3853 = vrcp.f32 %v1490_v3  ;;  %v4969_v3 = vld [vmem:[#allocation9 + $0xa8] ss:$16 sps:$4 sm:$0xff]  }
 0x78f   :  { %v3850_v56 = vpop.eup %3849 }
 0x790   :  { %v1499_v42 = vmul.f32 %v3850_v56, %v3846_v57  ;;  %v3852_v0 = vpop.eup %3851  ;;  %v4955_v57 = vld [vmem:[#allocation9 + $0x80] ss:$16 sps:$4 sm:$0xff]   ;;  %v4963_v56 = vld [vmem:[#allocation9 + $0xa4] ss:$16 sps:$4 sm:$0xff]  }
 0x791   :  { %v1498_v58 = vmul.f32 %v3852_v0, %v4852_v53  ;;  %v3647_v53 = vld [vmem:[#allocation7 + $0x20] ss:$16 sps:$4 sm:$0xff]  }
 0x792   :  { %v3854_v59 = vpop.eup %3853  ;;  %v4967_v0 = vld [vmem:[#allocation9 + $0xa0] ss:$16 sps:$4 sm:$0xff]  }
 0x793   :  { %v4882_v55 = vadd.f32 %v1499_v42, %v1498_v58  ;;  %v4965_v42 = vld [vmem:[#allocation9 + $0xac] ss:$16 sps:$4 sm:$0xff]   ;;  %v4975_v58 = vld [vmem:[#allocation9 + $0xc4] ss:$16 sps:$4 sm:$0xff]  }
 0x795   :  { %3855 = vtanh.f32 %v4882_v55 }
 0x79f   :  { %v3856_v62 = vpop.eup %3855 }
 0x7a0   :  { %v4885_v61 = vmul.f32 %v3856_v62, %v3854_v59  ;;  %v4977_v59 = vld [vmem:[#allocation9 + $0xcc] ss:$16 sps:$4 sm:$0xff]   ;;  %v4979_v62 = vld [vmem:[#allocation9 + $0xc0] ss:$16 sps:$4 sm:$0xff]  }
 0x7a2   :  { %v1510_v49 = vpack.c.bf16 %v4885_v61, %v4885_v61 }
 0x7a4   :  { %1544 = vmatmul.mubr.bf16.vlgmr.msra.gmra.mrb[28].mxu0 %v1510_v49  ;;  %1585 = vmatmul.mubr.bf16.vlgmr.msra.gmra.mrb[60].mxu1 %v1510_v49  ;;  %v4989_v49 = vld [vmem:[#allocation9 + $0xec] ss:$16 sps:$4 sm:$0xff]  }
 0x7a5   :  { %1884 = vmatpush1.bf16.msra.mxu0 %v3641_v46  ;;  %1957 = vmatpush1.bf16.msra.mxu1 %v3644_v32  ;;  %v4981_v46 = vld [vmem:[#allocation9 + $0xc8] ss:$16 sps:$4 sm:$0xff]   ;;  %v4987_v32 = vld [vmem:[#allocation9 + $0xe4] ss:$16 sps:$4 sm:$0xff]  }
 0x7a6   :  { %1885 = vmatprep.subr.bf16.mxu0 %v3649_v21  ;;  %1958 = vmatprep.subr.bf16.mxu1 %v3652_v25  ;;  %v4991_v21 = vld [vmem:[#allocation9 + $0xe0] ss:$16 sps:$4 sm:$0xff]   ;;  %v4993_v25 = vld [vmem:[#allocation9 + $0xe8] ss:$16 sps:$4 sm:$0xff]  }
 0x7a7   :  { %1915 = vmatprep.mubr.bf16.mxu0 %v5605_v60  ;;  %1988 = vmatprep.mubr.bf16.mxu1 %v5605_v60 }
 0x7a9   :  { %1886 = vmatpush1.bf16.msra.mxu0 %v3647_v53  ;;  %1959 = vmatpush1.bf16.msra.mxu1 %v3650_v31 }
 0x7aa   :  { %1887 = vmatprep.subr.bf16.mxu0 %v3655_v63  ;;  %1960 = vmatprep.subr.bf16.mxu1 %v3658_v45  ;;  %v5620_v63 = vld [vmem:[#allocation20_spill] sm:$0xff] }
 0x7ad   :  { %1888 = vmatpush1.bf16.msra.mxu0 %v3653_v35  ;;  %1961 = vmatpush1.bf16.msra.mxu1 %v3656_v48  ;;  %v5621_v35 = vld [vmem:[#allocation29_spill] sm:$0xff] }
 0x7ae   :  { %1889 = vmatprep.subr.bf16.mxu0 %v3661_v40  ;;  %1962 = vmatprep.subr.bf16.mxu1 %v3664_v43 }
 0x7b1   :  { %1890 = vmatpush1.bf16.msra.mxu0 %v3659_v52  ;;  %1963 = vmatpush1.bf16.msra.mxu1 %v3662_v30  ;;  %v5622_v52 = vld [vmem:[#allocation21_spill] sm:$0xff] }
 0x7b2   :  { %1891 = vmatprep.subr.bf16.mxu0 %v3667_v33  ;;  %1964 = vmatprep.subr.bf16.mxu1 %v3670_v34  ;;  %v5623_v33 = vld [vmem:[#allocation30_spill] sm:$0xff] }
 0x7b5   :  { %1892 = vmatpush1.bf16.msra.mxu0 %v3665_v28  ;;  %1965 = vmatpush1.bf16.msra.mxu1 %v3668_v41 }
 0x7b6   :  { %1893 = vmatprep.subr.bf16.mxu0 %v3673_v4  ;;  %1966 = vmatprep.subr.bf16.mxu1 %v3676_v7 }
 0x7b9   :  { %1894 = vmatpush1.bf16.msra.mxu0 %v3671_v47  ;;  %1967 = vmatpush1.bf16.msra.mxu1 %v3674_v44 }
 0x7ba   :  { %1895 = vmatprep.subr.bf16.mxu0 %v3679_v38  ;;  %1968 = vmatprep.subr.bf16.mxu1 %v3682_v13 }
 0x7bd   :  { %1896 = vmatpush1.bf16.msra.mxu0 %v3677_v36  ;;  %1969 = vmatpush1.bf16.msra.mxu1 %v3680_v1 }
 0x7be   :  { %1897 = vmatprep.subr.bf16.mxu0 %v3685_v2  ;;  %1970 = vmatprep.subr.bf16.mxu1 %v3688_v14 }
 0x7c1   :  { %1898 = vmatpush1.bf16.msra.mxu0 %v3683_v5  ;;  %1971 = vmatpush1.bf16.msra.mxu1 %v3686_v6 }
 0x7c2   :  { %2230 = vmatprep.subr.bf16.mxu0 %v4903_v39  ;;  %2271 = vmatprep.subr.bf16.mxu1 %v4905_v8 }
 0x7c4   :  { %1916 = vmatmul.mubr.bf16.vlgmr.msra.gmra.mrb[32].mxu0 %v1698_v9  ;;  %1989 = vmatmul.mubr.bf16.vlgmr.msra.gmra.mrb[64].mxu1 %v1698_v9 }
 0x7c5   :  { %1925 = vmatprep.mubr.bf16.mxu0 %v5605_v60  ;;  %1998 = vmatprep.mubr.bf16.mxu1 %v5605_v60 }
 0x7c6   :  { %2231 = vmatpush1.bf16.msra.mxu0 %v4907_v51  ;;  %2272 = vmatpush1.bf16.msra.mxu1 %v4909_v29 }
 0x7c7   :  { %2232 = vmatprep.subr.bf16.mxu0 %v4915_v50  ;;  %2273 = vmatprep.subr.bf16.mxu1 %v4917_v26 }
 0x7ca   :  { %2233 = vmatpush1.bf16.msra.mxu0 %v4919_v12  ;;  %2274 = vmatpush1.bf16.msra.mxu1 %v4921_v15 }
 0x7cb   :  { %2234 = vmatprep.subr.bf16.mxu0 %v4927_v18  ;;  %2275 = vmatprep.subr.bf16.mxu1 %v4929_v16 }
 0x7cc   :  { %1926 = vmatmul.mubr.bf16.gmra.mrb[36].mxu0 %v1699_v17  ;;  %1999 = vmatmul.mubr.bf16.gmra.mrb[68].mxu1 %v1699_v17 }
 0x7cd   :  { %1935 = vmatprep.mubr.bf16.mxu0 %v5605_v60  ;;  %2008 = vmatprep.mubr.bf16.mxu1 %v5605_v60 }
 0x7ce   :  { %2235 = vmatpush1.bf16.msra.mxu0 %v4931_v19  ;;  %2276 = vmatpush1.bf16.msra.mxu1 %v4933_v20 }
 0x7cf   :  { %2236 = vmatprep.subr.bf16.mxu0 %v4939_v23  ;;  %2277 = vmatprep.subr.bf16.mxu1 %v4941_v24 }
 0x7d2   :  { %2237 = vmatpush1.bf16.msra.mxu0 %v4943_v22  ;;  %2278 = vmatpush1.bf16.msra.mxu1 %v4945_v37 }
 0x7d3   :  { %2238 = vmatprep.subr.bf16.mxu0 %v4951_v54  ;;  %2279 = vmatprep.subr.bf16.mxu1 %v4953_v27 }
 0x7d4   :  { %1936 = vmatmul.mubr.bf16.gmra.mrb[40].mxu0 %v1700_v10  ;;  %2009 = vmatmul.mubr.bf16.gmra.mrb[72].mxu1 %v1700_v10 }
 0x7d5   :  { %1945 = vmatprep.mubr.bf16.mxu0 %v5605_v60  ;;  %2018 = vmatprep.mubr.bf16.mxu1 %v5605_v60 }
 0x7d6   :  { %2239 = vmatpush1.bf16.msra.mxu0 %v4955_v57  ;;  %2280 = vmatpush1.bf16.msra.mxu1 %v4957_v11 }
 0x7d7   :  { %2240 = vmatprep.subr.bf16.mxu0 %v4963_v56  ;;  %2281 = vmatprep.subr.bf16.mxu1 %v4965_v42 }
 0x7da   :  { %2241 = vmatpush1.bf16.msra.mxu0 %v4967_v0  ;;  %2282 = vmatpush1.bf16.msra.mxu1 %v4969_v3 }
 0x7db   :  { %2242 = vmatprep.subr.bf16.mxu0 %v4975_v58  ;;  %2283 = vmatprep.subr.bf16.mxu1 %v4977_v59 }
 0x7de   :  { %2243 = vmatpush1.bf16.msra.mxu0 %v4979_v62  ;;  %2284 = vmatpush1.bf16.msra.mxu1 %v4981_v46 }
 0x7df   :  { %2244 = vmatprep.subr.bf16.mxu0 %v4987_v32  ;;  %2285 = vmatprep.subr.bf16.mxu1 %v4989_v49 }
 0x7e2   :  { %2245 = vmatpush1.bf16.msra.mxu0 %v4991_v21  ;;  %2286 = vmatpush1.bf16.msra.mxu1 %v4993_v25 }
 0x7e3   :  { %2346 = vmatprep.subr.bf16.mxu0 %v4903_v39  ;;  %2387 = vmatprep.subr.bf16.mxu1 %v4905_v8 }
 0x877   :  { %v1545_v53 = vpop.f32.mrb[28].mxu0  ;;  %v1586_v31 = vpop.f32.mrb[60].mxu1 }
 0x878   :  { %v1593_v45 = vadd.f32 %v1545_v53, %v5620_v63  ;;  %v1595_v48 = vadd.f32 %v1586_v31, %v5621_v35  ;;  %v1547_v40 = vpop.f32.mrb[29].mxu0  ;;  %v1588_v43 = vpop.f32.mrb[61].mxu1 }
 0x879   :  { %v1594_v30 = vadd.f32 %v1547_v40, %v5622_v52  ;;  %v1596_v34 = vadd.f32 %v1588_v43, %v5623_v33  ;;  %v1549_v28 = vpop.f32.mrb[30].mxu0  ;;  %v1590_v41 = vpop.f32.mrb[62].mxu1 }
 0x87a   :  { %v3402_v4 = vmul.f32 -1.442695, %v1593_v45  ;;  %v1550_v7 = vpop.f32.mrb[31].mxu0  ;;  %v1591_v47 = vpop.f32.mrb[63].mxu1  ;;  %v3404_v38 = vmul.f32 -1.442695, %v1595_v48 }
 0x87b   :  { %v3403_v44 = vmul.f32 -1.442695, %v1594_v30 }
 0x87c   :  { %3857 = vpow2.f32 %v3402_v4 }
 0x87d   :  { %3859 = vpow2.f32 %v3403_v44 }
 0x87e   :  { %3861 = vtanh.f32 %v1596_v34 }
 0x87f   :  { %3863 = vpow2.f32 %v3404_v38 }
 0x886   :  { %v3858_v13 = vpop.eup %3857 }
 0x887   :  { %v1606_v36 = vadd.f32 1.0, %v3858_v13  ;;  %v3860_v1 = vpop.eup %3859 }
 0x888   :  { %v1607_v2 = vadd.f32 1.0, %v3860_v1  ;;  %v3862_v14 = vpop.eup %3861 }
 0x889   :  { %3865 = vrcp.f32 %v1606_v36  ;;  %v3864_v5 = vpop.eup %3863 }
 0x88a   :  { %3867 = vrcp.f32 %v1607_v2  ;;  %v1608_v10 = vadd.f32 1.0, %v3864_v5 }
 0x88c   :  { %3869 = vrcp.f32 %v1608_v10 }
 0x893   :  { %v3866_v6 = vpop.eup %3865 }
 0x894   :  { %v1617_v9 = vmul.f32 %v3866_v6, %v3862_v14  ;;  %v3868_v17 = vpop.eup %3867 }
 0x895   :  { %v1616_v53 = vmul.f32 %v3868_v17, %v4882_v55 }
 0x896   :  { %v3870_v44 = vpop.eup %3869 }
 0x897   :  { %v5006_v31 = vpop.f32.mrb[32].mxu0  ;;  %v5008_v63 = vpop.f32.mrb[64].mxu1  ;;  %v1618_v45 = vadd.f32 %v1617_v9, %v1616_v53  ;;  %v5639_v53 = vmov 0.0|0.0  }
 0x898   :  { %v5010_v35 = vpop.f32.mrb[33].mxu0  ;;  %v5012_v48 = vpop.f32.mrb[65].mxu1 }
 0x899   :  { %v5014_v40 = vpop.f32.mrb[34].mxu0  ;;  %v5016_v43 = vpop.f32.mrb[66].mxu1  ;;  %3871 = vtanh.f32 %v1618_v45 }
 0x89a   :  { %v5018_v52 = vpop.f32.mrb[35].mxu0  ;;  %v5020_v30 = vpop.f32.mrb[67].mxu1 }
 0x89f   :  { %v5022_v55 = vpop.f32.mrb[36].mxu0  ;;  %v5024_v33 = vpop.f32.mrb[68].mxu1 }
 0x8a0   :  { %5624 = vst [vmem:[#allocation13_spill] sm:$0xff] %v5024_v33  ;;  %v5026_v34 = vpop.f32.mrb[37].mxu0  ;;  %v5028_v28 = vpop.f32.mrb[69].mxu1 }
 0x8a1   :  { %5625 = vst [vmem:[#allocation22_spill] sm:$0xff] %v5026_v34  ;;  %5626 = vst [vmem:[#allocation14_spill] sm:$0xff] %v5028_v28  ;;  %v5030_v41 = vpop.f32.mrb[38].mxu0  ;;  %v5032_v4 = vpop.f32.mrb[70].mxu1 }
 0x8a2   :  { %5627 = vst [vmem:[#allocation23_spill] sm:$0xff] %v5030_v41  ;;  %5628 = vst [vmem:[#allocation15_spill] sm:$0xff] %v5032_v4  ;;  %v5034_v7 = vpop.f32.mrb[39].mxu0  ;;  %v5036_v47 = vpop.f32.mrb[71].mxu1 }
 0x8a3   :  { %5629 = vst [vmem:[#allocation24_spill] sm:$0xff] %v5034_v7  ;;  %5630 = vst [vmem:[#allocation16_spill] sm:$0xff] %v5036_v47  ;;  %v3872_v38 = vpop.eup %3871 }
 0x8a4   :  { %v1620_v13 = vmul.f32 %v3872_v38, %v3870_v44 }
 0x8a6   :  { %v1701_v2 = vpack.c.bf16 %v1620_v13, %v4885_v61  ;;  %v1697_v61 = vld [vmem:[%s5572_s6] sm:$0xf] }
 0x8a7   :  { %v5038_v36 = vpop.f32.mrb[40].mxu0  ;;  %v5040_v1 = vpop.f32.mrb[72].mxu1 }
 0x8a8   :  { %5631 = vst [vmem:[#allocation25_spill] sm:$0xff] %v5038_v36  ;;  %5632 = vst [vmem:[#allocation17_spill] sm:$0xff] %v5040_v1  ;;  %v5043_v14 = vpop.f32.mrb[41].mxu0  ;;  %v5045_v5 = vpop.f32.mrb[73].mxu1  ;;  %1946 = vmatmul.mubr.bf16.gmra.mrb[44].mxu0 %v1701_v2  ;;  %2019 = vmatmul.mubr.bf16.gmra.mrb[76].mxu1 %v1701_v2 }
 0x8a9   :  { %5633 = vst [vmem:[#allocation26_spill] sm:$0xff] %v5043_v14  ;;  %5634 = vst [vmem:[#allocation18_spill] sm:$0xff] %v5045_v5  ;;  %v5047_v6 = vpop.f32.mrb[42].mxu0  ;;  %v5049_v9 = vpop.f32.mrb[74].mxu1  ;;  %2262 = vmatprep.mubr.bf16.mxu0 %v5605_v60  ;;  %2303 = vmatprep.mubr.bf16.mxu1 %v5605_v60 }
 0x8aa   :  { %5635 = vst [vmem:[#allocation27_spill] sm:$0xff] %v5047_v6  ;;  %5636 = vst [vmem:[#allocation19_spill] sm:$0xff] %v5049_v9  ;;  %v5051_v17 = vpop.f32.mrb[43].mxu0  ;;  %v5053_v10 = vpop.f32.mrb[75].mxu1 }
 0x8ab   :  { %5637 = vst [vmem:[#allocation28_spill] sm:$0xff] %v5051_v17  ;;  %5638 = vst [vmem:[#allocation20_spill] sm:$0xff] %v5053_v10  ;;  %v5646_v10 = vld [vmem:[#allocation12_spill] sm:$0xff] }
 0x8ac   :  { %v5647_v17 = vsub.s32 0, %v5646_v10  ;;  %v5648_v6 = vsub.s32 2, %v5646_v10 }
 0x8ae   :  { %v5110_v9 = vrot.slane %v1697_v61, %v5647_v17  ;;  %v5114_v5 = vrot.slane %v1697_v61, %v5648_v6 }
 0x8b0   :  { %2263 = vmatmul.mubr.bf16.vlgmr.msra.gmra.mrb[48].mxu0 %v5639_v53  ;;  %2304 = vmatmul.mubr.bf16.vlgmr.msra.gmra.mrb[80].mxu1 %v5639_v53  ;;  %v1918_v17 = vadd.f32 %v5006_v31, %v5110_v9 }
 0x8b1   :  { %2347 = vmatpush1.bf16.msra.mxu0 %v4907_v51  ;;  %2388 = vmatpush1.bf16.msra.mxu1 %v4909_v29 }
 0x8b2   :  { %2348 = vmatprep.subr.bf16.mxu0 %v4915_v50  ;;  %2389 = vmatprep.subr.bf16.mxu1 %v4917_v26 }
 0x8b3   :  { %2378 = vmatprep.mubr.bf16.mxu0 %v5605_v60  ;;  %2419 = vmatprep.mubr.bf16.mxu1 %v5605_v60 }
 0x8b5   :  { %2349 = vmatpush1.bf16.msra.mxu0 %v4919_v12  ;;  %2390 = vmatpush1.bf16.msra.mxu1 %v4921_v15 }
 0x8b6   :  { %2350 = vmatprep.subr.bf16.mxu0 %v4927_v18  ;;  %2391 = vmatprep.subr.bf16.mxu1 %v4929_v16 }
 0x8b9   :  { %2351 = vmatpush1.bf16.msra.mxu0 %v4931_v19  ;;  %2392 = vmatpush1.bf16.msra.mxu1 %v4933_v20 }
 0x8ba   :  { %2352 = vmatprep.subr.bf16.mxu0 %v4939_v23  ;;  %2393 = vmatprep.subr.bf16.mxu1 %v4941_v24 }
 0x8bd   :  { %2353 = vmatpush1.bf16.msra.mxu0 %v4943_v22  ;;  %2394 = vmatpush1.bf16.msra.mxu1 %v4945_v37 }
 0x8be   :  { %2354 = vmatprep.subr.bf16.mxu0 %v4951_v54  ;;  %2395 = vmatprep.subr.bf16.mxu1 %v4953_v27 }
 0x8c1   :  { %2355 = vmatpush1.bf16.msra.mxu0 %v4955_v57  ;;  %2396 = vmatpush1.bf16.msra.mxu1 %v4957_v11 }
 0x8c2   :  { %2356 = vmatprep.subr.bf16.mxu0 %v4963_v56  ;;  %2397 = vmatprep.subr.bf16.mxu1 %v4965_v42 }
 0x8c5   :  { %2357 = vmatpush1.bf16.msra.mxu0 %v4967_v0  ;;  %2398 = vmatpush1.bf16.msra.mxu1 %v4969_v3 }
 0x8c6   :  { %2358 = vmatprep.subr.bf16.mxu0 %v4975_v58  ;;  %2399 = vmatprep.subr.bf16.mxu1 %v4977_v59 }
 0x8c9   :  { %2359 = vmatpush1.bf16.msra.mxu0 %v4979_v62  ;;  %2400 = vmatpush1.bf16.msra.mxu1 %v4981_v46 }
 0x8ca   :  { %2360 = vmatprep.subr.bf16.mxu0 %v4987_v32  ;;  %2401 = vmatprep.subr.bf16.mxu1 %v4989_v49 }
 0x8cd   :  { %2361 = vmatpush1.bf16.msra.mxu0 %v4991_v21  ;;  %2402 = vmatpush1.bf16.msra.mxu1 %v4993_v25 }
 0x8ce   :  { %2462 = vmatprep.subr.bf16.mxu0 %v4903_v39  ;;  %2503 = vmatprep.subr.bf16.mxu1 %v4905_v8 }
 0x97b   :  { %v5096_v45 = vpop.f32.mrb[44].mxu0  ;;  %v5098_v44 = vpop.f32.mrb[76].mxu1 }
 0x97c   :  { %5640 = vst [vmem:[#allocation29_spill] sm:$0xff] %v5096_v45  ;;  %5641 = vst [vmem:[#allocation21_spill] sm:$0xff] %v5098_v44  ;;  %v5100_v38 = vpop.f32.mrb[45].mxu0  ;;  %v5102_v13 = vpop.f32.mrb[77].mxu1 }
 0x97d   :  { %5642 = vst [vmem:[#allocation30_spill] sm:$0xff] %v5100_v38  ;;  %5643 = vst [vmem:[#allocation31_spill] sm:$0xff] %v5102_v13  ;;  %v5104_v2 = vpop.f32.mrb[46].mxu0  ;;  %v5106_v53 = vpop.f32.mrb[78].mxu1  ;;  %v5651_v38 = vsub.s32 1, %v5646_v10 }
 0x97e   :  { %5644 = vst [vmem:[#allocation32_spill] sm:$0xff] %v5104_v2  ;;  %5645 = vst [vmem:[#allocation33_spill] sm:$0xff] %v5106_v53  ;;  %v5116_v14 = vpop.f32.mrb[47].mxu0  ;;  %v5118_v45 = vpop.f32.mrb[79].mxu1  ;;  %v5652_v2 = vsub.s32 3, %v5646_v10  ;;  %v1991_v53 = vadd.f32 %v5008_v63, %v5114_v5 }
 0x97f   :  { %5649 = vst [vmem:[#allocation12_spill] sm:$0xff] %v5116_v14  ;;  %5650 = vst [vmem:[#allocation34_spill] sm:$0xff] %v5118_v45  ;;  %v5122_v44 = vrot.slane %v1697_v61, %v5651_v38 }
 0x980   :  { %v5126_v13 = vrot.slane %v1697_v61, %v5652_v2 }
 0x981   :  { %v1920_v6 = vadd.f32 %v5010_v35, %v5122_v44 }
 0x982   :  { %v1993_v45 = vadd.f32 %v5012_v48, %v5126_v13 }
 0x983   :  { %v2264_v14 = vpop.f32.mrb[48].mxu0  ;;  %v2305_v1 = vpop.f32.mrb[80].mxu1 }
 0x984   :  { %v2312_v38 = vadd.f32 %v2264_v14, %v1918_v17  ;;  %v2314_v36 = vadd.f32 %v2305_v1, %v1991_v53  ;;  %v2266_v47 = vpop.f32.mrb[49].mxu0  ;;  %v2307_v10 = vpop.f32.mrb[81].mxu1 }
 0x985   :  { %v2313_v61 = vadd.f32 %v2266_v47, %v1920_v6  ;;  %v2315_v2 = vadd.f32 %v2307_v10, %v1993_v45  ;;  %v2268_v7 = vpop.f32.mrb[50].mxu0  ;;  %v2309_v4 = vpop.f32.mrb[82].mxu1  ;;  %v1922_v6 = vadd.f32 %v5014_v40, %v5110_v9  ;;  %v1924_v10 = vadd.f32 %v5018_v52, %v5122_v44 }
 0x986   :  { %v3469_v31 = vmul.f32 -1.442695, %v2312_v38  ;;  %v2269_v41 = vpop.f32.mrb[51].mxu0  ;;  %v2310_v28 = vpop.f32.mrb[83].mxu1  ;;  %v3471_v35 = vmul.f32 -1.442695, %v2314_v36  ;;  %v1995_v38 = vadd.f32 %v5016_v43, %v5114_v5 }
 0x987   :  { %v3470_v63 = vmul.f32 -1.442695, %v2313_v61  ;;  %v1997_v61 = vadd.f32 %v5020_v30, %v5126_v13 }
 0x988   :  { %3873 = vpow2.f32 %v3469_v31 }
 0x989   :  { %3875 = vpow2.f32 %v3470_v63 }
 0x98a   :  { %3877 = vtanh.f32 %v2315_v2 }
 0x98b   :  { %3879 = vpow2.f32 %v3471_v35 }
 0x992   :  { %v3874_v34 = vpop.eup %3873 }
 0x993   :  { %v2325_v33 = vadd.f32 1.0, %v3874_v34  ;;  %v3876_v48 = vpop.eup %3875 }
 0x994   :  { %v2326_v1 = vadd.f32 1.0, %v3876_v48  ;;  %v3878_v14 = vpop.eup %3877 }
 0x995   :  { %3881 = vrcp.f32 %v2325_v33  ;;  %v3880_v47 = vpop.eup %3879 }
 0x996   :  { %3883 = vrcp.f32 %v2326_v1  ;;  %v2327_v53 = vadd.f32 1.0, %v3880_v47 }
 0x998   :  { %3885 = vrcp.f32 %v2327_v53 }
 0x99f   :  { %v3882_v45 = vpop.eup %3881 }
 0x9a0   :  { %v2336_v7 = vmul.f32 %v3882_v45, %v3878_v14  ;;  %v3884_v4 = vpop.eup %3883 }
 0x9a1   :  { %v2335_v41 = vmul.f32 0.0, %v3884_v4 }
 0x9a2   :  { %v3886_v36 = vpop.eup %3885 }
 0x9a3   :  { %v5136_v28 = vadd.f32 %v2336_v7, %v2335_v41 }
 0x9a5   :  { %3887 = vtanh.f32 %v5136_v28 }
 0x9af   :  { %v3888_v34 = vpop.eup %3887 }
 0x9b0   :  { %v5139_v17 = vmul.f32 %v3888_v34, %v3886_v36 }
 0x9b2   :  { %v2345_v33 = vpack.c.bf16 %v5139_v17, %v5139_v17 }
 0x9b4   :  { %2379 = vmatmul.mubr.bf16.vlgmr.msra.gmra.mrb[52].mxu0 %v2345_v33  ;;  %2420 = vmatmul.mubr.bf16.vlgmr.msra.gmra.mrb[84].mxu1 %v2345_v33 }
 0x9b5   :  { %2463 = vmatpush1.bf16.msra.mxu0 %v4907_v51  ;;  %2504 = vmatpush1.bf16.msra.mxu1 %v4909_v29 }
 0x9b6   :  { %2464 = vmatprep.subr.bf16.mxu0 %v4915_v50  ;;  %2505 = vmatprep.subr.bf16.mxu1 %v4917_v26 }
 0x9b7   :  { %2494 = vmatprep.mubr.bf16.mxu0 %v5605_v60  ;;  %2535 = vmatprep.mubr.bf16.mxu1 %v5605_v60 }
 0x9b9   :  { %2465 = vmatpush1.bf16.msra.mxu0 %v4919_v12  ;;  %2506 = vmatpush1.bf16.msra.mxu1 %v4921_v15 }
 0x9ba   :  { %2466 = vmatprep.subr.bf16.mxu0 %v4927_v18  ;;  %2507 = vmatprep.subr.bf16.mxu1 %v4929_v16 }
 0x9bd   :  { %2467 = vmatpush1.bf16.msra.mxu0 %v4931_v19  ;;  %2508 = vmatpush1.bf16.msra.mxu1 %v4933_v20 }
 0x9be   :  { %2468 = vmatprep.subr.bf16.mxu0 %v4939_v23  ;;  %2509 = vmatprep.subr.bf16.mxu1 %v4941_v24 }
 0x9c1   :  { %2469 = vmatpush1.bf16.msra.mxu0 %v4943_v22  ;;  %2510 = vmatpush1.bf16.msra.mxu1 %v4945_v37 }
 0x9c2   :  { %2470 = vmatprep.subr.bf16.mxu0 %v4951_v54  ;;  %2511 = vmatprep.subr.bf16.mxu1 %v4953_v27 }
 0x9c5   :  { %2471 = vmatpush1.bf16.msra.mxu0 %v4955_v57  ;;  %2512 = vmatpush1.bf16.msra.mxu1 %v4957_v11 }
 0x9c6   :  { %2472 = vmatprep.subr.bf16.mxu0 %v4963_v56  ;;  %2513 = vmatprep.subr.bf16.mxu1 %v4965_v42 }
 0x9c9   :  { %2473 = vmatpush1.bf16.msra.mxu0 %v4967_v0  ;;  %2514 = vmatpush1.bf16.msra.mxu1 %v4969_v3 }
 0x9ca   :  { %2474 = vmatprep.subr.bf16.mxu0 %v4975_v58  ;;  %2515 = vmatprep.subr.bf16.mxu1 %v4977_v59 }
 0x9cd   :  { %2475 = vmatpush1.bf16.msra.mxu0 %v4979_v62  ;;  %2516 = vmatpush1.bf16.msra.mxu1 %v4981_v46 }
 0x9ce   :  { %2476 = vmatprep.subr.bf16.mxu0 %v4987_v32  ;;  %2517 = vmatprep.subr.bf16.mxu1 %v4989_v49 }
 0x9d1   :  { %2477 = vmatpush1.bf16.msra.mxu0 %v4991_v21  ;;  %2518 = vmatpush1.bf16.msra.mxu1 %v4993_v25 }
 0x9d2   :  { %2578 = vmatprep.subr.bf16.mxu0 %v4903_v39  ;;  %2619 = vmatprep.subr.bf16.mxu1 %v4905_v8 }
 0xa87   :  { %v2380_v2 = vpop.f32.mrb[52].mxu0  ;;  %v2421_v31 = vpop.f32.mrb[84].mxu1 }
 0xa88   :  { %v2428_v63 = vadd.f32 %v2380_v2, %v1922_v6  ;;  %v2430_v35 = vadd.f32 %v2421_v31, %v1995_v38  ;;  %v2382_v48 = vpop.f32.mrb[53].mxu0  ;;  %v2423_v1 = vpop.f32.mrb[85].mxu1 }
 0xa89   :  { %v2429_v14 = vadd.f32 %v2382_v48, %v1924_v10  ;;  %v2431_v47 = vadd.f32 %v2423_v1, %v1997_v61  ;;  %v2384_v45 = vpop.f32.mrb[54].mxu0  ;;  %v2425_v7 = vpop.f32.mrb[86].mxu1 }
 0xa8a   :  { %v3472_v40 = vmul.f32 -1.442695, %v2428_v63  ;;  %v2385_v4 = vpop.f32.mrb[55].mxu0  ;;  %v2426_v53 = vpop.f32.mrb[87].mxu1  ;;  %v3474_v52 = vmul.f32 -1.442695, %v2430_v35 }
 0xa8b   :  { %v3473_v43 = vmul.f32 -1.442695, %v2429_v14  ;;  %v5654_v7 = vld [vmem:[#allocation22_spill] sm:$0xff] }
 0xa8c   :  { %3889 = vpow2.f32 %v3472_v40  ;;  %v1930_v40 = vadd.f32 %v5654_v7, %v5122_v44  ;;  %v5655_v4 = vld [vmem:[#allocation14_spill] sm:$0xff] }
 0xa8d   :  { %3891 = vpow2.f32 %v3473_v43  ;;  %v2003_v53 = vadd.f32 %v5655_v4, %v5126_v13 }
 0xa8e   :  { %3893 = vtanh.f32 %v2431_v47  ;;  %v5653_v47 = vld [vmem:[#allocation13_spill] sm:$0xff] }
 0xa8f   :  { %3895 = vpow2.f32 %v3474_v52  ;;  %v2001_v45 = vadd.f32 %v5653_v47, %v5114_v5 }
 0xa96   :  { %v3890_v41 = vpop.eup %3889 }
 0xa97   :  { %v2441_v36 = vadd.f32 1.0, %v3890_v41  ;;  %v3892_v30 = vpop.eup %3891 }
 0xa98   :  { %v2442_v34 = vadd.f32 1.0, %v3892_v30  ;;  %v3894_v33 = vpop.eup %3893 }
 0xa99   :  { %3897 = vrcp.f32 %v2441_v36  ;;  %v3896_v6 = vpop.eup %3895 }
 0xa9a   :  { %3899 = vrcp.f32 %v2442_v34  ;;  %v2443_v2 = vadd.f32 1.0, %v3896_v6 }
 0xa9c   :  { %3901 = vrcp.f32 %v2443_v2 }
 0xaa3   :  { %v3898_v38 = vpop.eup %3897 }
 0xaa4   :  { %v2452_v10 = vmul.f32 %v3898_v38, %v3894_v33  ;;  %v3900_v61 = vpop.eup %3899 }
 0xaa5   :  { %v2451_v31 = vmul.f32 %v3900_v61, %v5136_v28  ;;  %v1928_v28 = vadd.f32 %v5022_v55, %v5110_v9 }
 0xaa6   :  { %v3902_v35 = vpop.eup %3901 }
 0xaa7   :  { %v5186_v63 = vadd.f32 %v2452_v10, %v2451_v31 }
 0xaa9   :  { %3903 = vtanh.f32 %v5186_v63 }
 0xab3   :  { %v3904_v48 = vpop.eup %3903 }
 0xab4   :  { %v5189_v1 = vmul.f32 %v3904_v48, %v3902_v35 }
 0xab6   :  { %v2461_v14 = vpack.c.bf16 %v5189_v1, %v5189_v1 }
 0xab8   :  { %2495 = vmatmul.mubr.bf16.vlgmr.msra.gmra.mrb[56].mxu0 %v2461_v14  ;;  %2536 = vmatmul.mubr.bf16.vlgmr.msra.gmra.mrb[88].mxu1 %v2461_v14 }
 0xab9   :  { %2579 = vmatpush1.bf16.msra.mxu0 %v4907_v51  ;;  %2620 = vmatpush1.bf16.msra.mxu1 %v4909_v29 }
 0xaba   :  { %2580 = vmatprep.subr.bf16.mxu0 %v4915_v50  ;;  %2621 = vmatprep.subr.bf16.mxu1 %v4917_v26 }
 0xabb   :  { %2610 = vmatprep.mubr.bf16.mxu0 %v5605_v60  ;;  %2651 = vmatprep.mubr.bf16.mxu1 %v5605_v60 }
 0xabd   :  { %2581 = vmatpush1.bf16.msra.mxu0 %v4919_v12  ;;  %2622 = vmatpush1.bf16.msra.mxu1 %v4921_v15 }
 0xabe   :  { %2582 = vmatprep.subr.bf16.mxu0 %v4927_v18  ;;  %2623 = vmatprep.subr.bf16.mxu1 %v4929_v16 }
 0xac1   :  { %2583 = vmatpush1.bf16.msra.mxu0 %v4931_v19  ;;  %2624 = vmatpush1.bf16.msra.mxu1 %v4933_v20 }
 0xac2   :  { %2584 = vmatprep.subr.bf16.mxu0 %v4939_v23  ;;  %2625 = vmatprep.subr.bf16.mxu1 %v4941_v24 }
 0xac5   :  { %2585 = vmatpush1.bf16.msra.mxu0 %v4943_v22  ;;  %2626 = vmatpush1.bf16.msra.mxu1 %v4945_v37 }
 0xac6   :  { %2586 = vmatprep.subr.bf16.mxu0 %v4951_v54  ;;  %2627 = vmatprep.subr.bf16.mxu1 %v4953_v27 }
 0xac9   :  { %2587 = vmatpush1.bf16.msra.mxu0 %v4955_v57  ;;  %2628 = vmatpush1.bf16.msra.mxu1 %v4957_v11 }
 0xaca   :  { %2588 = vmatprep.subr.bf16.mxu0 %v4963_v56  ;;  %2629 = vmatprep.subr.bf16.mxu1 %v4965_v42 }
 0xacd   :  { %2589 = vmatpush1.bf16.msra.mxu0 %v4967_v0  ;;  %2630 = vmatpush1.bf16.msra.mxu1 %v4969_v3 }
 0xace   :  { %2590 = vmatprep.subr.bf16.mxu0 %v4975_v58  ;;  %2631 = vmatprep.subr.bf16.mxu1 %v4977_v59 }
 0xad1   :  { %2591 = vmatpush1.bf16.msra.mxu0 %v4979_v62  ;;  %2632 = vmatpush1.bf16.msra.mxu1 %v4981_v46 }
 0xad2   :  { %2592 = vmatprep.subr.bf16.mxu0 %v4987_v32  ;;  %2633 = vmatprep.subr.bf16.mxu1 %v4989_v49 }
 0xad5   :  { %2593 = vmatpush1.bf16.msra.mxu0 %v4991_v21  ;;  %2634 = vmatpush1.bf16.msra.mxu1 %v4993_v25 }
 0xad6   :  { %2694 = vmatprep.subr.bf16.mxu0 %v4903_v39  ;;  %2735 = vmatprep.subr.bf16.mxu1 %v4905_v8 }
 0xb8b   :  { %v2496_v43 = vpop.f32.mrb[56].mxu0  ;;  %v2537_v52 = vpop.f32.mrb[88].mxu1 }
 0xb8c   :  { %v2544_v41 = vadd.f32 %v2496_v43, %v1928_v28  ;;  %v2546_v36 = vadd.f32 %v2537_v52, %v2001_v45  ;;  %v2498_v30 = vpop.f32.mrb[57].mxu0  ;;  %v2539_v34 = vpop.f32.mrb[89].mxu1 }
 0xb8d   :  { %v2545_v33 = vadd.f32 %v2498_v30, %v1930_v40  ;;  %v2547_v6 = vadd.f32 %v2539_v34, %v2003_v53  ;;  %v2500_v38 = vpop.f32.mrb[58].mxu0  ;;  %v2541_v10 = vpop.f32.mrb[90].mxu1 }
 0xb8e   :  { %v3475_v55 = vmul.f32 -1.442695, %v2544_v41  ;;  %v2501_v61 = vpop.f32.mrb[59].mxu0  ;;  %v2542_v2 = vpop.f32.mrb[91].mxu1  ;;  %v3477_v35 = vmul.f32 -1.442695, %v2546_v36 }
 0xb8f   :  { %v3476_v31 = vmul.f32 -1.442695, %v2545_v33  ;;  %v5657_v38 = vld [vmem:[#allocation15_spill] sm:$0xff]  ;;  %v5659_v2 = vld [vmem:[#allocation16_spill] sm:$0xff] }
 0xb90   :  { %3905 = vpow2.f32 %v3475_v55  ;;  %v2005_v10 = vadd.f32 %v5657_v38, %v5114_v5  ;;  %v5658_v55 = vld [vmem:[#allocation24_spill] sm:$0xff] }
 0xb91   :  { %3907 = vpow2.f32 %v3476_v31  ;;  %v1934_v61 = vadd.f32 %v5658_v55, %v5122_v44  ;;  %v2007_v31 = vadd.f32 %v5659_v2, %v5126_v13 }
 0xb92   :  { %3909 = vtanh.f32 %v2547_v6 }
 0xb93   :  { %3911 = vpow2.f32 %v3477_v35 }
 0xb9a   :  { %v3906_v48 = vpop.eup %3905 }
 0xb9b   :  { %v2557_v14 = vadd.f32 1.0, %v3906_v48  ;;  %v3908_v47 = vpop.eup %3907 }
 0xb9c   :  { %v2558_v28 = vadd.f32 1.0, %v3908_v47  ;;  %v3910_v45 = vpop.eup %3909 }
 0xb9d   :  { %3913 = vrcp.f32 %v2557_v14  ;;  %v3912_v7 = vpop.eup %3911 }
 0xb9e   :  { %3915 = vrcp.f32 %v2558_v28  ;;  %v2559_v43 = vadd.f32 1.0, %v3912_v7 }
 0xba0   :  { %3917 = vrcp.f32 %v2559_v43 }
 0xba7   :  { %v3914_v40 = vpop.eup %3913 }
 0xba8   :  { %v2568_v4 = vmul.f32 %v3914_v40, %v3910_v45  ;;  %v3916_v53 = vpop.eup %3915 }
 0xba9   :  { %v2567_v52 = vmul.f32 %v3916_v53, %v5186_v63  ;;  %v5656_v63 = vld [vmem:[#allocation23_spill] sm:$0xff] }
 0xbaa   :  { %v3918_v36 = vpop.eup %3917  ;;  %v1932_v6 = vadd.f32 %v5656_v63, %v5110_v9 }
 0xbab   :  { %v5236_v41 = vadd.f32 %v2568_v4, %v2567_v52 }
 0xbad   :  { %3919 = vtanh.f32 %v5236_v41 }
 0xbb7   :  { %v3920_v30 = vpop.eup %3919 }
 0xbb8   :  { %v5239_v34 = vmul.f32 %v3920_v30, %v3918_v36 }
 0xbba   :  { %v2577_v33 = vpack.c.bf16 %v5239_v34, %v5239_v34 }
 0xbbc   :  { %2611 = vmatmul.mubr.bf16.vlgmr.msra.gmra.mrb[60].mxu0 %v2577_v33  ;;  %2652 = vmatmul.mubr.bf16.vlgmr.msra.gmra.mrb[92].mxu1 %v2577_v33 }
 0xbbd   :  { %2695 = vmatpush1.bf16.msra.mxu0 %v4907_v51  ;;  %2736 = vmatpush1.bf16.msra.mxu1 %v4909_v29 }
 0xbbe   :  { %2696 = vmatprep.subr.bf16.mxu0 %v4915_v50  ;;  %2737 = vmatprep.subr.bf16.mxu1 %v4917_v26 }
 0xbbf   :  { %2726 = vmatprep.mubr.bf16.mxu0 %v5605_v60  ;;  %2767 = vmatprep.mubr.bf16.mxu1 %v5605_v60 }
 0xbc1   :  { %2697 = vmatpush1.bf16.msra.mxu0 %v4919_v12  ;;  %2738 = vmatpush1.bf16.msra.mxu1 %v4921_v15 }
 0xbc2   :  { %2698 = vmatprep.subr.bf16.mxu0 %v4927_v18  ;;  %2739 = vmatprep.subr.bf16.mxu1 %v4929_v16 }
 0xbc5   :  { %2699 = vmatpush1.bf16.msra.mxu0 %v4931_v19  ;;  %2740 = vmatpush1.bf16.msra.mxu1 %v4933_v20 }
 0xbc6   :  { %2700 = vmatprep.subr.bf16.mxu0 %v4939_v23  ;;  %2741 = vmatprep.subr.bf16.mxu1 %v4941_v24 }
 0xbc9   :  { %2701 = vmatpush1.bf16.msra.mxu0 %v4943_v22  ;;  %2742 = vmatpush1.bf16.msra.mxu1 %v4945_v37 }
 0xbca   :  { %2702 = vmatprep.subr.bf16.mxu0 %v4951_v54  ;;  %2743 = vmatprep.subr.bf16.mxu1 %v4953_v27 }
 0xbcd   :  { %2703 = vmatpush1.bf16.msra.mxu0 %v4955_v57  ;;  %2744 = vmatpush1.bf16.msra.mxu1 %v4957_v11 }
 0xbce   :  { %2704 = vmatprep.subr.bf16.mxu0 %v4963_v56  ;;  %2745 = vmatprep.subr.bf16.mxu1 %v4965_v42 }
 0xbd1   :  { %2705 = vmatpush1.bf16.msra.mxu0 %v4967_v0  ;;  %2746 = vmatpush1.bf16.msra.mxu1 %v4969_v3 }
 0xbd2   :  { %2706 = vmatprep.subr.bf16.mxu0 %v4975_v58  ;;  %2747 = vmatprep.subr.bf16.mxu1 %v4977_v59 }
 0xbd5   :  { %2707 = vmatpush1.bf16.msra.mxu0 %v4979_v62  ;;  %2748 = vmatpush1.bf16.msra.mxu1 %v4981_v46 }
 0xbd6   :  { %2708 = vmatprep.subr.bf16.mxu0 %v4987_v32  ;;  %2749 = vmatprep.subr.bf16.mxu1 %v4989_v49 }
 0xbd9   :  { %2709 = vmatpush1.bf16.msra.mxu0 %v4991_v21  ;;  %2750 = vmatpush1.bf16.msra.mxu1 %v4993_v25 }
 0xbda   :  { %2810 = vmatprep.subr.bf16.mxu0 %v4903_v39  ;;  %2851 = vmatprep.subr.bf16.mxu1 %v4905_v8 }
 0xc8f   :  { %v2612_v35 = vpop.f32.mrb[60].mxu0  ;;  %v2653_v48 = vpop.f32.mrb[92].mxu1 }
 0xc90   :  { %v2660_v14 = vadd.f32 %v2612_v35, %v1932_v6  ;;  %v2662_v47 = vadd.f32 %v2653_v48, %v2005_v10  ;;  %v2614_v28 = vpop.f32.mrb[61].mxu0  ;;  %v2655_v45 = vpop.f32.mrb[93].mxu1 }
 0xc91   :  { %v2661_v7 = vadd.f32 %v2614_v28, %v1934_v61  ;;  %v2663_v40 = vadd.f32 %v2655_v45, %v2007_v31  ;;  %v2616_v4 = vpop.f32.mrb[62].mxu0  ;;  %v2657_v53 = vpop.f32.mrb[94].mxu1 }
 0xc92   :  { %v3478_v43 = vmul.f32 -1.442695, %v2660_v14  ;;  %v2617_v52 = vpop.f32.mrb[63].mxu0  ;;  %v2658_v36 = vpop.f32.mrb[95].mxu1  ;;  %v3480_v33 = vmul.f32 -1.442695, %v2662_v47 }
 0xc93   :  { %v3479_v30 = vmul.f32 -1.442695, %v2661_v7 }
 0xc94   :  { %3921 = vpow2.f32 %v3478_v43 }
 0xc95   :  { %3923 = vpow2.f32 %v3479_v30 }
 0xc96   :  { %3925 = vtanh.f32 %v2663_v40 }
 0xc97   :  { %3927 = vpow2.f32 %v3480_v33  ;;  %v5343_v33 = vld [vmem:[#allocation9] ss:$16 sps:$4 sm:$0xff]  }
 0xc9e   :  { %v3922_v63 = vpop.eup %3921 }
 0xc9f   :  { %v2673_v38 = vadd.f32 1.0, %v3922_v63  ;;  %v3924_v55 = vpop.eup %3923  ;;  %v5346_v63 = vld [vmem:[#allocation9 + $0x8] ss:$16 sps:$4 sm:$0xff]  }
 0xca0   :  { %v2674_v6 = vadd.f32 1.0, %v3924_v55  ;;  %v3926_v10 = vpop.eup %3925  ;;  %v5352_v55 = vld [vmem:[#allocation9 + $0x2c] ss:$16 sps:$4 sm:$0xff]  }
 0xca1   :  { %3929 = vrcp.f32 %v2673_v38  ;;  %v3928_v61 = vpop.eup %3927  ;;  %v5349_v38 = vld [vmem:[#allocation9 + $0x24] ss:$16 sps:$4 sm:$0xff]  }
 0xca2   :  { %3931 = vrcp.f32 %v2674_v6  ;;  %v2675_v48 = vadd.f32 1.0, %v3928_v61  ;;  %v5357_v6 = vld [vmem:[#allocation9 + $0x20] ss:$16 sps:$4 sm:$0xff]   ;;  %v5363_v61 = vld [vmem:[#allocation9 + $0x44] ss:$16 sps:$4 sm:$0xff]  }
 0xca4   :  { %3933 = vrcp.f32 %v2675_v48  ;;  %v5375_v48 = vld [vmem:[#allocation9 + $0x64] ss:$16 sps:$4 sm:$0xff]  }
 0xcab   :  { %v3930_v2 = vpop.eup %3929 }
 0xcac   :  { %v2684_v31 = vmul.f32 %v3930_v2, %v3926_v10  ;;  %v3932_v35 = vpop.eup %3931  ;;  %v5360_v10 = vld [vmem:[#allocation9 + $0x28] ss:$16 sps:$4 sm:$0xff]   ;;  %v5366_v2 = vld [vmem:[#allocation9 + $0x4c] ss:$16 sps:$4 sm:$0xff]  }
 0xcad   :  { %v2683_v14 = vmul.f32 %v3932_v35, %v5236_v41  ;;  %v5372_v35 = vld [vmem:[#allocation9 + $0x48] ss:$16 sps:$4 sm:$0xff]  }
 0xcae   :  { %v3934_v47 = vpop.eup %3933 }
 0xcaf   :  { %v5286_v28 = vadd.f32 %v2684_v31, %v2683_v14  ;;  %v5369_v31 = vld [vmem:[#allocation9 + $0x40] ss:$16 sps:$4 sm:$0xff]   ;;  %v5378_v14 = vld [vmem:[#allocation9 + $0x6c] ss:$16 sps:$4 sm:$0xff]  }
 0xcb1   :  { %3935 = vtanh.f32 %v5286_v28 }
 0xcbb   :  { %v3936_v45 = vpop.eup %3935 }
 0xcbc   :  { %v5289_v7 = vmul.f32 %v3936_v45, %v3934_v47  ;;  %v5384_v47 = vld [vmem:[#allocation9 + $0x68] ss:$16 sps:$4 sm:$0xff]   ;;  %v5387_v45 = vld [vmem:[#allocation9 + $0x84] ss:$16 sps:$4 sm:$0xff]  }
 0xcbe   :  { %v2693_v40 = vpack.c.bf16 %v5289_v7, %v5289_v7 }
 0xcc0   :  { %2727 = vmatmul.mubr.bf16.vlgmr.msra.gmra.mrb[64].mxu0 %v2693_v40  ;;  %2768 = vmatmul.mubr.bf16.vlgmr.msra.gmra.mrb[96].mxu1 %v2693_v40  ;;  %v5390_v40 = vld [vmem:[#allocation9 + $0x8c] ss:$16 sps:$4 sm:$0xff]  }
 0xcc1   :  { %2811 = vmatpush1.bf16.msra.mxu0 %v4907_v51  ;;  %2852 = vmatpush1.bf16.msra.mxu1 %v4909_v29  ;;  %v5660_v51 = vld [vmem:[#allocation25_spill] sm:$0xff] }
 0xcc2   :  { %2812 = vmatprep.subr.bf16.mxu0 %v4915_v50  ;;  %2853 = vmatprep.subr.bf16.mxu1 %v4917_v26  ;;  %v1938_v29 = vadd.f32 %v5660_v51, %v5110_v9  ;;  %v5661_v50 = vld [vmem:[#allocation17_spill] sm:$0xff]  ;;  %v5393_v51 = vld [vmem:[#allocation9 + $0x80] ss:$16 sps:$4 sm:$0xff]  }
 0xcc3   :  { %2842 = vmatprep.mubr.bf16.mxu0 %v5605_v60  ;;  %2883 = vmatprep.mubr.bf16.mxu1 %v5605_v60  ;;  %v2011_v26 = vadd.f32 %v5661_v50, %v5114_v5  ;;  %v5399_v50 = vld [vmem:[#allocation9 + $0xa4] ss:$16 sps:$4 sm:$0xff]  }
 0xcc5   :  { %2813 = vmatpush1.bf16.msra.mxu0 %v4919_v12  ;;  %2854 = vmatpush1.bf16.msra.mxu1 %v4921_v15  ;;  %v5662_v12 = vld [vmem:[#allocation26_spill] sm:$0xff] }
 0xcc6   :  { %2814 = vmatprep.subr.bf16.mxu0 %v4927_v18  ;;  %2855 = vmatprep.subr.bf16.mxu1 %v4929_v16  ;;  %v1940_v15 = vadd.f32 %v5662_v12, %v5122_v44  ;;  %v5663_v18 = vld [vmem:[#allocation18_spill] sm:$0xff] }
 0xcc7   :  { %v2013_v16 = vadd.f32 %v5663_v18, %v5126_v13  ;;  %v5405_v12 = vld [vmem:[#allocation9 + $0xa0] ss:$16 sps:$4 sm:$0xff]   ;;  %v5411_v18 = vld [vmem:[#allocation9 + $0xc4] ss:$16 sps:$4 sm:$0xff]  }
 0xcc9   :  { %2815 = vmatpush1.bf16.msra.mxu0 %v4931_v19  ;;  %2856 = vmatpush1.bf16.msra.mxu1 %v4933_v20 }
 0xcca   :  { %2816 = vmatprep.subr.bf16.mxu0 %v4939_v23  ;;  %2857 = vmatprep.subr.bf16.mxu1 %v4941_v24 }
 0xccd   :  { %2817 = vmatpush1.bf16.msra.mxu0 %v4943_v22  ;;  %2858 = vmatpush1.bf16.msra.mxu1 %v4945_v37 }
 0xcce   :  { %2818 = vmatprep.subr.bf16.mxu0 %v4951_v54  ;;  %2859 = vmatprep.subr.bf16.mxu1 %v4953_v27 }
 0xcd1   :  { %2819 = vmatpush1.bf16.msra.mxu0 %v4955_v57  ;;  %2860 = vmatpush1.bf16.msra.mxu1 %v4957_v11 }
 0xcd2   :  { %2820 = vmatprep.subr.bf16.mxu0 %v4963_v56  ;;  %2861 = vmatprep.subr.bf16.mxu1 %v4965_v42 }
 0xcd5   :  { %2821 = vmatpush1.bf16.msra.mxu0 %v4967_v0  ;;  %2862 = vmatpush1.bf16.msra.mxu1 %v4969_v3 }
 0xcd6   :  { %2822 = vmatprep.subr.bf16.mxu0 %v4975_v58  ;;  %2863 = vmatprep.subr.bf16.mxu1 %v4977_v59 }
 0xcd9   :  { %2823 = vmatpush1.bf16.msra.mxu0 %v4979_v62  ;;  %2864 = vmatpush1.bf16.msra.mxu1 %v4981_v46 }
 0xcda   :  { %2824 = vmatprep.subr.bf16.mxu0 %v4987_v32  ;;  %2865 = vmatprep.subr.bf16.mxu1 %v4989_v49 }
 0xcdd   :  { %2825 = vmatpush1.bf16.msra.mxu0 %v4991_v21  ;;  %2866 = vmatpush1.bf16.msra.mxu1 %v4993_v25 }
 0xcde   :  { %2926 = vmatprep.subr.bf16.mxu0 %v4903_v39  ;;  %2967 = vmatprep.subr.bf16.mxu1 %v4905_v8 }
 0xd93   :  { %v2728_v19 = vpop.f32.mrb[64].mxu0  ;;  %v2769_v20 = vpop.f32.mrb[96].mxu1 }
 0xd94   :  { %v2776_v23 = vadd.f32 %v2728_v19, %v1938_v29  ;;  %v2778_v24 = vadd.f32 %v2769_v20, %v2011_v26  ;;  %v2730_v22 = vpop.f32.mrb[65].mxu0  ;;  %v2771_v39 = vpop.f32.mrb[97].mxu1  ;;  %v5396_v29 = vld [vmem:[#allocation9 + $0x88] ss:$16 sps:$4 sm:$0xff]   ;;  %v5402_v26 = vld [vmem:[#allocation9 + $0xac] ss:$16 sps:$4 sm:$0xff]  }
 0xd95   :  { %v2777_v37 = vadd.f32 %v2730_v22, %v1940_v15  ;;  %v2779_v8 = vadd.f32 %v2771_v39, %v2013_v16  ;;  %v2732_v54 = vpop.f32.mrb[66].mxu0  ;;  %v2773_v27 = vpop.f32.mrb[98].mxu1  ;;  %v5408_v15 = vld [vmem:[#allocation9 + $0xa8] ss:$16 sps:$4 sm:$0xff]   ;;  %v5414_v16 = vld [vmem:[#allocation9 + $0xcc] ss:$16 sps:$4 sm:$0xff]  }
 0xd96   :  { %v3481_v57 = vmul.f32 -1.442695, %v2776_v23  ;;  %v2733_v11 = vpop.f32.mrb[67].mxu0  ;;  %v2774_v56 = vpop.f32.mrb[99].mxu1  ;;  %v3483_v0 = vmul.f32 -1.442695, %v2778_v24 }
 0xd97   :  { %v3482_v42 = vmul.f32 -1.442695, %v2777_v37  ;;  %v5417_v19 = vld [vmem:[#allocation9 + $0xc0] ss:$16 sps:$4 sm:$0xff]   ;;  %v5420_v20 = vld [vmem:[#allocation9 + $0xc8] ss:$16 sps:$4 sm:$0xff]  }
 0xd98   :  { %3937 = vpow2.f32 %v3481_v57  ;;  %v5423_v23 = vld [vmem:[#allocation9 + $0xe4] ss:$16 sps:$4 sm:$0xff]   ;;  %v5426_v24 = vld [vmem:[#allocation9 + $0xec] ss:$16 sps:$4 sm:$0xff]   ;;  %v5429_v22 = vld [vmem:[#allocation9 + $0xe0] ss:$16 sps:$4 sm:$0xff]  }
 0xd99   :  { %3939 = vpow2.f32 %v3482_v42  ;;  %v5432_v39 = vld [vmem:[#allocation9 + $0xe8] ss:$16 sps:$4 sm:$0xff]   ;;  %v4063_v37 = vld [vmem:[#allocation9 + $0x4] ss:$16 sps:$4 sm:$0xff]  }
 0xd9a   :  { %3941 = vtanh.f32 %v2779_v8  ;;  %v4064_v8 = vld [vmem:[#allocation9 + $0xc] ss:$16 sps:$4 sm:$0xff]   ;;  %v5666_v56 = vld [vmem:[#allocation28_spill] sm:$0xff] }
 0xd9b   :  { %3943 = vpow2.f32 %v3483_v0  ;;  %v5664_v54 = vld [vmem:[#allocation27_spill] sm:$0xff]  ;;  %v1944_v42 = vadd.f32 %v5666_v56, %v5122_v44  ;;  %v5667_v0 = vld [vmem:[#allocation20_spill] sm:$0xff] }
 0xd9c   :  { %v1942_v27 = vadd.f32 %v5664_v54, %v5110_v9  ;;  %v5665_v57 = vld [vmem:[#allocation19_spill] sm:$0xff] }
 0xd9d   :  { %v2015_v11 = vadd.f32 %v5665_v57, %v5114_v5 }
 0xda2   :  { %v3938_v3 = vpop.eup %3937 }
 0xda3   :  { %v2789_v58 = vadd.f32 1.0, %v3938_v3  ;;  %v3940_v59 = vpop.eup %3939  ;;  %v2017_v3 = vadd.f32 %v5667_v0, %v5126_v13 }
 0xda4   :  { %v2790_v62 = vadd.f32 1.0, %v3940_v59  ;;  %v3942_v46 = vpop.eup %3941 }
 0xda5   :  { %3945 = vrcp.f32 %v2789_v58  ;;  %v3944_v32 = vpop.eup %3943 }
 0xda6   :  { %3947 = vrcp.f32 %v2790_v62  ;;  %v2791_v41 = vadd.f32 1.0, %v3944_v32 }
 0xda8   :  { %3949 = vrcp.f32 %v2791_v41 }
 0xdaf   :  { %v3946_v49 = vpop.eup %3945 }
 0xdb0   :  { %v2800_v21 = vmul.f32 %v3946_v49, %v3942_v46  ;;  %v3948_v25 = vpop.eup %3947 }
 0xdb1   :  { %v2799_v4 = vmul.f32 %v3948_v25, %v5286_v28  ;;  %v5381_v28 = vld [vmem:[#allocation9 + $0x60] ss:$16 sps:$4 sm:$0xff]  }
 0xdb2   :  { %v3950_v43 = vpop.eup %3949 }
 0xdb3   :  { %v5336_v53 = vadd.f32 %v2800_v21, %v2799_v4 }
 0xdb5   :  { %3951 = vtanh.f32 %v5336_v53 }
 0xdbf   :  { %v3952_v52 = vpop.eup %3951 }
 0xdc0   :  { %v5339_v36 = vmul.f32 %v3952_v52, %v3950_v43 }
 0xdc2   :  { %v2809_v30 = vpack.c.bf16 %v5339_v36, %v5339_v36 }
 0xdc4   :  { %2843 = vmatmul.mubr.bf16.vlgmr.msra.gmra.mrb[68].mxu0 %v2809_v30  ;;  %2884 = vmatmul.mubr.bf16.vlgmr.msra.gmra.mrb[100].mxu1 %v2809_v30 }
 0xdc5   :  { %2927 = vmatpush1.bf16.msra.mxu0 %v5343_v33  ;;  %2968 = vmatpush1.bf16.msra.mxu1 %v5346_v63 }
 0xdc6   :  { %2928 = vmatprep.subr.bf16.mxu0 %v5349_v38  ;;  %2969 = vmatprep.subr.bf16.mxu1 %v5352_v55 }
 0xdc7   :  { %2958 = vmatprep.mubr.bf16.mxu0 %v5605_v60  ;;  %2999 = vmatprep.mubr.bf16.mxu1 %v5605_v60 }
 0xdc9   :  { %2929 = vmatpush1.bf16.msra.mxu0 %v5357_v6  ;;  %2970 = vmatpush1.bf16.msra.mxu1 %v5360_v10 }
 0xdca   :  { %2930 = vmatprep.subr.bf16.mxu0 %v5363_v61  ;;  %2971 = vmatprep.subr.bf16.mxu1 %v5366_v2 }
 0xdcd   :  { %2931 = vmatpush1.bf16.msra.mxu0 %v5369_v31  ;;  %2972 = vmatpush1.bf16.msra.mxu1 %v5372_v35 }
 0xdce   :  { %2932 = vmatprep.subr.bf16.mxu0 %v5375_v48  ;;  %2973 = vmatprep.subr.bf16.mxu1 %v5378_v14 }
 0xdd1   :  { %2933 = vmatpush1.bf16.msra.mxu0 %v5381_v28  ;;  %2974 = vmatpush1.bf16.msra.mxu1 %v5384_v47 }
 0xdd2   :  { %2934 = vmatprep.subr.bf16.mxu0 %v5387_v45  ;;  %2975 = vmatprep.subr.bf16.mxu1 %v5390_v40 }
 0xdd5   :  { %2935 = vmatpush1.bf16.msra.mxu0 %v5393_v51  ;;  %2976 = vmatpush1.bf16.msra.mxu1 %v5396_v29 }
 0xdd6   :  { %2936 = vmatprep.subr.bf16.mxu0 %v5399_v50  ;;  %2977 = vmatprep.subr.bf16.mxu1 %v5402_v26 }
 0xdd9   :  { %2937 = vmatpush1.bf16.msra.mxu0 %v5405_v12  ;;  %2978 = vmatpush1.bf16.msra.mxu1 %v5408_v15 }
 0xdda   :  { %2938 = vmatprep.subr.bf16.mxu0 %v5411_v18  ;;  %2979 = vmatprep.subr.bf16.mxu1 %v5414_v16 }
 0xddd   :  { %2939 = vmatpush1.bf16.msra.mxu0 %v5417_v19  ;;  %2980 = vmatpush1.bf16.msra.mxu1 %v5420_v20 }
 0xdde   :  { %2940 = vmatprep.subr.bf16.mxu0 %v5423_v23  ;;  %2981 = vmatprep.subr.bf16.mxu1 %v5426_v24 }
 0xde1   :  { %2941 = vmatpush1.bf16.msra.mxu0 %v5429_v22  ;;  %2982 = vmatpush1.bf16.msra.mxu1 %v5432_v39 }
 0xde2   :  { %3042 = vmatprep.subr.bf16.mxu0 %v4063_v37  ;;  %3083 = vmatprep.subr.bf16.mxu1 %v4064_v8 }
 0xe97   :  { %v2844_v58 = vpop.f32.mrb[68].mxu0  ;;  %v2885_v59 = vpop.f32.mrb[100].mxu1 }
 0xe98   :  { %v2892_v62 = vadd.f32 %v2844_v58, %v1942_v27  ;;  %v2894_v46 = vadd.f32 %v2885_v59, %v2015_v11  ;;  %v2846_v32 = vpop.f32.mrb[69].mxu0  ;;  %v2887_v49 = vpop.f32.mrb[101].mxu1 }
 0xe99   :  { %v2893_v21 = vadd.f32 %v2846_v32, %v1944_v42  ;;  %v2895_v25 = vadd.f32 %v2887_v49, %v2017_v3  ;;  %v2848_v41 = vpop.f32.mrb[70].mxu0  ;;  %v2889_v4 = vpop.f32.mrb[102].mxu1 }
 0xe9a   :  { %v3484_v43 = vmul.f32 -1.442695, %v2892_v62  ;;  %v2849_v52 = vpop.f32.mrb[71].mxu0  ;;  %v2890_v30 = vpop.f32.mrb[103].mxu1  ;;  %v3486_v8 = vmul.f32 -1.442695, %v2894_v46 }
 0xe9b   :  { %v3485_v37 = vmul.f32 -1.442695, %v2893_v21 }
 0xe9c   :  { %3953 = vpow2.f32 %v3484_v43 }
 0xe9d   :  { %3955 = vpow2.f32 %v3485_v37 }
 0xe9e   :  { %3957 = vtanh.f32 %v2895_v25 }
 0xe9f   :  { %3959 = vpow2.f32 %v3486_v8 }
 0xea6   :  { %v3954_v54 = vpop.eup %3953 }
 0xea7   :  { %v2905_v57 = vadd.f32 1.0, %v3954_v54  ;;  %v3956_v56 = vpop.eup %3955 }
 0xea8   :  { %v2906_v27 = vadd.f32 1.0, %v3956_v56  ;;  %v3958_v11 = vpop.eup %3957  ;;  %v3163_v56 = vpack.c.bf16 %v5189_v1, %v5139_v17  ;;  %v3741_v17 = vld [vmem:[%s5573_s7 + $0x20] sm:$0xff]   ;;  %v3742_v1 = vld [vmem:[%s5573_s7 + $0x28] sm:$0xff]  }
 0xea9   :  { %3961 = vrcp.f32 %v2905_v57  ;;  %v3960_v42 = vpop.eup %3959  ;;  %v3738_v57 = vld [vmem:[%s5573_s7 + $0x8] sm:$0xff]  }
 0xeaa   :  { %3963 = vrcp.f32 %v2906_v27  ;;  %v2907_v59 = vadd.f32 1.0, %v3960_v42  ;;  %v3739_v27 = vld [vmem:[%s5573_s7 + $0x10] sm:$0xff]  }
 0xeab   :  { %v3743_v42 = vld [vmem:[%s5573_s7 + $0x30] sm:$0xff]  }
 0xeac   :  { %3965 = vrcp.f32 %v2907_v59  ;;  %v5672_v59 = vld [vmem:[#allocation32_spill] sm:$0xff] }
 0xeb3   :  { %v3962_v0 = vpop.eup %3961 }
 0xeb4   :  { %v2916_v3 = vmul.f32 %v3962_v0, %v3958_v11  ;;  %v3964_v58 = vpop.eup %3963  ;;  %v3740_v11 = vld [vmem:[%s5573_s7 + $0x18] sm:$0xff]  }
 0xeb5   :  { %v2915_v62 = vmul.f32 %v3964_v58, %v5336_v53  ;;  %v5668_v53 = vld [vmem:[#allocation29_spill] sm:$0xff]  ;;  %v3744_v0 = vld [vmem:[%s5573_s7 + $0x38] sm:$0xff]  }
 0xeb6   :  { %v3966_v46 = vpop.eup %3965 }
 0xeb7   :  { %v5444_v32 = vadd.f32 %v2916_v3, %v2915_v62  ;;  %v3164_v3 = vpack.c.bf16 %v5289_v7, %v5239_v34  ;;  %v1952_v62 = vadd.f32 %v5672_v59, %v5110_v9 }
 0xeb9   :  { %3967 = vtanh.f32 %v5444_v32 }
 0xec3   :  { %v3968_v49 = vpop.eup %3967 }
 0xec4   :  { %v5447_v21 = vmul.f32 %v3968_v49, %v3966_v46  ;;  %v5674_v49 = vld [vmem:[#allocation12_spill] sm:$0xff] }
 0xec6   :  { %v2925_v25 = vpack.c.bf16 %v5447_v21, %v5447_v21  ;;  %v3165_v58 = vpack.c.bf16 %v5447_v21, %v5339_v36 }
 0xec8   :  { %2959 = vmatmul.mubr.bf16.vlgmr.msra.gmra.mrb[72].mxu0 %v2925_v25  ;;  %3000 = vmatmul.mubr.bf16.vlgmr.msra.gmra.mrb[104].mxu1 %v2925_v25  ;;  %v1954_v25 = vadd.f32 %v5674_v49, %v5122_v44 }
 0xec9   :  { %3043 = vmatpush1.bf16.msra.mxu0 %v5343_v33  ;;  %3084 = vmatpush1.bf16.msra.mxu1 %v5346_v63  ;;  %v1948_v33 = vadd.f32 %v5668_v53, %v5110_v9  ;;  %v5669_v63 = vld [vmem:[#allocation21_spill] sm:$0xff] }
 0xeca   :  { %3044 = vmatprep.subr.bf16.mxu0 %v5349_v38  ;;  %3085 = vmatprep.subr.bf16.mxu1 %v5352_v55  ;;  %v2021_v38 = vadd.f32 %v5669_v63, %v5114_v5  ;;  %v5670_v55 = vld [vmem:[#allocation30_spill] sm:$0xff] }
 0xecb   :  { %3074 = vmatprep.mubr.bf16.mxu0 %v5605_v60  ;;  %3115 = vmatprep.mubr.bf16.mxu1 %v5605_v60  ;;  %v3737_v60 = vld [vmem:[%s5573_s7] sm:$0xff]  }
 0xecd   :  { %3045 = vmatpush1.bf16.msra.mxu0 %v5357_v6  ;;  %3086 = vmatpush1.bf16.msra.mxu1 %v5360_v10  ;;  %v1950_v6 = vadd.f32 %v5670_v55, %v5122_v44  ;;  %v5671_v10 = vld [vmem:[#allocation31_spill] sm:$0xff] }
 0xece   :  { %3046 = vmatprep.subr.bf16.mxu0 %v5363_v61  ;;  %3087 = vmatprep.subr.bf16.mxu1 %v5366_v2  ;;  %v2023_v61 = vadd.f32 %v5671_v10, %v5126_v13 }
 0xed1   :  { %3047 = vmatpush1.bf16.msra.mxu0 %v5369_v31  ;;  %3088 = vmatpush1.bf16.msra.mxu1 %v5372_v35 }
 0xed2   :  { %3048 = vmatprep.subr.bf16.mxu0 %v5375_v48  ;;  %3089 = vmatprep.subr.bf16.mxu1 %v5378_v14 }
 0xed5   :  { %3049 = vmatpush1.bf16.msra.mxu0 %v5381_v28  ;;  %3090 = vmatpush1.bf16.msra.mxu1 %v5384_v47 }
 0xed6   :  { %3050 = vmatprep.subr.bf16.mxu0 %v5387_v45  ;;  %3091 = vmatprep.subr.bf16.mxu1 %v5390_v40 }
 0xed9   :  { %3051 = vmatpush1.bf16.msra.mxu0 %v5393_v51  ;;  %3092 = vmatpush1.bf16.msra.mxu1 %v5396_v29 }
 0xeda   :  { %3052 = vmatprep.subr.bf16.mxu0 %v5399_v50  ;;  %3093 = vmatprep.subr.bf16.mxu1 %v5402_v26 }
 0xedd   :  { %3053 = vmatpush1.bf16.msra.mxu0 %v5405_v12  ;;  %3094 = vmatpush1.bf16.msra.mxu1 %v5408_v15 }
 0xede   :  { %3054 = vmatprep.subr.bf16.mxu0 %v5411_v18  ;;  %3095 = vmatprep.subr.bf16.mxu1 %v5414_v16 }
 0xee1   :  { %3055 = vmatpush1.bf16.msra.mxu0 %v5417_v19  ;;  %3096 = vmatpush1.bf16.msra.mxu1 %v5420_v20 }
 0xee2   :  { %3056 = vmatprep.subr.bf16.mxu0 %v5423_v23  ;;  %3097 = vmatprep.subr.bf16.mxu1 %v5426_v24 }
 0xee5   :  { %3057 = vmatpush1.bf16.msra.mxu0 %v5429_v22  ;;  %3098 = vmatpush1.bf16.msra.mxu1 %v5432_v39 }
 0xee6   :  { %3514 = vmatprep.subr.bf16.mxu0 %v3737_v60 }
 0xf9b   :  { %v2960_v2 = vpop.f32.mrb[72].mxu0  ;;  %v3001_v31 = vpop.f32.mrb[104].mxu1 }
 0xf9c   :  { %v3008_v35 = vadd.f32 %v2960_v2, %v1948_v33  ;;  %v3010_v48 = vadd.f32 %v3001_v31, %v2021_v38  ;;  %v2962_v14 = vpop.f32.mrb[73].mxu0  ;;  %v3003_v28 = vpop.f32.mrb[105].mxu1 }
 0xf9d   :  { %v3009_v47 = vadd.f32 %v2962_v14, %v1950_v6  ;;  %v3011_v45 = vadd.f32 %v3003_v28, %v2023_v61  ;;  %v2964_v40 = vpop.f32.mrb[74].mxu0  ;;  %v3005_v51 = vpop.f32.mrb[106].mxu1 }
 0xf9e   :  { %v3487_v29 = vmul.f32 -1.442695, %v3008_v35  ;;  %v2965_v50 = vpop.f32.mrb[75].mxu0  ;;  %v3006_v26 = vpop.f32.mrb[107].mxu1  ;;  %v3489_v15 = vmul.f32 -1.442695, %v3010_v48 }
 0xf9f   :  { %v3488_v12 = vmul.f32 -1.442695, %v3009_v47 }
 0xfa0   :  { %3969 = vpow2.f32 %v3487_v29  ;;  %v3493_v29 = vld [vmem:[%s5574_s8] ss:$0 sm:$0xff] }
 0xfa1   :  { %3971 = vpow2.f32 %v3488_v12 }
 0xfa2   :  { %3973 = vtanh.f32 %v3011_v45 }
 0xfa3   :  { %3975 = vpow2.f32 %v3489_v15 }
 0xfaa   :  { %v3970_v18 = vpop.eup %3969 }
 0xfab   :  { %v3021_v16 = vadd.f32 1.0, %v3970_v18  ;;  %v3972_v19 = vpop.eup %3971 }
 0xfac   :  { %v3022_v20 = vadd.f32 1.0, %v3972_v19  ;;  %v3974_v23 = vpop.eup %3973 }
 0xfad   :  { %3977 = vrcp.f32 %v3021_v16  ;;  %v3976_v24 = vpop.eup %3975 }
 0xfae   :  { %3979 = vrcp.f32 %v3022_v20  ;;  %v3023_v4 = vadd.f32 1.0, %v3976_v24 }
 0xfb0   :  { %3981 = vrcp.f32 %v3023_v4 }
 0xfb7   :  { %v3978_v22 = vpop.eup %3977 }
 0xfb8   :  { %v3032_v39 = vmul.f32 %v3978_v22, %v3974_v23  ;;  %v3980_v41 = vpop.eup %3979 }
 0xfb9   :  { %v3031_v43 = vmul.f32 %v3980_v41, %v5444_v32  ;;  %v5673_v32 = vld [vmem:[#allocation33_spill] sm:$0xff] }
 0xfba   :  { %v3982_v30 = vpop.eup %3981  ;;  %v2025_v46 = vadd.f32 %v5673_v32, %v5114_v5 }
 0xfbb   :  { %v5495_v52 = vadd.f32 %v3032_v39, %v3031_v43 }
 0xfbd   :  { %3983 = vtanh.f32 %v5495_v52 }
 0xfc7   :  { %v3984_v37 = vpop.eup %3983 }
 0xfc8   :  { %v5498_v8 = vmul.f32 %v3984_v37, %v3982_v30 }
 0xfca   :  { %v3041_v54 = vpack.c.bf16 %v5498_v8, %v5498_v8 }
 0xfcc   :  { %3075 = vmatmul.mubr.bf16.vlgmr.msra.gmra.mrb[76].mxu0 %v3041_v54  ;;  %3116 = vmatmul.mubr.bf16.vlgmr.msra.gmra.mrb[108].mxu1 %v3041_v54 }
 0xfcd   :  { %3515 = vmatpush3.bf16.msra.mxu0 %v3737_v60  ;;  %3530 = vmatprep.mubr.bf16.mxu0 %v3163_v56  ;;  %v5675_v60 = vld [vmem:[#allocation34_spill] sm:$0xff] }
 0xfce   :  { %3516 = vmatprep.subr.bf16.mxu0 %v3738_v57  ;;  %v2027_v53 = vadd.f32 %v5675_v60, %v5126_v13 }
 0xfd1   :  { %3517 = vmatpush3.bf16.msra.mxu0 %v3738_v57 }
 0xfd2   :  { %3518 = vmatprep.subr.bf16.mxu0 %v3739_v27 }
 0xfd5   :  { %3519 = vmatpush3.bf16.msra.mxu0 %v3739_v27 }
 0xfd6   :  { %3520 = vmatprep.subr.bf16.mxu0 %v3740_v11 }
 0xfd9   :  { %3521 = vmatpush3.bf16.msra.mxu0 %v3740_v11 }
 0xfda   :  { %3522 = vmatprep.subr.bf16.mxu0 %v3741_v17 }
 0xfdd   :  { %3523 = vmatpush3.bf16.msra.mxu0 %v3741_v17 }
 0xfde   :  { %3524 = vmatprep.subr.bf16.mxu0 %v3742_v1 }
 0xfe1   :  { %3525 = vmatpush3.bf16.msra.mxu0 %v3742_v1 }
 0xfe2   :  { %3526 = vmatprep.subr.bf16.mxu0 %v3743_v42 }
 0xfe5   :  { %3527 = vmatpush3.bf16.msra.mxu0 %v3743_v42 }
 0xfe6   :  { %3528 = vmatprep.subr.bf16.mxu0 %v3744_v0 }
 0xfe9   :  { %3529 = vmatpush3.bf16.msra.mxu0 %v3744_v0 }
 0xfec   :  { %3531 = vmatmul.mubr.bf16.vlgmr.msra.gmra.mrb[80].mxu0 %v3164_v3 }
 0xfed   :  { %3534 = vmatprep.mubr.bf16.mxu0 %v3165_v58 }
0x109f   :  { %v3076_v33 = vpop.f32.mrb[76].mxu0  ;;  %v3117_v63 = vpop.f32.mrb[108].mxu1 }
0x10a0   :  { %v3124_v34 = vadd.f32 %v3076_v33, %v1952_v62  ;;  %v3126_v7 = vadd.f32 %v3117_v63, %v2025_v46  ;;  %v3078_v38 = vpop.f32.mrb[77].mxu0  ;;  %v3119_v36 = vpop.f32.mrb[109].mxu1 }
0x10a1   :  { %v3125_v21 = vadd.f32 %v3078_v38, %v1954_v25  ;;  %v3127_v55 = vadd.f32 %v3119_v36, %v2027_v53  ;;  %v3080_v6 = vpop.f32.mrb[78].mxu0  ;;  %v3121_v10 = vpop.f32.mrb[110].mxu1 }
0x10a2   :  { %v3490_v9 = vmul.f32 -1.442695, %v3124_v34  ;;  %v3081_v61 = vpop.f32.mrb[79].mxu0  ;;  %v3122_v2 = vpop.f32.mrb[111].mxu1  ;;  %v3492_v44 = vmul.f32 -1.442695, %v3126_v7 }
0x10a3   :  { %v3491_v5 = vmul.f32 -1.442695, %v3125_v21 }
0x10a4   :  { %3985 = vpow2.f32 %v3490_v9 }
0x10a5   :  { %3987 = vpow2.f32 %v3491_v5 }
0x10a6   :  { %3989 = vtanh.f32 %v3127_v55 }
0x10a7   :  { %3991 = vpow2.f32 %v3492_v44 }
0x10ae   :  { %v3986_v31 = vpop.eup %3985 }
0x10af   :  { %v3137_v35 = vadd.f32 1.0, %v3986_v31  ;;  %v3988_v13 = vpop.eup %3987 }
0x10b0   :  { %v3138_v48 = vadd.f32 1.0, %v3988_v13  ;;  %v3990_v14 = vpop.eup %3989 }
0x10b1   :  { %3993 = vrcp.f32 %v3137_v35  ;;  %v3992_v28 = vpop.eup %3991 }
0x10b2   :  { %3995 = vrcp.f32 %v3138_v48  ;;  %v3139_v51 = vadd.f32 1.0, %v3992_v28 }
0x10b4   :  { %3997 = vrcp.f32 %v3139_v51 }
0x10bb   :  { %v3994_v47 = vpop.eup %3993 }
0x10bc   :  { %v3148_v45 = vmul.f32 %v3994_v47, %v3990_v14  ;;  %v3996_v40 = vpop.eup %3995 }
0x10bd   :  { %v3147_v50 = vmul.f32 %v3996_v40, %v5495_v52 }
0x10be   :  { %v3998_v22 = vpop.eup %3997 }
0x10bf   :  { %v3532_v26 = vpop.f32.mrb[80].mxu0  ;;  %v3149_v12 = vadd.f32 %v3148_v45, %v3147_v50 }
0x10c0   :  { %v3281_v15 = vadd.f32 %v3532_v26, %v3493_v29  ;;  %v3272_v18 = vpop.f32.mrb[81].mxu0 }
0x10c1   :  { %v3273_v16 = vadd.f32 %v3493_v29, %v3272_v18  ;;  %v3533_v19 = vpop.f32.mrb[82].mxu0  ;;  %3999 = vtanh.f32 %v3149_v12 }
0x10c2   :  { %3305 = vst [vmem:[%s5575_s9 + $0x10] sm:$0xff] %v3281_v15  ;;  %v3284_v20 = vadd.f32 %v3533_v19, %v3493_v29  ;;  %v3275_v23 = vpop.f32.mrb[83].mxu0 }
0x10c3   :  { %3303 = vst [vmem:[%s5575_s9] sm:$0xff] %v3273_v16  ;;  %v3276_v24 = vadd.f32 %v3493_v29, %v3275_v23 }
0x10c4   :  { %3306 = vst [vmem:[%s5575_s9 + $0x18] sm:$0xff] %v3284_v20 }
0x10c5   :  { %3304 = vst [vmem:[%s5575_s9 + $0x8] sm:$0xff] %v3276_v24 }
0x10cb   :  { %v4000_v39 = vpop.eup %3999 }
0x10cc   :  { %v3151_v41 = vmul.f32 %v4000_v39, %v3998_v22 }
0x10ce   :  { %v3166_v4 = vpack.c.bf16 %v3151_v41, %v5498_v8 }
0x10d0   :  { %3535 = vmatmul.mubr.bf16.gmra.mrb[84].mxu0 %v3166_v4 }
0x11a3   :  { %v3536_v43 = vpop.f32.mrb[84].mxu0 }
0x11a4   :  { %v3297_v52 = vadd.f32 %v3536_v43, %v3493_v29  ;;  %v3288_v30 = vpop.f32.mrb[85].mxu0 }
0x11a5   :  { %v3289_v37 = vadd.f32 %v3493_v29, %v3288_v30  ;;  %v3537_v54 = vpop.f32.mrb[86].mxu0 }
0x11a6   :  { %3309 = vst [vmem:[%s5575_s9 + $0x30] sm:$0xff] %v3297_v52  ;;  %v3300_v57 = vadd.f32 %v3537_v54, %v3493_v29  ;;  %v3291_v56 = vpop.f32.mrb[87].mxu0 }
0x11a7   :  { %3307 = vst [vmem:[%s5575_s9 + $0x20] sm:$0xff] %v3289_v37  ;;  %v3292_v27 = vadd.f32 %v3493_v29, %v3291_v56 }
0x11a8   :  { %3310 = vst [vmem:[%s5575_s9 + $0x38] sm:$0xff] %v3300_v57 }
0x11a9   :  { %3308 = vst [vmem:[%s5575_s9 + $0x28] sm:$0xff] %v3292_v27 }
0x11aa   :  { %3315 = vsyncpa [#allocation6], 1 }
0x11ab   :  { %3316 = vsyncpa [#allocation8], 1 }

</bundles_post_ra>
